<compile_context>
chip_gen: v7x
topology: tpu7x:2x2x1
jax: 0.10.0
libtpu: 0.0.40
codegen_flags: <defaults>
</compile_context>

<pallas_src>
import functools

import jax
import jax.numpy as jnp
import numpy as np
from jax import lax
from jax.experimental import pallas as pl
from jax.experimental.pallas import tpu as pltpu


# ----------------------------- fused Pallas kernel --------------------------

def _st_pointnet_kernel(
    # inputs
    x_ref,
    s_pos_w_ref, s_pos_b_ref,
    s_w0_ref, s_b0_ref, s_w1_ref, s_b1_ref, s_ws_ref,
    s_fcc_w_ref, s_fcc_b_ref,
    t_pos_w_ref, t_pos_b_ref,
    t_w0_ref, t_b0_ref, t_w1_ref, t_b1_ref, t_ws_ref,
    t_fcc_w_ref, t_fcc_b_ref,
    f_w_ref, f_b_ref,
    # outputs
    spatial_out_ref, st_out_ref,
    *, T, P, D, H, C,
):
    TP = T * P
    f32 = jnp.float32

    def relu(a):
        return jnp.maximum(a, 0.0)

    def mm(a, w):
        return jnp.dot(a, w, preferred_element_type=f32)

    def pool_points(a2d, width):
        # (T*P, width) -> (T, width): max over the P points of each time step.
        return jnp.max(a2d.reshape(T, P, width), axis=1)

    def add_per_step(a2d, per_t, width):
        # add a per-time-step (T, width) row to each of its P point rows.
        return (a2d.reshape(T, P, width) + per_t[:, None, :]).reshape(TP, width)

    def resblock_plain(inp, w0, b0, w1, b1, ws):
        # ResnetBlockFC: x @ Ws + fc_1(relu(fc_0(relu(x)))); shortcut bias-free.
        net0 = mm(relu(inp), w0) + b0
        dx = mm(relu(net0), w1) + b1
        return mm(inp, ws) + dx

    x2 = x_ref[0].reshape(TP, D)                                     # (T*P, D)

    # ------------------------------ spatial branch --------------------------
    net = mm(x2, s_pos_w_ref[...]) + s_pos_b_ref[...]                # (TP, 2H)
    net = resblock_plain(net, s_w0_ref[0], s_b0_ref[0],
                         s_w1_ref[0], s_b1_ref[0], s_ws_ref[0])      # (TP, H)

    for i in range(1, 5):
        # torch: cat([net, pooled.expand(...)], -1) -> spatial_block_i
        w0 = s_w0_ref[i]                                             # (2H, H)
        ws = s_ws_ref[i]                                             # (2H, H)
        pooled = pool_points(net, H)                                 # (T, H)
        fc0 = mm(relu(net), w0[:H]) + s_b0_ref[i]                    # (TP, H)
        fc0 = add_per_step(fc0, mm(relu(pooled), w0[H:]), H)
        dx = mm(relu(fc0), s_w1_ref[i]) + s_b1_ref[i]
        sc = mm(net, ws[:H])
        sc = add_per_step(sc, mm(pooled, ws[H:]), H)
        net = sc + dx

    pooled = pool_points(net, H)                                     # (T, H)
    spatial_c = mm(relu(pooled), s_fcc_w_ref[...]) + s_fcc_b_ref[...]  # (T, C)
    spatial_out_ref[0] = spatial_c

    # ------------------------------ temporal branch -------------------------
    # temporal_fc_pos(cat([x, t])) == x @ W[:D] + t * W[D] + b  (t const / step)
    t_pos_w = t_pos_w_ref[...]                                       # (D+1, 3H)
    # TODO(synk): original torch divides by (T-1) and yields NaN for T == 1;
    # here T == 1 maps to t == 0 instead.
    t_scale = 1.0 / (T - 1) if T > 1 else 0.0
    step = lax.broadcasted_iota(jnp.int32, (T, 3 * H), 0).astype(f32)
    t_contrib = (step * t_scale) * t_pos_w[D:]                       # (T, 3H)
    net = mm(x2, t_pos_w[:D]) + t_pos_b_ref[...]                     # (TP, 3H)
    net = add_per_step(net, t_contrib, 3 * H)

    net = resblock_plain(net, t_w0_ref[0], t_b0_ref[0],
                         t_w1_ref[0], t_b1_ref[0], t_ws_ref[0])      # (TP, H)

    for i in range(1, 5):
        # torch: cat([net, pooled.expand, pooled_time.expand], -1) -> block_i
        w0 = t_w0_ref[i]                                             # (3H, H)
        ws = t_ws_ref[i]                                             # (3H, H)
        pooled = pool_points(net, H)                                 # (T, H)
        pooled_time = jnp.max(pooled, axis=0, keepdims=True)         # (1, H)
        fc0 = mm(relu(net), w0[:H]) + t_b0_ref[i]
        fc0_p = (mm(relu(pooled), w0[H:2 * H])
                 + mm(relu(pooled_time), w0[2 * H:]))                # (T, H)
        fc0 = add_per_step(fc0, fc0_p, H)
        dx = mm(relu(fc0), t_w1_ref[i]) + t_b1_ref[i]
        sc = mm(net, ws[:H])
        sc_p = mm(pooled, ws[H:2 * H]) + mm(pooled_time, ws[2 * H:])
        sc = add_per_step(sc, sc_p, H)
        net = sc + dx

    pooled = pool_points(net, H)                                     # (T, H)
    temporal_c = mm(relu(pooled), t_fcc_w_ref[...]) + t_fcc_b_ref[...]  # (T, C)

    # final fc_c on cat([spatial_c, temporal_c]) -- split-weight form again.
    f_w = f_w_ref[...]                                               # (2C, C)
    st_c = mm(spatial_c, f_w[:C]) + mm(temporal_c, f_w[C:]) + f_b_ref[...]
    st_out_ref[0] = st_c


# ----------------------------- wrapper ---------------------------------------

_WEIGHT_ORDER = (
    "s_pos_w", "s_pos_b",
    "s_w0", "s_b0", "s_w1", "s_b1", "s_ws",
    "s_fcc_w", "s_fcc_b",
    "t_pos_w", "t_pos_b",
    "t_w0", "t_b0", "t_w1", "t_b1", "t_ws",
    "t_fcc_w", "t_fcc_b",
    "f_w", "f_b",
)


def forward(params, x):
    """x: (B, T, P, dim) -> (spatial_c (B,T,C), spatiotemporal_c (B,T,C))."""
    B, T, P, D = x.shape
    H, C = params["s_fcc_w"].shape            # static (shape-derived, jit-safe)

    kernel = functools.partial(_st_pointnet_kernel, T=T, P=P, D=D, H=H, C=C)

    def full_spec(arr):
        # Whole (small) weight resident in VMEM; constant block index so Pallas
        # does not re-copy it across grid steps.
        return pl.BlockSpec(arr.shape, lambda b, n=arr.ndim: (0,) * n)

    weights = [params[k] for k in _WEIGHT_ORDER]
    in_specs = [pl.BlockSpec((1, T, P, D), lambda b: (b, 0, 0, 0))]
    in_specs += [full_spec(w) for w in weights]
    out_specs = (pl.BlockSpec((1, T, C), lambda b: (b, 0, 0)),
                 pl.BlockSpec((1, T, C), lambda b: (b, 0, 0)))
    out_shape = (jax.ShapeDtypeStruct((B, T, C), jnp.float32),
                 jax.ShapeDtypeStruct((B, T, C), jnp.float32))

    spatial_c, st_c = pl.pallas_call(
        kernel,
        grid=(B,),
        in_specs=in_specs,
        out_specs=out_specs,
        out_shape=out_shape,
        compiler_params=pltpu.CompilerParams(
            dimension_semantics=("parallel",)),
    )(x, *weights)
    return spatial_c, st_c


# ----------------------------- parameters ------------------------------------

def _uniform(key, shape, fan_in):
    s = 1.0 / np.sqrt(fan_in)
    return jax.random.uniform(key, shape, jnp.float32, -s, s)


def init_params(key, c_dim=16, dim=3, hidden_dim=32):
    """PyTorch-default-style init. Weights stored (in, out); the 5 resblocks of
    each branch are stacked along a leading axis. Only arrays in the dict."""
    H, C = hidden_dim, c_dim
    ks = iter(jax.random.split(key, 32))
    p = {}
    # spatial branch
    p["s_pos_w"] = _uniform(next(ks), (dim, 2 * H), dim)
    p["s_pos_b"] = _uniform(next(ks), (1, 2 * H), dim)
    p["s_w0"] = _uniform(next(ks), (5, 2 * H, H), 2 * H)
    p["s_b0"] = _uniform(next(ks), (5, 1, H), 2 * H)
    p["s_w1"] = _uniform(next(ks), (5, H, H), H)
    p["s_b1"] = _uniform(next(ks), (5, 1, H), H)
    p["s_ws"] = _uniform(next(ks), (5, 2 * H, H), 2 * H)   # shortcut, no bias
    p["s_fcc_w"] = _uniform(next(ks), (H, C), H)
    p["s_fcc_b"] = _uniform(next(ks), (1, C), H)
    # temporal branch (pool_once=False path)
    p["t_pos_w"] = _uniform(next(ks), (dim + 1, 3 * H), dim + 1)
    p["t_pos_b"] = _uniform(next(ks), (1, 3 * H), dim + 1)
    p["t_w0"] = _uniform(next(ks), (5, 3 * H, H), 3 * H)
    p["t_b0"] = _uniform(next(ks), (5, 1, H), 3 * H)
    p["t_w1"] = _uniform(next(ks), (5, H, H), H)
    p["t_b1"] = _uniform(next(ks), (5, 1, H), H)
    p["t_ws"] = _uniform(next(ks), (5, 3 * H, H), 3 * H)
    p["t_fcc_w"] = _uniform(next(ks), (H, C), H)
    p["t_fcc_b"] = _uniform(next(ks), (1, C), H)
    # final fc_c
    p["f_w"] = _uniform(next(ks), (2 * C, C), 2 * C)
    p["f_b"] = _uniform(next(ks), (1, C), 2 * C)
    return p


# ----------------------------- pure-JAX reference -----------------------------

def _ref_forward(params, x):
    """XLA reference using the original concat formulation of the module."""
    B, T, P, D = x.shape
    H, C = params["s_fcc_w"].shape
    hp = lax.Precision.HIGHEST

    def mm(a, w):
        return jnp.matmul(a, w, precision=hp)

    def relu(a):
        return jnp.maximum(a, 0.0)

    def rb(a, w0, b0, w1, b1, ws):
        net = mm(relu(a), w0) + b0
        dx = mm(relu(net), w1) + b1
        return mm(a, ws) + dx

    tvals = jnp.arange(T, dtype=jnp.float32) / max(T - 1, 1)
    t = jnp.broadcast_to(tvals[None, :, None, None], (B, T, P, 1))
    x_t = jnp.concatenate([x, t], axis=3)

    # spatial
    net = mm(x, params["s_pos_w"]) + params["s_pos_b"][0]
    net = rb(net, params["s_w0"][0], params["s_b0"][0, 0],
             params["s_w1"][0], params["s_b1"][0, 0], params["s_ws"][0])
    for i in range(1, 5):
        pooled = jnp.max(net, axis=2, keepdims=True)
        cat = jnp.concatenate([net, jnp.broadcast_to(pooled, net.shape)], axis=3)
        net = rb(cat, params["s_w0"][i], params["s_b0"][i, 0],
                 params["s_w1"][i], params["s_b1"][i, 0], params["s_ws"][i])
    net = jnp.max(net, axis=2)
    spatial_c = mm(relu(net), params["s_fcc_w"]) + params["s_fcc_b"][0]

    # temporal
    net = mm(x_t, params["t_pos_w"]) + params["t_pos_b"][0]
    net = rb(net, params["t_w0"][0], params["t_b0"][0, 0],
             params["t_w1"][0], params["t_b1"][0, 0], params["t_ws"][0])
    for i in range(1, 5):
        pooled = jnp.max(net, axis=2, keepdims=True)
        pooled_time = jnp.max(pooled, axis=1, keepdims=True)
        cat = jnp.concatenate(
            [net,
             jnp.broadcast_to(pooled, net.shape),
             jnp.broadcast_to(pooled_time, net.shape)], axis=3)
        net = rb(cat, params["t_w0"][i], params["t_b0"][i, 0],
                 params["t_w1"][i], params["t_b1"][i, 0], params["t_ws"][i])
    net = jnp.max(net, axis=2)
    temporal_c = mm(relu(net), params["t_fcc_w"]) + params["t_fcc_b"][0]

    st = jnp.concatenate([spatial_c, temporal_c], axis=2)
    spatiotemporal_c = mm(st, params["f_w"]) + params["f_b"][0]
    return spatial_c, spatiotemporal_c


# ----------------------------- main -------------------------------------------

if __name__ == "__main__":
    key = jax.random.PRNGKey(0)
    kx, kp = jax.random.split(key)

    B, T, P, D = 2, 4, 8, 3          # batch, n_steps, n_pts, dim
    HIDDEN, CDIM = 32, 16

    x = jax.random.normal(kx, (B, T, P, D), dtype=jnp.float32)
    params = init_params(kp, c_dim=CDIM, dim=D, hidden_dim=HIDDEN)

    spatial_c, st_c = jax.jit(forward)(params, x)
    jax.block_until_ready((spatial_c, st_c))

    ref_spatial_c, ref_st_c = _ref_forward(params, x)
    np.testing.assert_allclose(np.asarray(spatial_c), np.asarray(ref_spatial_c),
                               rtol=2e-3, atol=2e-3)
    np.testing.assert_allclose(np.asarray(st_c), np.asarray(ref_st_c),
                               rtol=2e-3, atol=2e-3)

    assert spatial_c.shape == (B, T, CDIM)
    assert st_c.shape == (B, T, CDIM)
    print("KERNEL_OK")
</pallas_src>

<mosaic_0001>
module attributes {stable_mosaic.version = 11 : i64} {
  func.func @_st_pointnet_kernel(%arg0: i32, %arg1: memref<1x4x8x3xf32, #tpu.memory_space<vmem>>, %arg2: memref<3x64xf32, #tpu.memory_space<vmem>>, %arg3: memref<1x64xf32, #tpu.memory_space<vmem>>, %arg4: memref<5x64x32xf32, #tpu.memory_space<vmem>>, %arg5: memref<5x1x32xf32, #tpu.memory_space<vmem>>, %arg6: memref<5x32x32xf32, #tpu.memory_space<vmem>>, %arg7: memref<5x1x32xf32, #tpu.memory_space<vmem>>, %arg8: memref<5x64x32xf32, #tpu.memory_space<vmem>>, %arg9: memref<32x16xf32, #tpu.memory_space<vmem>>, %arg10: memref<1x16xf32, #tpu.memory_space<vmem>>, %arg11: memref<4x96xf32, #tpu.memory_space<vmem>>, %arg12: memref<1x96xf32, #tpu.memory_space<vmem>>, %arg13: memref<5x96x32xf32, #tpu.memory_space<vmem>>, %arg14: memref<5x1x32xf32, #tpu.memory_space<vmem>>, %arg15: memref<5x32x32xf32, #tpu.memory_space<vmem>>, %arg16: memref<5x1x32xf32, #tpu.memory_space<vmem>>, %arg17: memref<5x96x32xf32, #tpu.memory_space<vmem>>, %arg18: memref<32x16xf32, #tpu.memory_space<vmem>>, %arg19: memref<1x16xf32, #tpu.memory_space<vmem>>, %arg20: memref<32x16xf32, #tpu.memory_space<vmem>>, %arg21: memref<1x16xf32, #tpu.memory_space<vmem>>, %arg22: memref<1x4x16xf32, #tpu.memory_space<vmem>>, %arg23: memref<1x4x16xf32, #tpu.memory_space<vmem>>) attributes {dimension_semantics = [#tpu.dimension_semantics<parallel>], iteration_bounds = array<i64: 2>, scalar_prefetch = 0 : i64, scratch_operands = 0 : i64, tpu.core_type = #tpu.core_type<tc>, window_params = [{transform_indices = @transform_0, window_bounds = array<i64: 1, 4, 8, 3>}, {pipeline_mode = #tpu.pipeline_mode<synchronous>, transform_indices = @transform_1, window_bounds = array<i64: 3, 64>}, {pipeline_mode = #tpu.pipeline_mode<synchronous>, transform_indices = @transform_2, window_bounds = array<i64: 1, 64>}, {pipeline_mode = #tpu.pipeline_mode<synchronous>, transform_indices = @transform_3, window_bounds = array<i64: 5, 64, 32>}, {pipeline_mode = #tpu.pipeline_mode<synchronous>, transform_indices = @transform_4, window_bounds = array<i64: 5, 1, 32>}, {pipeline_mode = #tpu.pipeline_mode<synchronous>, transform_indices = @transform_5, window_bounds = array<i64: 5, 32, 32>}, {pipeline_mode = #tpu.pipeline_mode<synchronous>, transform_indices = @transform_6, window_bounds = array<i64: 5, 1, 32>}, {pipeline_mode = #tpu.pipeline_mode<synchronous>, transform_indices = @transform_7, window_bounds = array<i64: 5, 64, 32>}, {pipeline_mode = #tpu.pipeline_mode<synchronous>, transform_indices = @transform_8, window_bounds = array<i64: 32, 16>}, {pipeline_mode = #tpu.pipeline_mode<synchronous>, transform_indices = @transform_9, window_bounds = array<i64: 1, 16>}, {pipeline_mode = #tpu.pipeline_mode<synchronous>, transform_indices = @transform_10, window_bounds = array<i64: 4, 96>}, {pipeline_mode = #tpu.pipeline_mode<synchronous>, transform_indices = @transform_11, window_bounds = array<i64: 1, 96>}, {pipeline_mode = #tpu.pipeline_mode<synchronous>, transform_indices = @transform_12, window_bounds = array<i64: 5, 96, 32>}, {pipeline_mode = #tpu.pipeline_mode<synchronous>, transform_indices = @transform_13, window_bounds = array<i64: 5, 1, 32>}, {pipeline_mode = #tpu.pipeline_mode<synchronous>, transform_indices = @transform_14, window_bounds = array<i64: 5, 32, 32>}, {pipeline_mode = #tpu.pipeline_mode<synchronous>, transform_indices = @transform_15, window_bounds = array<i64: 5, 1, 32>}, {pipeline_mode = #tpu.pipeline_mode<synchronous>, transform_indices = @transform_16, window_bounds = array<i64: 5, 96, 32>}, {pipeline_mode = #tpu.pipeline_mode<synchronous>, transform_indices = @transform_17, window_bounds = array<i64: 32, 16>}, {pipeline_mode = #tpu.pipeline_mode<synchronous>, transform_indices = @transform_18, window_bounds = array<i64: 1, 16>}, {pipeline_mode = #tpu.pipeline_mode<synchronous>, transform_indices = @transform_19, window_bounds = array<i64: 32, 16>}, {pipeline_mode = #tpu.pipeline_mode<synchronous>, transform_indices = @transform_20, window_bounds = array<i64: 1, 16>}, {transform_indices = @transform_21, window_bounds = array<i64: 1, 4, 16>}, {transform_indices = @transform_22, window_bounds = array<i64: 1, 4, 16>}]} {
    %c0 = arith.constant 0 : index
    %c0_0 = arith.constant 0 : index
    %c0_1 = arith.constant 0 : index
    %c0_2 = arith.constant 0 : index
    %0 = vector.load %arg1[%c0, %c0_0, %c0_1, %c0_2] : memref<1x4x8x3xf32, #tpu.memory_space<vmem>>, vector<1x4x8x3xf32>
    %1 = vector.shape_cast %0 : vector<1x4x8x3xf32> to vector<4x8x3xf32>
    %2 = vector.shape_cast %1 : vector<4x8x3xf32> to vector<32x3xf32>
    %c0_3 = arith.constant 0 : index
    %c0_4 = arith.constant 0 : index
    %3 = vector.load %arg2[%c0_3, %c0_4] : memref<3x64xf32, #tpu.memory_space<vmem>>, vector<3x64xf32>
    %cst = arith.constant dense<0.000000e+00> : vector<32x64xf32>
    %4 = tpu.matmul %2, %3, %cst {dimension_numbers = #tpu.dot_dimension_numbers<[1], [0], [0], [1], [0, 0, 1, 1], [], []>} : vector<32x3xf32>, vector<3x64xf32>, vector<32x64xf32> -> vector<32x64xf32>
    %c0_5 = arith.constant 0 : index
    %c0_6 = arith.constant 0 : index
    %5 = vector.load %arg3[%c0_5, %c0_6] : memref<1x64xf32, #tpu.memory_space<vmem>>, vector<1x64xf32>
    %6 = vector.broadcast %5 : vector<1x64xf32> to vector<32x64xf32>
    %7 = arith.addf %4, %6 : vector<32x64xf32>
    %c0_7 = arith.constant 0 : index
    %c0_8 = arith.constant 0 : index
    %c0_9 = arith.constant 0 : index
    %8 = vector.load %arg4[%c0_7, %c0_8, %c0_9] : memref<5x64x32xf32, #tpu.memory_space<vmem>>, vector<1x64x32xf32>
    %9 = vector.shape_cast %8 : vector<1x64x32xf32> to vector<64x32xf32>
    %c0_10 = arith.constant 0 : index
    %c0_11 = arith.constant 0 : index
    %c0_12 = arith.constant 0 : index
    %10 = vector.load %arg5[%c0_10, %c0_11, %c0_12] : memref<5x1x32xf32, #tpu.memory_space<vmem>>, vector<1x1x32xf32>
    %11 = vector.shape_cast %10 : vector<1x1x32xf32> to vector<1x32xf32>
    %c0_13 = arith.constant 0 : index
    %c0_14 = arith.constant 0 : index
    %c0_15 = arith.constant 0 : index
    %12 = vector.load %arg6[%c0_13, %c0_14, %c0_15] : memref<5x32x32xf32, #tpu.memory_space<vmem>>, vector<1x32x32xf32>
    %13 = vector.shape_cast %12 : vector<1x32x32xf32> to vector<32x32xf32>
    %c0_16 = arith.constant 0 : index
    %c0_17 = arith.constant 0 : index
    %c0_18 = arith.constant 0 : index
    %14 = vector.load %arg7[%c0_16, %c0_17, %c0_18] : memref<5x1x32xf32, #tpu.memory_space<vmem>>, vector<1x1x32xf32>
    %15 = vector.shape_cast %14 : vector<1x1x32xf32> to vector<1x32xf32>
    %c0_19 = arith.constant 0 : index
    %c0_20 = arith.constant 0 : index
    %c0_21 = arith.constant 0 : index
    %16 = vector.load %arg8[%c0_19, %c0_20, %c0_21] : memref<5x64x32xf32, #tpu.memory_space<vmem>>, vector<1x64x32xf32>
    %17 = vector.shape_cast %16 : vector<1x64x32xf32> to vector<64x32xf32>
    %cst_22 = arith.constant 0.000000e+00 : f32
    %18 = vector.broadcast %cst_22 : f32 to vector<32x64xf32>
    %19 = arith.maximumf %7, %18 : vector<32x64xf32>
    %cst_23 = arith.constant dense<0.000000e+00> : vector<32x32xf32>
    %20 = tpu.matmul %19, %9, %cst_23 {dimension_numbers = #tpu.dot_dimension_numbers<[1], [0], [0], [1], [0, 0, 1, 1], [], []>} : vector<32x64xf32>, vector<64x32xf32>, vector<32x32xf32> -> vector<32x32xf32>
    %21 = vector.broadcast %11 : vector<1x32xf32> to vector<32x32xf32>
    %22 = arith.addf %20, %21 : vector<32x32xf32>
    %cst_24 = arith.constant 0.000000e+00 : f32
    %23 = vector.broadcast %cst_24 : f32 to vector<32x32xf32>
    %24 = arith.maximumf %22, %23 : vector<32x32xf32>
    %cst_25 = arith.constant dense<0.000000e+00> : vector<32x32xf32>
    %25 = tpu.matmul %24, %13, %cst_25 {dimension_numbers = #tpu.dot_dimension_numbers<[1], [0], [0], [1], [0, 0, 1, 1], [], []>} : vector<32x32xf32>, vector<32x32xf32>, vector<32x32xf32> -> vector<32x32xf32>
    %26 = vector.broadcast %15 : vector<1x32xf32> to vector<32x32xf32>
    %27 = arith.addf %25, %26 : vector<32x32xf32>
    %cst_26 = arith.constant dense<0.000000e+00> : vector<32x32xf32>
    %28 = tpu.matmul %7, %17, %cst_26 {dimension_numbers = #tpu.dot_dimension_numbers<[1], [0], [0], [1], [0, 0, 1, 1], [], []>} : vector<32x64xf32>, vector<64x32xf32>, vector<32x32xf32> -> vector<32x32xf32>
    %29 = arith.addf %28, %27 : vector<32x32xf32>
    %c1 = arith.constant 1 : index
    %c0_27 = arith.constant 0 : index
    %c0_28 = arith.constant 0 : index
    %30 = vector.load %arg4[%c1, %c0_27, %c0_28] : memref<5x64x32xf32, #tpu.memory_space<vmem>>, vector<1x64x32xf32>
    %31 = vector.shape_cast %30 : vector<1x64x32xf32> to vector<64x32xf32>
    %c1_29 = arith.constant 1 : index
    %c0_30 = arith.constant 0 : index
    %c0_31 = arith.constant 0 : index
    %32 = vector.load %arg8[%c1_29, %c0_30, %c0_31] : memref<5x64x32xf32, #tpu.memory_space<vmem>>, vector<1x64x32xf32>
    %33 = vector.shape_cast %32 : vector<1x64x32xf32> to vector<64x32xf32>
    %34 = vector.shape_cast %29 : vector<32x32xf32> to vector<4x8x32xf32>
    %cst_32 = arith.constant dense<0xFF800000> : vector<4x32xf32>
    %35 = vector.multi_reduction <maximumf>, %34, %cst_32 [1] : vector<4x8x32xf32> to vector<4x32xf32>
    %cst_33 = arith.constant 0.000000e+00 : f32
    %36 = vector.broadcast %cst_33 : f32 to vector<32x32xf32>
    %37 = arith.maximumf %29, %36 : vector<32x32xf32>
    %38 = vector.extract_strided_slice %31 {offsets = [0, 0], sizes = [32, 32], strides = [1, 1]} : vector<64x32xf32> to vector<32x32xf32>
    %cst_34 = arith.constant dense<0.000000e+00> : vector<32x32xf32>
    %39 = tpu.matmul %37, %38, %cst_34 {dimension_numbers = #tpu.dot_dimension_numbers<[1], [0], [0], [1], [0, 0, 1, 1], [], []>} : vector<32x32xf32>, vector<32x32xf32>, vector<32x32xf32> -> vector<32x32xf32>
    %c1_35 = arith.constant 1 : index
    %c0_36 = arith.constant 0 : index
    %c0_37 = arith.constant 0 : index
    %40 = vector.load %arg5[%c1_35, %c0_36, %c0_37] : memref<5x1x32xf32, #tpu.memory_space<vmem>>, vector<1x1x32xf32>
    %41 = vector.shape_cast %40 : vector<1x1x32xf32> to vector<1x32xf32>
    %42 = vector.broadcast %41 : vector<1x32xf32> to vector<32x32xf32>
    %43 = arith.addf %39, %42 : vector<32x32xf32>
    %cst_38 = arith.constant 0.000000e+00 : f32
    %44 = vector.broadcast %cst_38 : f32 to vector<4x32xf32>
    %45 = arith.maximumf %35, %44 : vector<4x32xf32>
    %46 = vector.extract_strided_slice %31 {offsets = [32, 0], sizes = [32, 32], strides = [1, 1]} : vector<64x32xf32> to vector<32x32xf32>
    %cst_39 = arith.constant dense<0.000000e+00> : vector<4x32xf32>
    %47 = tpu.matmul %45, %46, %cst_39 {dimension_numbers = #tpu.dot_dimension_numbers<[1], [0], [0], [1], [0, 0, 1, 1], [], []>} : vector<4x32xf32>, vector<32x32xf32>, vector<4x32xf32> -> vector<4x32xf32>
    %48 = vector.shape_cast %43 : vector<32x32xf32> to vector<4x8x32xf32>
    %49 = vector.shape_cast %47 : vector<4x32xf32> to vector<4x1x32xf32>
    %50 = vector.broadcast %49 : vector<4x1x32xf32> to vector<4x8x32xf32>
    %51 = arith.addf %48, %50 : vector<4x8x32xf32>
    %52 = vector.shape_cast %51 : vector<4x8x32xf32> to vector<32x32xf32>
    %cst_40 = arith.constant 0.000000e+00 : f32
    %53 = vector.broadcast %cst_40 : f32 to vector<32x32xf32>
    %54 = arith.maximumf %52, %53 : vector<32x32xf32>
    %c1_41 = arith.constant 1 : index
    %c0_42 = arith.constant 0 : index
    %c0_43 = arith.constant 0 : index
    %55 = vector.load %arg6[%c1_41, %c0_42, %c0_43] : memref<5x32x32xf32, #tpu.memory_space<vmem>>, vector<1x32x32xf32>
    %56 = vector.shape_cast %55 : vector<1x32x32xf32> to vector<32x32xf32>
    %cst_44 = arith.constant dense<0.000000e+00> : vector<32x32xf32>
    %57 = tpu.matmul %54, %56, %cst_44 {dimension_numbers = #tpu.dot_dimension_numbers<[1], [0], [0], [1], [0, 0, 1, 1], [], []>} : vector<32x32xf32>, vector<32x32xf32>, vector<32x32xf32> -> vector<32x32xf32>
    %c1_45 = arith.constant 1 : index
    %c0_46 = arith.constant 0 : index
    %c0_47 = arith.constant 0 : index
    %58 = vector.load %arg7[%c1_45, %c0_46, %c0_47] : memref<5x1x32xf32, #tpu.memory_space<vmem>>, vector<1x1x32xf32>
    %59 = vector.shape_cast %58 : vector<1x1x32xf32> to vector<1x32xf32>
    %60 = vector.broadcast %59 : vector<1x32xf32> to vector<32x32xf32>
    %61 = arith.addf %57, %60 : vector<32x32xf32>
    %62 = vector.extract_strided_slice %33 {offsets = [0, 0], sizes = [32, 32], strides = [1, 1]} : vector<64x32xf32> to vector<32x32xf32>
    %cst_48 = arith.constant dense<0.000000e+00> : vector<32x32xf32>
    %63 = tpu.matmul %29, %62, %cst_48 {dimension_numbers = #tpu.dot_dimension_numbers<[1], [0], [0], [1], [0, 0, 1, 1], [], []>} : vector<32x32xf32>, vector<32x32xf32>, vector<32x32xf32> -> vector<32x32xf32>
    %64 = vector.extract_strided_slice %33 {offsets = [32, 0], sizes = [32, 32], strides = [1, 1]} : vector<64x32xf32> to vector<32x32xf32>
    %cst_49 = arith.constant dense<0.000000e+00> : vector<4x32xf32>
    %65 = tpu.matmul %35, %64, %cst_49 {dimension_numbers = #tpu.dot_dimension_numbers<[1], [0], [0], [1], [0, 0, 1, 1], [], []>} : vector<4x32xf32>, vector<32x32xf32>, vector<4x32xf32> -> vector<4x32xf32>
    %66 = vector.shape_cast %63 : vector<32x32xf32> to vector<4x8x32xf32>
    %67 = vector.shape_cast %65 : vector<4x32xf32> to vector<4x1x32xf32>
    %68 = vector.broadcast %67 : vector<4x1x32xf32> to vector<4x8x32xf32>
    %69 = arith.addf %66, %68 : vector<4x8x32xf32>
    %70 = vector.shape_cast %69 : vector<4x8x32xf32> to vector<32x32xf32>
    %71 = arith.addf %70, %61 : vector<32x32xf32>
    %c2 = arith.constant 2 : index
    %c0_50 = arith.constant 0 : index
    %c0_51 = arith.constant 0 : index
    %72 = vector.load %arg4[%c2, %c0_50, %c0_51] : memref<5x64x32xf32, #tpu.memory_space<vmem>>, vector<1x64x32xf32>
    %73 = vector.shape_cast %72 : vector<1x64x32xf32> to vector<64x32xf32>
    %c2_52 = arith.constant 2 : index
    %c0_53 = arith.constant 0 : index
    %c0_54 = arith.constant 0 : index
    %74 = vector.load %arg8[%c2_52, %c0_53, %c0_54] : memref<5x64x32xf32, #tpu.memory_space<vmem>>, vector<1x64x32xf32>
    %75 = vector.shape_cast %74 : vector<1x64x32xf32> to vector<64x32xf32>
    %76 = vector.shape_cast %71 : vector<32x32xf32> to vector<4x8x32xf32>
    %cst_55 = arith.constant dense<0xFF800000> : vector<4x32xf32>
    %77 = vector.multi_reduction <maximumf>, %76, %cst_55 [1] : vector<4x8x32xf32> to vector<4x32xf32>
    %cst_56 = arith.constant 0.000000e+00 : f32
    %78 = vector.broadcast %cst_56 : f32 to vector<32x32xf32>
    %79 = arith.maximumf %71, %78 : vector<32x32xf32>
    %80 = vector.extract_strided_slice %73 {offsets = [0, 0], sizes = [32, 32], strides = [1, 1]} : vector<64x32xf32> to vector<32x32xf32>
    %cst_57 = arith.constant dense<0.000000e+00> : vector<32x32xf32>
    %81 = tpu.matmul %79, %80, %cst_57 {dimension_numbers = #tpu.dot_dimension_numbers<[1], [0], [0], [1], [0, 0, 1, 1], [], []>} : vector<32x32xf32>, vector<32x32xf32>, vector<32x32xf32> -> vector<32x32xf32>
    %c2_58 = arith.constant 2 : index
    %c0_59 = arith.constant 0 : index
    %c0_60 = arith.constant 0 : index
    %82 = vector.load %arg5[%c2_58, %c0_59, %c0_60] : memref<5x1x32xf32, #tpu.memory_space<vmem>>, vector<1x1x32xf32>
    %83 = vector.shape_cast %82 : vector<1x1x32xf32> to vector<1x32xf32>
    %84 = vector.broadcast %83 : vector<1x32xf32> to vector<32x32xf32>
    %85 = arith.addf %81, %84 : vector<32x32xf32>
    %cst_61 = arith.constant 0.000000e+00 : f32
    %86 = vector.broadcast %cst_61 : f32 to vector<4x32xf32>
    %87 = arith.maximumf %77, %86 : vector<4x32xf32>
    %88 = vector.extract_strided_slice %73 {offsets = [32, 0], sizes = [32, 32], strides = [1, 1]} : vector<64x32xf32> to vector<32x32xf32>
    %cst_62 = arith.constant dense<0.000000e+00> : vector<4x32xf32>
    %89 = tpu.matmul %87, %88, %cst_62 {dimension_numbers = #tpu.dot_dimension_numbers<[1], [0], [0], [1], [0, 0, 1, 1], [], []>} : vector<4x32xf32>, vector<32x32xf32>, vector<4x32xf32> -> vector<4x32xf32>
    %90 = vector.shape_cast %85 : vector<32x32xf32> to vector<4x8x32xf32>
    %91 = vector.shape_cast %89 : vector<4x32xf32> to vector<4x1x32xf32>
    %92 = vector.broadcast %91 : vector<4x1x32xf32> to vector<4x8x32xf32>
    %93 = arith.addf %90, %92 : vector<4x8x32xf32>
    %94 = vector.shape_cast %93 : vector<4x8x32xf32> to vector<32x32xf32>
    %cst_63 = arith.constant 0.000000e+00 : f32
    %95 = vector.broadcast %cst_63 : f32 to vector<32x32xf32>
    %96 = arith.maximumf %94, %95 : vector<32x32xf32>
    %c2_64 = arith.constant 2 : index
    %c0_65 = arith.constant 0 : index
    %c0_66 = arith.constant 0 : index
    %97 = vector.load %arg6[%c2_64, %c0_65, %c0_66] : memref<5x32x32xf32, #tpu.memory_space<vmem>>, vector<1x32x32xf32>
    %98 = vector.shape_cast %97 : vector<1x32x32xf32> to vector<32x32xf32>
    %cst_67 = arith.constant dense<0.000000e+00> : vector<32x32xf32>
    %99 = tpu.matmul %96, %98, %cst_67 {dimension_numbers = #tpu.dot_dimension_numbers<[1], [0], [0], [1], [0, 0, 1, 1], [], []>} : vector<32x32xf32>, vector<32x32xf32>, vector<32x32xf32> -> vector<32x32xf32>
    %c2_68 = arith.constant 2 : index
    %c0_69 = arith.constant 0 : index
    %c0_70 = arith.constant 0 : index
    %100 = vector.load %arg7[%c2_68, %c0_69, %c0_70] : memref<5x1x32xf32, #tpu.memory_space<vmem>>, vector<1x1x32xf32>
    %101 = vector.shape_cast %100 : vector<1x1x32xf32> to vector<1x32xf32>
    %102 = vector.broadcast %101 : vector<1x32xf32> to vector<32x32xf32>
    %103 = arith.addf %99, %102 : vector<32x32xf32>
    %104 = vector.extract_strided_slice %75 {offsets = [0, 0], sizes = [32, 32], strides = [1, 1]} : vector<64x32xf32> to vector<32x32xf32>
    %cst_71 = arith.constant dense<0.000000e+00> : vector<32x32xf32>
    %105 = tpu.matmul %71, %104, %cst_71 {dimension_numbers = #tpu.dot_dimension_numbers<[1], [0], [0], [1], [0, 0, 1, 1], [], []>} : vector<32x32xf32>, vector<32x32xf32>, vector<32x32xf32> -> vector<32x32xf32>
    %106 = vector.extract_strided_slice %75 {offsets = [32, 0], sizes = [32, 32], strides = [1, 1]} : vector<64x32xf32> to vector<32x32xf32>
    %cst_72 = arith.constant dense<0.000000e+00> : vector<4x32xf32>
    %107 = tpu.matmul %77, %106, %cst_72 {dimension_numbers = #tpu.dot_dimension_numbers<[1], [0], [0], [1], [0, 0, 1, 1], [], []>} : vector<4x32xf32>, vector<32x32xf32>, vector<4x32xf32> -> vector<4x32xf32>
    %108 = vector.shape_cast %105 : vector<32x32xf32> to vector<4x8x32xf32>
    %109 = vector.shape_cast %107 : vector<4x32xf32> to vector<4x1x32xf32>
    %110 = vector.broadcast %109 : vector<4x1x32xf32> to vector<4x8x32xf32>
    %111 = arith.addf %108, %110 : vector<4x8x32xf32>
    %112 = vector.shape_cast %111 : vector<4x8x32xf32> to vector<32x32xf32>
    %113 = arith.addf %112, %103 : vector<32x32xf32>
    %c3 = arith.constant 3 : index
    %c0_73 = arith.constant 0 : index
    %c0_74 = arith.constant 0 : index
    %114 = vector.load %arg4[%c3, %c0_73, %c0_74] : memref<5x64x32xf32, #tpu.memory_space<vmem>>, vector<1x64x32xf32>
    %115 = vector.shape_cast %114 : vector<1x64x32xf32> to vector<64x32xf32>
    %c3_75 = arith.constant 3 : index
    %c0_76 = arith.constant 0 : index
    %c0_77 = arith.constant 0 : index
    %116 = vector.load %arg8[%c3_75, %c0_76, %c0_77] : memref<5x64x32xf32, #tpu.memory_space<vmem>>, vector<1x64x32xf32>
    %117 = vector.shape_cast %116 : vector<1x64x32xf32> to vector<64x32xf32>
    %118 = vector.shape_cast %113 : vector<32x32xf32> to vector<4x8x32xf32>
    %cst_78 = arith.constant dense<0xFF800000> : vector<4x32xf32>
    %119 = vector.multi_reduction <maximumf>, %118, %cst_78 [1] : vector<4x8x32xf32> to vector<4x32xf32>
    %cst_79 = arith.constant 0.000000e+00 : f32
    %120 = vector.broadcast %cst_79 : f32 to vector<32x32xf32>
    %121 = arith.maximumf %113, %120 : vector<32x32xf32>
    %122 = vector.extract_strided_slice %115 {offsets = [0, 0], sizes = [32, 32], strides = [1, 1]} : vector<64x32xf32> to vector<32x32xf32>
    %cst_80 = arith.constant dense<0.000000e+00> : vector<32x32xf32>
    %123 = tpu.matmul %121, %122, %cst_80 {dimension_numbers = #tpu.dot_dimension_numbers<[1], [0], [0], [1], [0, 0, 1, 1], [], []>} : vector<32x32xf32>, vector<32x32xf32>, vector<32x32xf32> -> vector<32x32xf32>
    %c3_81 = arith.constant 3 : index
    %c0_82 = arith.constant 0 : index
    %c0_83 = arith.constant 0 : index
    %124 = vector.load %arg5[%c3_81, %c0_82, %c0_83] : memref<5x1x32xf32, #tpu.memory_space<vmem>>, vector<1x1x32xf32>
    %125 = vector.shape_cast %124 : vector<1x1x32xf32> to vector<1x32xf32>
    %126 = vector.broadcast %125 : vector<1x32xf32> to vector<32x32xf32>
    %127 = arith.addf %123, %126 : vector<32x32xf32>
    %cst_84 = arith.constant 0.000000e+00 : f32
    %128 = vector.broadcast %cst_84 : f32 to vector<4x32xf32>
    %129 = arith.maximumf %119, %128 : vector<4x32xf32>
    %130 = vector.extract_strided_slice %115 {offsets = [32, 0], sizes = [32, 32], strides = [1, 1]} : vector<64x32xf32> to vector<32x32xf32>
    %cst_85 = arith.constant dense<0.000000e+00> : vector<4x32xf32>
    %131 = tpu.matmul %129, %130, %cst_85 {dimension_numbers = #tpu.dot_dimension_numbers<[1], [0], [0], [1], [0, 0, 1, 1], [], []>} : vector<4x32xf32>, vector<32x32xf32>, vector<4x32xf32> -> vector<4x32xf32>
    %132 = vector.shape_cast %127 : vector<32x32xf32> to vector<4x8x32xf32>
    %133 = vector.shape_cast %131 : vector<4x32xf32> to vector<4x1x32xf32>
    %134 = vector.broadcast %133 : vector<4x1x32xf32> to vector<4x8x32xf32>
    %135 = arith.addf %132, %134 : vector<4x8x32xf32>
    %136 = vector.shape_cast %135 : vector<4x8x32xf32> to vector<32x32xf32>
    %cst_86 = arith.constant 0.000000e+00 : f32
    %137 = vector.broadcast %cst_86 : f32 to vector<32x32xf32>
    %138 = arith.maximumf %136, %137 : vector<32x32xf32>
    %c3_87 = arith.constant 3 : index
    %c0_88 = arith.constant 0 : index
    %c0_89 = arith.constant 0 : index
    %139 = vector.load %arg6[%c3_87, %c0_88, %c0_89] : memref<5x32x32xf32, #tpu.memory_space<vmem>>, vector<1x32x32xf32>
    %140 = vector.shape_cast %139 : vector<1x32x32xf32> to vector<32x32xf32>
    %cst_90 = arith.constant dense<0.000000e+00> : vector<32x32xf32>
    %141 = tpu.matmul %138, %140, %cst_90 {dimension_numbers = #tpu.dot_dimension_numbers<[1], [0], [0], [1], [0, 0, 1, 1], [], []>} : vector<32x32xf32>, vector<32x32xf32>, vector<32x32xf32> -> vector<32x32xf32>
    %c3_91 = arith.constant 3 : index
    %c0_92 = arith.constant 0 : index
    %c0_93 = arith.constant 0 : index
    %142 = vector.load %arg7[%c3_91, %c0_92, %c0_93] : memref<5x1x32xf32, #tpu.memory_space<vmem>>, vector<1x1x32xf32>
    %143 = vector.shape_cast %142 : vector<1x1x32xf32> to vector<1x32xf32>
    %144 = vector.broadcast %143 : vector<1x32xf32> to vector<32x32xf32>
    %145 = arith.addf %141, %144 : vector<32x32xf32>
    %146 = vector.extract_strided_slice %117 {offsets = [0, 0], sizes = [32, 32], strides = [1, 1]} : vector<64x32xf32> to vector<32x32xf32>
    %cst_94 = arith.constant dense<0.000000e+00> : vector<32x32xf32>
    %147 = tpu.matmul %113, %146, %cst_94 {dimension_numbers = #tpu.dot_dimension_numbers<[1], [0], [0], [1], [0, 0, 1, 1], [], []>} : vector<32x32xf32>, vector<32x32xf32>, vector<32x32xf32> -> vector<32x32xf32>
    %148 = vector.extract_strided_slice %117 {offsets = [32, 0], sizes = [32, 32], strides = [1, 1]} : vector<64x32xf32> to vector<32x32xf32>
    %cst_95 = arith.constant dense<0.000000e+00> : vector<4x32xf32>
    %149 = tpu.matmul %119, %148, %cst_95 {dimension_numbers = #tpu.dot_dimension_numbers<[1], [0], [0], [1], [0, 0, 1, 1], [], []>} : vector<4x32xf32>, vector<32x32xf32>, vector<4x32xf32> -> vector<4x32xf32>
    %150 = vector.shape_cast %147 : vector<32x32xf32> to vector<4x8x32xf32>
    %151 = vector.shape_cast %149 : vector<4x32xf32> to vector<4x1x32xf32>
    %152 = vector.broadcast %151 : vector<4x1x32xf32> to vector<4x8x32xf32>
    %153 = arith.addf %150, %152 : vector<4x8x32xf32>
    %154 = vector.shape_cast %153 : vector<4x8x32xf32> to vector<32x32xf32>
    %155 = arith.addf %154, %145 : vector<32x32xf32>
    %c4 = arith.constant 4 : index
    %c0_96 = arith.constant 0 : index
    %c0_97 = arith.constant 0 : index
    %156 = vector.load %arg4[%c4, %c0_96, %c0_97] : memref<5x64x32xf32, #tpu.memory_space<vmem>>, vector<1x64x32xf32>
    %157 = vector.shape_cast %156 : vector<1x64x32xf32> to vector<64x32xf32>
    %c4_98 = arith.constant 4 : index
    %c0_99 = arith.constant 0 : index
    %c0_100 = arith.constant 0 : index
    %158 = vector.load %arg8[%c4_98, %c0_99, %c0_100] : memref<5x64x32xf32, #tpu.memory_space<vmem>>, vector<1x64x32xf32>
    %159 = vector.shape_cast %158 : vector<1x64x32xf32> to vector<64x32xf32>
    %160 = vector.shape_cast %155 : vector<32x32xf32> to vector<4x8x32xf32>
    %cst_101 = arith.constant dense<0xFF800000> : vector<4x32xf32>
    %161 = vector.multi_reduction <maximumf>, %160, %cst_101 [1] : vector<4x8x32xf32> to vector<4x32xf32>
    %cst_102 = arith.constant 0.000000e+00 : f32
    %162 = vector.broadcast %cst_102 : f32 to vector<32x32xf32>
    %163 = arith.maximumf %155, %162 : vector<32x32xf32>
    %164 = vector.extract_strided_slice %157 {offsets = [0, 0], sizes = [32, 32], strides = [1, 1]} : vector<64x32xf32> to vector<32x32xf32>
    %cst_103 = arith.constant dense<0.000000e+00> : vector<32x32xf32>
    %165 = tpu.matmul %163, %164, %cst_103 {dimension_numbers = #tpu.dot_dimension_numbers<[1], [0], [0], [1], [0, 0, 1, 1], [], []>} : vector<32x32xf32>, vector<32x32xf32>, vector<32x32xf32> -> vector<32x32xf32>
    %c4_104 = arith.constant 4 : index
    %c0_105 = arith.constant 0 : index
    %c0_106 = arith.constant 0 : index
    %166 = vector.load %arg5[%c4_104, %c0_105, %c0_106] : memref<5x1x32xf32, #tpu.memory_space<vmem>>, vector<1x1x32xf32>
    %167 = vector.shape_cast %166 : vector<1x1x32xf32> to vector<1x32xf32>
    %168 = vector.broadcast %167 : vector<1x32xf32> to vector<32x32xf32>
    %169 = arith.addf %165, %168 : vector<32x32xf32>
    %cst_107 = arith.constant 0.000000e+00 : f32
    %170 = vector.broadcast %cst_107 : f32 to vector<4x32xf32>
    %171 = arith.maximumf %161, %170 : vector<4x32xf32>
    %172 = vector.extract_strided_slice %157 {offsets = [32, 0], sizes = [32, 32], strides = [1, 1]} : vector<64x32xf32> to vector<32x32xf32>
    %cst_108 = arith.constant dense<0.000000e+00> : vector<4x32xf32>
    %173 = tpu.matmul %171, %172, %cst_108 {dimension_numbers = #tpu.dot_dimension_numbers<[1], [0], [0], [1], [0, 0, 1, 1], [], []>} : vector<4x32xf32>, vector<32x32xf32>, vector<4x32xf32> -> vector<4x32xf32>
    %174 = vector.shape_cast %169 : vector<32x32xf32> to vector<4x8x32xf32>
    %175 = vector.shape_cast %173 : vector<4x32xf32> to vector<4x1x32xf32>
    %176 = vector.broadcast %175 : vector<4x1x32xf32> to vector<4x8x32xf32>
    %177 = arith.addf %174, %176 : vector<4x8x32xf32>
    %178 = vector.shape_cast %177 : vector<4x8x32xf32> to vector<32x32xf32>
    %cst_109 = arith.constant 0.000000e+00 : f32
    %179 = vector.broadcast %cst_109 : f32 to vector<32x32xf32>
    %180 = arith.maximumf %178, %179 : vector<32x32xf32>
    %c4_110 = arith.constant 4 : index
    %c0_111 = arith.constant 0 : index
    %c0_112 = arith.constant 0 : index
    %181 = vector.load %arg6[%c4_110, %c0_111, %c0_112] : memref<5x32x32xf32, #tpu.memory_space<vmem>>, vector<1x32x32xf32>
    %182 = vector.shape_cast %181 : vector<1x32x32xf32> to vector<32x32xf32>
    %cst_113 = arith.constant dense<0.000000e+00> : vector<32x32xf32>
    %183 = tpu.matmul %180, %182, %cst_113 {dimension_numbers = #tpu.dot_dimension_numbers<[1], [0], [0], [1], [0, 0, 1, 1], [], []>} : vector<32x32xf32>, vector<32x32xf32>, vector<32x32xf32> -> vector<32x32xf32>
    %c4_114 = arith.constant 4 : index
    %c0_115 = arith.constant 0 : index
    %c0_116 = arith.constant 0 : index
    %184 = vector.load %arg7[%c4_114, %c0_115, %c0_116] : memref<5x1x32xf32, #tpu.memory_space<vmem>>, vector<1x1x32xf32>
    %185 = vector.shape_cast %184 : vector<1x1x32xf32> to vector<1x32xf32>
    %186 = vector.broadcast %185 : vector<1x32xf32> to vector<32x32xf32>
    %187 = arith.addf %183, %186 : vector<32x32xf32>
    %188 = vector.extract_strided_slice %159 {offsets = [0, 0], sizes = [32, 32], strides = [1, 1]} : vector<64x32xf32> to vector<32x32xf32>
    %cst_117 = arith.constant dense<0.000000e+00> : vector<32x32xf32>
    %189 = tpu.matmul %155, %188, %cst_117 {dimension_numbers = #tpu.dot_dimension_numbers<[1], [0], [0], [1], [0, 0, 1, 1], [], []>} : vector<32x32xf32>, vector<32x32xf32>, vector<32x32xf32> -> vector<32x32xf32>
    %190 = vector.extract_strided_slice %159 {offsets = [32, 0], sizes = [32, 32], strides = [1, 1]} : vector<64x32xf32> to vector<32x32xf32>
    %cst_118 = arith.constant dense<0.000000e+00> : vector<4x32xf32>
    %191 = tpu.matmul %161, %190, %cst_118 {dimension_numbers = #tpu.dot_dimension_numbers<[1], [0], [0], [1], [0, 0, 1, 1], [], []>} : vector<4x32xf32>, vector<32x32xf32>, vector<4x32xf32> -> vector<4x32xf32>
    %192 = vector.shape_cast %189 : vector<32x32xf32> to vector<4x8x32xf32>
    %193 = vector.shape_cast %191 : vector<4x32xf32> to vector<4x1x32xf32>
    %194 = vector.broadcast %193 : vector<4x1x32xf32> to vector<4x8x32xf32>
    %195 = arith.addf %192, %194 : vector<4x8x32xf32>
    %196 = vector.shape_cast %195 : vector<4x8x32xf32> to vector<32x32xf32>
    %197 = arith.addf %196, %187 : vector<32x32xf32>
    %198 = vector.shape_cast %197 : vector<32x32xf32> to vector<4x8x32xf32>
    %cst_119 = arith.constant dense<0xFF800000> : vector<4x32xf32>
    %199 = vector.multi_reduction <maximumf>, %198, %cst_119 [1] : vector<4x8x32xf32> to vector<4x32xf32>
    %cst_120 = arith.constant 0.000000e+00 : f32
    %200 = vector.broadcast %cst_120 : f32 to vector<4x32xf32>
    %201 = arith.maximumf %199, %200 : vector<4x32xf32>
    %c0_121 = arith.constant 0 : index
    %c0_122 = arith.constant 0 : index
    %202 = vector.load %arg9[%c0_121, %c0_122] : memref<32x16xf32, #tpu.memory_space<vmem>>, vector<32x16xf32>
    %cst_123 = arith.constant dense<0.000000e+00> : vector<4x16xf32>
    %203 = tpu.matmul %201, %202, %cst_123 {dimension_numbers = #tpu.dot_dimension_numbers<[1], [0], [0], [1], [0, 0, 1, 1], [], []>} : vector<4x32xf32>, vector<32x16xf32>, vector<4x16xf32> -> vector<4x16xf32>
    %c0_124 = arith.constant 0 : index
    %c0_125 = arith.constant 0 : index
    %204 = vector.load %arg10[%c0_124, %c0_125] : memref<1x16xf32, #tpu.memory_space<vmem>>, vector<1x16xf32>
    %205 = vector.broadcast %204 : vector<1x16xf32> to vector<4x16xf32>
    %206 = arith.addf %203, %205 : vector<4x16xf32>
    %c0_126 = arith.constant 0 : index
    %c0_127 = arith.constant 0 : index
    %c0_128 = arith.constant 0 : index
    %207 = vector.load %arg22[%c0_126, %c0_127, %c0_128] : memref<1x4x16xf32, #tpu.memory_space<vmem>>, vector<1x4x16xf32>
    %208 = vector.shape_cast %207 : vector<1x4x16xf32> to vector<4x16xf32>
    %209 = vector.shape_cast %206 : vector<4x16xf32> to vector<1x4x16xf32>
    tpu.vector_store %arg22[%c0_126, %c0_127, %c0_128], %209 {strides = array<i32>} : memref<1x4x16xf32, #tpu.memory_space<vmem>>, vector<1x4x16xf32>,
    %c0_129 = arith.constant 0 : index
    %c0_130 = arith.constant 0 : index
    %210 = vector.load %arg11[%c0_129, %c0_130] : memref<4x96xf32, #tpu.memory_space<vmem>>, vector<4x96xf32>
    %211 = tpu.iota {dimensions = array<i32: 0>} : vector<4x96xi32>
    %212 = arith.sitofp %211 : vector<4x96xi32> to vector<4x96xf32>
    %cst_131 = arith.constant 0.333333343 : f32
    %213 = vector.broadcast %cst_131 : f32 to vector<4x96xf32>
    %214 = arith.mulf %212, %213 : vector<4x96xf32>
    %215 = vector.extract_strided_slice %210 {offsets = [3, 0], sizes = [1, 96], strides = [1, 1]} : vector<4x96xf32> to vector<1x96xf32>
    %216 = vector.broadcast %215 : vector<1x96xf32> to vector<4x96xf32>
    %217 = arith.mulf %214, %216 : vector<4x96xf32>
    %218 = vector.extract_strided_slice %210 {offsets = [0, 0], sizes = [3, 96], strides = [1, 1]} : vector<4x96xf32> to vector<3x96xf32>
    %cst_132 = arith.constant dense<0.000000e+00> : vector<32x96xf32>
    %219 = tpu.matmul %2, %218, %cst_132 {dimension_numbers = #tpu.dot_dimension_numbers<[1], [0], [0], [1], [0, 0, 1, 1], [], []>} : vector<32x3xf32>, vector<3x96xf32>, vector<32x96xf32> -> vector<32x96xf32>
    %c0_133 = arith.constant 0 : index
    %c0_134 = arith.constant 0 : index
    %220 = vector.load %arg12[%c0_133, %c0_134] : memref<1x96xf32, #tpu.memory_space<vmem>>, vector<1x96xf32>
    %221 = vector.broadcast %220 : vector<1x96xf32> to vector<32x96xf32>
    %222 = arith.addf %219, %221 : vector<32x96xf32>
    %223 = vector.shape_cast %222 : vector<32x96xf32> to vector<4x8x96xf32>
    %224 = vector.shape_cast %217 : vector<4x96xf32> to vector<4x1x96xf32>
    %225 = vector.broadcast %224 : vector<4x1x96xf32> to vector<4x8x96xf32>
    %226 = arith.addf %223, %225 : vector<4x8x96xf32>
    %227 = vector.shape_cast %226 : vector<4x8x96xf32> to vector<32x96xf32>
    %c0_135 = arith.constant 0 : index
    %c0_136 = arith.constant 0 : index
    %c0_137 = arith.constant 0 : index
    %228 = vector.load %arg13[%c0_135, %c0_136, %c0_137] : memref<5x96x32xf32, #tpu.memory_space<vmem>>, vector<1x96x32xf32>
    %229 = vector.shape_cast %228 : vector<1x96x32xf32> to vector<96x32xf32>
    %c0_138 = arith.constant 0 : index
    %c0_139 = arith.constant 0 : index
    %c0_140 = arith.constant 0 : index
    %230 = vector.load %arg14[%c0_138, %c0_139, %c0_140] : memref<5x1x32xf32, #tpu.memory_space<vmem>>, vector<1x1x32xf32>
    %231 = vector.shape_cast %230 : vector<1x1x32xf32> to vector<1x32xf32>
    %c0_141 = arith.constant 0 : index
    %c0_142 = arith.constant 0 : index
    %c0_143 = arith.constant 0 : index
    %232 = vector.load %arg15[%c0_141, %c0_142, %c0_143] : memref<5x32x32xf32, #tpu.memory_space<vmem>>, vector<1x32x32xf32>
    %233 = vector.shape_cast %232 : vector<1x32x32xf32> to vector<32x32xf32>
    %c0_144 = arith.constant 0 : index
    %c0_145 = arith.constant 0 : index
    %c0_146 = arith.constant 0 : index
    %234 = vector.load %arg16[%c0_144, %c0_145, %c0_146] : memref<5x1x32xf32, #tpu.memory_space<vmem>>, vector<1x1x32xf32>
    %235 = vector.shape_cast %234 : vector<1x1x32xf32> to vector<1x32xf32>
    %c0_147 = arith.constant 0 : index
    %c0_148 = arith.constant 0 : index
    %c0_149 = arith.constant 0 : index
    %236 = vector.load %arg17[%c0_147, %c0_148, %c0_149] : memref<5x96x32xf32, #tpu.memory_space<vmem>>, vector<1x96x32xf32>
    %237 = vector.shape_cast %236 : vector<1x96x32xf32> to vector<96x32xf32>
    %cst_150 = arith.constant 0.000000e+00 : f32
    %238 = vector.broadcast %cst_150 : f32 to vector<32x96xf32>
    %239 = arith.maximumf %227, %238 : vector<32x96xf32>
    %cst_151 = arith.constant dense<0.000000e+00> : vector<32x32xf32>
    %240 = tpu.matmul %239, %229, %cst_151 {dimension_numbers = #tpu.dot_dimension_numbers<[1], [0], [0], [1], [0, 0, 1, 1], [], []>} : vector<32x96xf32>, vector<96x32xf32>, vector<32x32xf32> -> vector<32x32xf32>
    %241 = vector.broadcast %231 : vector<1x32xf32> to vector<32x32xf32>
    %242 = arith.addf %240, %241 : vector<32x32xf32>
    %cst_152 = arith.constant 0.000000e+00 : f32
    %243 = vector.broadcast %cst_152 : f32 to vector<32x32xf32>
    %244 = arith.maximumf %242, %243 : vector<32x32xf32>
    %cst_153 = arith.constant dense<0.000000e+00> : vector<32x32xf32>
    %245 = tpu.matmul %244, %233, %cst_153 {dimension_numbers = #tpu.dot_dimension_numbers<[1], [0], [0], [1], [0, 0, 1, 1], [], []>} : vector<32x32xf32>, vector<32x32xf32>, vector<32x32xf32> -> vector<32x32xf32>
    %246 = vector.broadcast %235 : vector<1x32xf32> to vector<32x32xf32>
    %247 = arith.addf %245, %246 : vector<32x32xf32>
    %cst_154 = arith.constant dense<0.000000e+00> : vector<32x32xf32>
    %248 = tpu.matmul %227, %237, %cst_154 {dimension_numbers = #tpu.dot_dimension_numbers<[1], [0], [0], [1], [0, 0, 1, 1], [], []>} : vector<32x96xf32>, vector<96x32xf32>, vector<32x32xf32> -> vector<32x32xf32>
    %249 = arith.addf %248, %247 : vector<32x32xf32>
    %c1_155 = arith.constant 1 : index
    %c0_156 = arith.constant 0 : index
    %c0_157 = arith.constant 0 : index
    %250 = vector.load %arg13[%c1_155, %c0_156, %c0_157] : memref<5x96x32xf32, #tpu.memory_space<vmem>>, vector<1x96x32xf32>
    %251 = vector.shape_cast %250 : vector<1x96x32xf32> to vector<96x32xf32>
    %c1_158 = arith.constant 1 : index
    %c0_159 = arith.constant 0 : index
    %c0_160 = arith.constant 0 : index
    %252 = vector.load %arg17[%c1_158, %c0_159, %c0_160] : memref<5x96x32xf32, #tpu.memory_space<vmem>>, vector<1x96x32xf32>
    %253 = vector.shape_cast %252 : vector<1x96x32xf32> to vector<96x32xf32>
    %254 = vector.shape_cast %249 : vector<32x32xf32> to vector<4x8x32xf32>
    %cst_161 = arith.constant dense<0xFF800000> : vector<4x32xf32>
    %255 = vector.multi_reduction <maximumf>, %254, %cst_161 [1] : vector<4x8x32xf32> to vector<4x32xf32>
    %cst_162 = arith.constant dense<0xFF800000> : vector<32xf32>
    %256 = vector.multi_reduction <maximumf>, %255, %cst_162 [0] : vector<4x32xf32> to vector<32xf32>
    %257 = vector.shape_cast %256 : vector<32xf32> to vector<1x32xf32>
    %cst_163 = arith.constant 0.000000e+00 : f32
    %258 = vector.broadcast %cst_163 : f32 to vector<32x32xf32>
    %259 = arith.maximumf %249, %258 : vector<32x32xf32>
    %260 = vector.extract_strided_slice %251 {offsets = [0, 0], sizes = [32, 32], strides = [1, 1]} : vector<96x32xf32> to vector<32x32xf32>
    %cst_164 = arith.constant dense<0.000000e+00> : vector<32x32xf32>
    %261 = tpu.matmul %259, %260, %cst_164 {dimension_numbers = #tpu.dot_dimension_numbers<[1], [0], [0], [1], [0, 0, 1, 1], [], []>} : vector<32x32xf32>, vector<32x32xf32>, vector<32x32xf32> -> vector<32x32xf32>
    %c1_165 = arith.constant 1 : index
    %c0_166 = arith.constant 0 : index
    %c0_167 = arith.constant 0 : index
    %262 = vector.load %arg14[%c1_165, %c0_166, %c0_167] : memref<5x1x32xf32, #tpu.memory_space<vmem>>, vector<1x1x32xf32>
    %263 = vector.shape_cast %262 : vector<1x1x32xf32> to vector<1x32xf32>
    %264 = vector.broadcast %263 : vector<1x32xf32> to vector<32x32xf32>
    %265 = arith.addf %261, %264 : vector<32x32xf32>
    %cst_168 = arith.constant 0.000000e+00 : f32
    %266 = vector.broadcast %cst_168 : f32 to vector<4x32xf32>
    %267 = arith.maximumf %255, %266 : vector<4x32xf32>
    %268 = vector.extract_strided_slice %251 {offsets = [32, 0], sizes = [32, 32], strides = [1, 1]} : vector<96x32xf32> to vector<32x32xf32>
    %cst_169 = arith.constant dense<0.000000e+00> : vector<4x32xf32>
    %269 = tpu.matmul %267, %268, %cst_169 {dimension_numbers = #tpu.dot_dimension_numbers<[1], [0], [0], [1], [0, 0, 1, 1], [], []>} : vector<4x32xf32>, vector<32x32xf32>, vector<4x32xf32> -> vector<4x32xf32>
    %cst_170 = arith.constant 0.000000e+00 : f32
    %270 = vector.broadcast %cst_170 : f32 to vector<1x32xf32>
    %271 = arith.maximumf %257, %270 : vector<1x32xf32>
    %272 = vector.extract_strided_slice %251 {offsets = [64, 0], sizes = [32, 32], strides = [1, 1]} : vector<96x32xf32> to vector<32x32xf32>
    %cst_171 = arith.constant dense<0.000000e+00> : vector<1x32xf32>
    %273 = tpu.matmul %271, %272, %cst_171 {dimension_numbers = #tpu.dot_dimension_numbers<[1], [0], [0], [1], [0, 0, 1, 1], [], []>} : vector<1x32xf32>, vector<32x32xf32>, vector<1x32xf32> -> vector<1x32xf32>
    %274 = vector.broadcast %273 : vector<1x32xf32> to vector<4x32xf32>
    %275 = arith.addf %269, %274 : vector<4x32xf32>
    %276 = vector.shape_cast %265 : vector<32x32xf32> to vector<4x8x32xf32>
    %277 = vector.shape_cast %275 : vector<4x32xf32> to vector<4x1x32xf32>
    %278 = vector.broadcast %277 : vector<4x1x32xf32> to vector<4x8x32xf32>
    %279 = arith.addf %276, %278 : vector<4x8x32xf32>
    %280 = vector.shape_cast %279 : vector<4x8x32xf32> to vector<32x32xf32>
    %cst_172 = arith.constant 0.000000e+00 : f32
    %281 = vector.broadcast %cst_172 : f32 to vector<32x32xf32>
    %282 = arith.maximumf %280, %281 : vector<32x32xf32>
    %c1_173 = arith.constant 1 : index
    %c0_174 = arith.constant 0 : index
    %c0_175 = arith.constant 0 : index
    %283 = vector.load %arg15[%c1_173, %c0_174, %c0_175] : memref<5x32x32xf32, #tpu.memory_space<vmem>>, vector<1x32x32xf32>
    %284 = vector.shape_cast %283 : vector<1x32x32xf32> to vector<32x32xf32>
    %cst_176 = arith.constant dense<0.000000e+00> : vector<32x32xf32>
    %285 = tpu.matmul %282, %284, %cst_176 {dimension_numbers = #tpu.dot_dimension_numbers<[1], [0], [0], [1], [0, 0, 1, 1], [], []>} : vector<32x32xf32>, vector<32x32xf32>, vector<32x32xf32> -> vector<32x32xf32>
    %c1_177 = arith.constant 1 : index
    %c0_178 = arith.constant 0 : index
    %c0_179 = arith.constant 0 : index
    %286 = vector.load %arg16[%c1_177, %c0_178, %c0_179] : memref<5x1x32xf32, #tpu.memory_space<vmem>>, vector<1x1x32xf32>
    %287 = vector.shape_cast %286 : vector<1x1x32xf32> to vector<1x32xf32>
    %288 = vector.broadcast %287 : vector<1x32xf32> to vector<32x32xf32>
    %289 = arith.addf %285, %288 : vector<32x32xf32>
    %290 = vector.extract_strided_slice %253 {offsets = [0, 0], sizes = [32, 32], strides = [1, 1]} : vector<96x32xf32> to vector<32x32xf32>
    %cst_180 = arith.constant dense<0.000000e+00> : vector<32x32xf32>
    %291 = tpu.matmul %249, %290, %cst_180 {dimension_numbers = #tpu.dot_dimension_numbers<[1], [0], [0], [1], [0, 0, 1, 1], [], []>} : vector<32x32xf32>, vector<32x32xf32>, vector<32x32xf32> -> vector<32x32xf32>
    %292 = vector.extract_strided_slice %253 {offsets = [32, 0], sizes = [32, 32], strides = [1, 1]} : vector<96x32xf32> to vector<32x32xf32>
    %cst_181 = arith.constant dense<0.000000e+00> : vector<4x32xf32>
    %293 = tpu.matmul %255, %292, %cst_181 {dimension_numbers = #tpu.dot_dimension_numbers<[1], [0], [0], [1], [0, 0, 1, 1], [], []>} : vector<4x32xf32>, vector<32x32xf32>, vector<4x32xf32> -> vector<4x32xf32>
    %294 = vector.extract_strided_slice %253 {offsets = [64, 0], sizes = [32, 32], strides = [1, 1]} : vector<96x32xf32> to vector<32x32xf32>
    %cst_182 = arith.constant dense<0.000000e+00> : vector<1x32xf32>
    %295 = tpu.matmul %257, %294, %cst_182 {dimension_numbers = #tpu.dot_dimension_numbers<[1], [0], [0], [1], [0, 0, 1, 1], [], []>} : vector<1x32xf32>, vector<32x32xf32>, vector<1x32xf32> -> vector<1x32xf32>
    %296 = vector.broadcast %295 : vector<1x32xf32> to vector<4x32xf32>
    %297 = arith.addf %293, %296 : vector<4x32xf32>
    %298 = vector.shape_cast %291 : vector<32x32xf32> to vector<4x8x32xf32>
    %299 = vector.shape_cast %297 : vector<4x32xf32> to vector<4x1x32xf32>
    %300 = vector.broadcast %299 : vector<4x1x32xf32> to vector<4x8x32xf32>
    %301 = arith.addf %298, %300 : vector<4x8x32xf32>
    %302 = vector.shape_cast %301 : vector<4x8x32xf32> to vector<32x32xf32>
    %303 = arith.addf %302, %289 : vector<32x32xf32>
    %c2_183 = arith.constant 2 : index
    %c0_184 = arith.constant 0 : index
    %c0_185 = arith.constant 0 : index
    %304 = vector.load %arg13[%c2_183, %c0_184, %c0_185] : memref<5x96x32xf32, #tpu.memory_space<vmem>>, vector<1x96x32xf32>
    %305 = vector.shape_cast %304 : vector<1x96x32xf32> to vector<96x32xf32>
    %c2_186 = arith.constant 2 : index
    %c0_187 = arith.constant 0 : index
    %c0_188 = arith.constant 0 : index
    %306 = vector.load %arg17[%c2_186, %c0_187, %c0_188] : memref<5x96x32xf32, #tpu.memory_space<vmem>>, vector<1x96x32xf32>
    %307 = vector.shape_cast %306 : vector<1x96x32xf32> to vector<96x32xf32>
    %308 = vector.shape_cast %303 : vector<32x32xf32> to vector<4x8x32xf32>
    %cst_189 = arith.constant dense<0xFF800000> : vector<4x32xf32>
    %309 = vector.multi_reduction <maximumf>, %308, %cst_189 [1] : vector<4x8x32xf32> to vector<4x32xf32>
    %cst_190 = arith.constant dense<0xFF800000> : vector<32xf32>
    %310 = vector.multi_reduction <maximumf>, %309, %cst_190 [0] : vector<4x32xf32> to vector<32xf32>
    %311 = vector.shape_cast %310 : vector<32xf32> to vector<1x32xf32>
    %cst_191 = arith.constant 0.000000e+00 : f32
    %312 = vector.broadcast %cst_191 : f32 to vector<32x32xf32>
    %313 = arith.maximumf %303, %312 : vector<32x32xf32>
    %314 = vector.extract_strided_slice %305 {offsets = [0, 0], sizes = [32, 32], strides = [1, 1]} : vector<96x32xf32> to vector<32x32xf32>
    %cst_192 = arith.constant dense<0.000000e+00> : vector<32x32xf32>
    %315 = tpu.matmul %313, %314, %cst_192 {dimension_numbers = #tpu.dot_dimension_numbers<[1], [0], [0], [1], [0, 0, 1, 1], [], []>} : vector<32x32xf32>, vector<32x32xf32>, vector<32x32xf32> -> vector<32x32xf32>
    %c2_193 = arith.constant 2 : index
    %c0_194 = arith.constant 0 : index
    %c0_195 = arith.constant 0 : index
    %316 = vector.load %arg14[%c2_193, %c0_194, %c0_195] : memref<5x1x32xf32, #tpu.memory_space<vmem>>, vector<1x1x32xf32>
    %317 = vector.shape_cast %316 : vector<1x1x32xf32> to vector<1x32xf32>
    %318 = vector.broadcast %317 : vector<1x32xf32> to vector<32x32xf32>
    %319 = arith.addf %315, %318 : vector<32x32xf32>
    %cst_196 = arith.constant 0.000000e+00 : f32
    %320 = vector.broadcast %cst_196 : f32 to vector<4x32xf32>
    %321 = arith.maximumf %309, %320 : vector<4x32xf32>
    %322 = vector.extract_strided_slice %305 {offsets = [32, 0], sizes = [32, 32], strides = [1, 1]} : vector<96x32xf32> to vector<32x32xf32>
    %cst_197 = arith.constant dense<0.000000e+00> : vector<4x32xf32>
    %323 = tpu.matmul %321, %322, %cst_197 {dimension_numbers = #tpu.dot_dimension_numbers<[1], [0], [0], [1], [0, 0, 1, 1], [], []>} : vector<4x32xf32>, vector<32x32xf32>, vector<4x32xf32> -> vector<4x32xf32>
    %cst_198 = arith.constant 0.000000e+00 : f32
    %324 = vector.broadcast %cst_198 : f32 to vector<1x32xf32>
    %325 = arith.maximumf %311, %324 : vector<1x32xf32>
    %326 = vector.extract_strided_slice %305 {offsets = [64, 0], sizes = [32, 32], strides = [1, 1]} : vector<96x32xf32> to vector<32x32xf32>
    %cst_199 = arith.constant dense<0.000000e+00> : vector<1x32xf32>
    %327 = tpu.matmul %325, %326, %cst_199 {dimension_numbers = #tpu.dot_dimension_numbers<[1], [0], [0], [1], [0, 0, 1, 1], [], []>} : vector<1x32xf32>, vector<32x32xf32>, vector<1x32xf32> -> vector<1x32xf32>
    %328 = vector.broadcast %327 : vector<1x32xf32> to vector<4x32xf32>
    %329 = arith.addf %323, %328 : vector<4x32xf32>
    %330 = vector.shape_cast %319 : vector<32x32xf32> to vector<4x8x32xf32>
    %331 = vector.shape_cast %329 : vector<4x32xf32> to vector<4x1x32xf32>
    %332 = vector.broadcast %331 : vector<4x1x32xf32> to vector<4x8x32xf32>
    %333 = arith.addf %330, %332 : vector<4x8x32xf32>
    %334 = vector.shape_cast %333 : vector<4x8x32xf32> to vector<32x32xf32>
    %cst_200 = arith.constant 0.000000e+00 : f32
    %335 = vector.broadcast %cst_200 : f32 to vector<32x32xf32>
    %336 = arith.maximumf %334, %335 : vector<32x32xf32>
    %c2_201 = arith.constant 2 : index
    %c0_202 = arith.constant 0 : index
    %c0_203 = arith.constant 0 : index
    %337 = vector.load %arg15[%c2_201, %c0_202, %c0_203] : memref<5x32x32xf32, #tpu.memory_space<vmem>>, vector<1x32x32xf32>
    %338 = vector.shape_cast %337 : vector<1x32x32xf32> to vector<32x32xf32>
    %cst_204 = arith.constant dense<0.000000e+00> : vector<32x32xf32>
    %339 = tpu.matmul %336, %338, %cst_204 {dimension_numbers = #tpu.dot_dimension_numbers<[1], [0], [0], [1], [0, 0, 1, 1], [], []>} : vector<32x32xf32>, vector<32x32xf32>, vector<32x32xf32> -> vector<32x32xf32>
    %c2_205 = arith.constant 2 : index
    %c0_206 = arith.constant 0 : index
    %c0_207 = arith.constant 0 : index
    %340 = vector.load %arg16[%c2_205, %c0_206, %c0_207] : memref<5x1x32xf32, #tpu.memory_space<vmem>>, vector<1x1x32xf32>
    %341 = vector.shape_cast %340 : vector<1x1x32xf32> to vector<1x32xf32>
    %342 = vector.broadcast %341 : vector<1x32xf32> to vector<32x32xf32>
    %343 = arith.addf %339, %342 : vector<32x32xf32>
    %344 = vector.extract_strided_slice %307 {offsets = [0, 0], sizes = [32, 32], strides = [1, 1]} : vector<96x32xf32> to vector<32x32xf32>
    %cst_208 = arith.constant dense<0.000000e+00> : vector<32x32xf32>
    %345 = tpu.matmul %303, %344, %cst_208 {dimension_numbers = #tpu.dot_dimension_numbers<[1], [0], [0], [1], [0, 0, 1, 1], [], []>} : vector<32x32xf32>, vector<32x32xf32>, vector<32x32xf32> -> vector<32x32xf32>
    %346 = vector.extract_strided_slice %307 {offsets = [32, 0], sizes = [32, 32], strides = [1, 1]} : vector<96x32xf32> to vector<32x32xf32>
    %cst_209 = arith.constant dense<0.000000e+00> : vector<4x32xf32>
    %347 = tpu.matmul %309, %346, %cst_209 {dimension_numbers = #tpu.dot_dimension_numbers<[1], [0], [0], [1], [0, 0, 1, 1], [], []>} : vector<4x32xf32>, vector<32x32xf32>, vector<4x32xf32> -> vector<4x32xf32>
    %348 = vector.extract_strided_slice %307 {offsets = [64, 0], sizes = [32, 32], strides = [1, 1]} : vector<96x32xf32> to vector<32x32xf32>
    %cst_210 = arith.constant dense<0.000000e+00> : vector<1x32xf32>
    %349 = tpu.matmul %311, %348, %cst_210 {dimension_numbers = #tpu.dot_dimension_numbers<[1], [0], [0], [1], [0, 0, 1, 1], [], []>} : vector<1x32xf32>, vector<32x32xf32>, vector<1x32xf32> -> vector<1x32xf32>
    %350 = vector.broadcast %349 : vector<1x32xf32> to vector<4x32xf32>
    %351 = arith.addf %347, %350 : vector<4x32xf32>
    %352 = vector.shape_cast %345 : vector<32x32xf32> to vector<4x8x32xf32>
    %353 = vector.shape_cast %351 : vector<4x32xf32> to vector<4x1x32xf32>
    %354 = vector.broadcast %353 : vector<4x1x32xf32> to vector<4x8x32xf32>
    %355 = arith.addf %352, %354 : vector<4x8x32xf32>
    %356 = vector.shape_cast %355 : vector<4x8x32xf32> to vector<32x32xf32>
    %357 = arith.addf %356, %343 : vector<32x32xf32>
    %c3_211 = arith.constant 3 : index
    %c0_212 = arith.constant 0 : index
    %c0_213 = arith.constant 0 : index
    %358 = vector.load %arg13[%c3_211, %c0_212, %c0_213] : memref<5x96x32xf32, #tpu.memory_space<vmem>>, vector<1x96x32xf32>
    %359 = vector.shape_cast %358 : vector<1x96x32xf32> to vector<96x32xf32>
    %c3_214 = arith.constant 3 : index
    %c0_215 = arith.constant 0 : index
    %c0_216 = arith.constant 0 : index
    %360 = vector.load %arg17[%c3_214, %c0_215, %c0_216] : memref<5x96x32xf32, #tpu.memory_space<vmem>>, vector<1x96x32xf32>
    %361 = vector.shape_cast %360 : vector<1x96x32xf32> to vector<96x32xf32>
    %362 = vector.shape_cast %357 : vector<32x32xf32> to vector<4x8x32xf32>
    %cst_217 = arith.constant dense<0xFF800000> : vector<4x32xf32>
    %363 = vector.multi_reduction <maximumf>, %362, %cst_217 [1] : vector<4x8x32xf32> to vector<4x32xf32>
    %cst_218 = arith.constant dense<0xFF800000> : vector<32xf32>
    %364 = vector.multi_reduction <maximumf>, %363, %cst_218 [0] : vector<4x32xf32> to vector<32xf32>
    %365 = vector.shape_cast %364 : vector<32xf32> to vector<1x32xf32>
    %cst_219 = arith.constant 0.000000e+00 : f32
    %366 = vector.broadcast %cst_219 : f32 to vector<32x32xf32>
    %367 = arith.maximumf %357, %366 : vector<32x32xf32>
    %368 = vector.extract_strided_slice %359 {offsets = [0, 0], sizes = [32, 32], strides = [1, 1]} : vector<96x32xf32> to vector<32x32xf32>
    %cst_220 = arith.constant dense<0.000000e+00> : vector<32x32xf32>
    %369 = tpu.matmul %367, %368, %cst_220 {dimension_numbers = #tpu.dot_dimension_numbers<[1], [0], [0], [1], [0, 0, 1, 1], [], []>} : vector<32x32xf32>, vector<32x32xf32>, vector<32x32xf32> -> vector<32x32xf32>
    %c3_221 = arith.constant 3 : index
    %c0_222 = arith.constant 0 : index
    %c0_223 = arith.constant 0 : index
    %370 = vector.load %arg14[%c3_221, %c0_222, %c0_223] : memref<5x1x32xf32, #tpu.memory_space<vmem>>, vector<1x1x32xf32>
    %371 = vector.shape_cast %370 : vector<1x1x32xf32> to vector<1x32xf32>
    %372 = vector.broadcast %371 : vector<1x32xf32> to vector<32x32xf32>
    %373 = arith.addf %369, %372 : vector<32x32xf32>
    %cst_224 = arith.constant 0.000000e+00 : f32
    %374 = vector.broadcast %cst_224 : f32 to vector<4x32xf32>
    %375 = arith.maximumf %363, %374 : vector<4x32xf32>
    %376 = vector.extract_strided_slice %359 {offsets = [32, 0], sizes = [32, 32], strides = [1, 1]} : vector<96x32xf32> to vector<32x32xf32>
    %cst_225 = arith.constant dense<0.000000e+00> : vector<4x32xf32>
    %377 = tpu.matmul %375, %376, %cst_225 {dimension_numbers = #tpu.dot_dimension_numbers<[1], [0], [0], [1], [0, 0, 1, 1], [], []>} : vector<4x32xf32>, vector<32x32xf32>, vector<4x32xf32> -> vector<4x32xf32>
    %cst_226 = arith.constant 0.000000e+00 : f32
    %378 = vector.broadcast %cst_226 : f32 to vector<1x32xf32>
    %379 = arith.maximumf %365, %378 : vector<1x32xf32>
    %380 = vector.extract_strided_slice %359 {offsets = [64, 0], sizes = [32, 32], strides = [1, 1]} : vector<96x32xf32> to vector<32x32xf32>
    %cst_227 = arith.constant dense<0.000000e+00> : vector<1x32xf32>
    %381 = tpu.matmul %379, %380, %cst_227 {dimension_numbers = #tpu.dot_dimension_numbers<[1], [0], [0], [1], [0, 0, 1, 1], [], []>} : vector<1x32xf32>, vector<32x32xf32>, vector<1x32xf32> -> vector<1x32xf32>
    %382 = vector.broadcast %381 : vector<1x32xf32> to vector<4x32xf32>
    %383 = arith.addf %377, %382 : vector<4x32xf32>
    %384 = vector.shape_cast %373 : vector<32x32xf32> to vector<4x8x32xf32>
    %385 = vector.shape_cast %383 : vector<4x32xf32> to vector<4x1x32xf32>
    %386 = vector.broadcast %385 : vector<4x1x32xf32> to vector<4x8x32xf32>
    %387 = arith.addf %384, %386 : vector<4x8x32xf32>
    %388 = vector.shape_cast %387 : vector<4x8x32xf32> to vector<32x32xf32>
    %cst_228 = arith.constant 0.000000e+00 : f32
    %389 = vector.broadcast %cst_228 : f32 to vector<32x32xf32>
    %390 = arith.maximumf %388, %389 : vector<32x32xf32>
    %c3_229 = arith.constant 3 : index
    %c0_230 = arith.constant 0 : index
    %c0_231 = arith.constant 0 : index
    %391 = vector.load %arg15[%c3_229, %c0_230, %c0_231] : memref<5x32x32xf32, #tpu.memory_space<vmem>>, vector<1x32x32xf32>
    %392 = vector.shape_cast %391 : vector<1x32x32xf32> to vector<32x32xf32>
    %cst_232 = arith.constant dense<0.000000e+00> : vector<32x32xf32>
    %393 = tpu.matmul %390, %392, %cst_232 {dimension_numbers = #tpu.dot_dimension_numbers<[1], [0], [0], [1], [0, 0, 1, 1], [], []>} : vector<32x32xf32>, vector<32x32xf32>, vector<32x32xf32> -> vector<32x32xf32>
    %c3_233 = arith.constant 3 : index
    %c0_234 = arith.constant 0 : index
    %c0_235 = arith.constant 0 : index
    %394 = vector.load %arg16[%c3_233, %c0_234, %c0_235] : memref<5x1x32xf32, #tpu.memory_space<vmem>>, vector<1x1x32xf32>
    %395 = vector.shape_cast %394 : vector<1x1x32xf32> to vector<1x32xf32>
    %396 = vector.broadcast %395 : vector<1x32xf32> to vector<32x32xf32>
    %397 = arith.addf %393, %396 : vector<32x32xf32>
    %398 = vector.extract_strided_slice %361 {offsets = [0, 0], sizes = [32, 32], strides = [1, 1]} : vector<96x32xf32> to vector<32x32xf32>
    %cst_236 = arith.constant dense<0.000000e+00> : vector<32x32xf32>
    %399 = tpu.matmul %357, %398, %cst_236 {dimension_numbers = #tpu.dot_dimension_numbers<[1], [0], [0], [1], [0, 0, 1, 1], [], []>} : vector<32x32xf32>, vector<32x32xf32>, vector<32x32xf32> -> vector<32x32xf32>
    %400 = vector.extract_strided_slice %361 {offsets = [32, 0], sizes = [32, 32], strides = [1, 1]} : vector<96x32xf32> to vector<32x32xf32>
    %cst_237 = arith.constant dense<0.000000e+00> : vector<4x32xf32>
    %401 = tpu.matmul %363, %400, %cst_237 {dimension_numbers = #tpu.dot_dimension_numbers<[1], [0], [0], [1], [0, 0, 1, 1], [], []>} : vector<4x32xf32>, vector<32x32xf32>, vector<4x32xf32> -> vector<4x32xf32>
    %402 = vector.extract_strided_slice %361 {offsets = [64, 0], sizes = [32, 32], strides = [1, 1]} : vector<96x32xf32> to vector<32x32xf32>
    %cst_238 = arith.constant dense<0.000000e+00> : vector<1x32xf32>
    %403 = tpu.matmul %365, %402, %cst_238 {dimension_numbers = #tpu.dot_dimension_numbers<[1], [0], [0], [1], [0, 0, 1, 1], [], []>} : vector<1x32xf32>, vector<32x32xf32>, vector<1x32xf32> -> vector<1x32xf32>
    %404 = vector.broadcast %403 : vector<1x32xf32> to vector<4x32xf32>
    %405 = arith.addf %401, %404 : vector<4x32xf32>
    %406 = vector.shape_cast %399 : vector<32x32xf32> to vector<4x8x32xf32>
    %407 = vector.shape_cast %405 : vector<4x32xf32> to vector<4x1x32xf32>
    %408 = vector.broadcast %407 : vector<4x1x32xf32> to vector<4x8x32xf32>
    %409 = arith.addf %406, %408 : vector<4x8x32xf32>
    %410 = vector.shape_cast %409 : vector<4x8x32xf32> to vector<32x32xf32>
    %411 = arith.addf %410, %397 : vector<32x32xf32>
    %c4_239 = arith.constant 4 : index
    %c0_240 = arith.constant 0 : index
    %c0_241 = arith.constant 0 : index
    %412 = vector.load %arg13[%c4_239, %c0_240, %c0_241] : memref<5x96x32xf32, #tpu.memory_space<vmem>>, vector<1x96x32xf32>
    %413 = vector.shape_cast %412 : vector<1x96x32xf32> to vector<96x32xf32>
    %c4_242 = arith.constant 4 : index
    %c0_243 = arith.constant 0 : index
    %c0_244 = arith.constant 0 : index
    %414 = vector.load %arg17[%c4_242, %c0_243, %c0_244] : memref<5x96x32xf32, #tpu.memory_space<vmem>>, vector<1x96x32xf32>
    %415 = vector.shape_cast %414 : vector<1x96x32xf32> to vector<96x32xf32>
    %416 = vector.shape_cast %411 : vector<32x32xf32> to vector<4x8x32xf32>
    %cst_245 = arith.constant dense<0xFF800000> : vector<4x32xf32>
    %417 = vector.multi_reduction <maximumf>, %416, %cst_245 [1] : vector<4x8x32xf32> to vector<4x32xf32>
    %cst_246 = arith.constant dense<0xFF800000> : vector<32xf32>
    %418 = vector.multi_reduction <maximumf>, %417, %cst_246 [0] : vector<4x32xf32> to vector<32xf32>
    %419 = vector.shape_cast %418 : vector<32xf32> to vector<1x32xf32>
    %cst_247 = arith.constant 0.000000e+00 : f32
    %420 = vector.broadcast %cst_247 : f32 to vector<32x32xf32>
    %421 = arith.maximumf %411, %420 : vector<32x32xf32>
    %422 = vector.extract_strided_slice %413 {offsets = [0, 0], sizes = [32, 32], strides = [1, 1]} : vector<96x32xf32> to vector<32x32xf32>
    %cst_248 = arith.constant dense<0.000000e+00> : vector<32x32xf32>
    %423 = tpu.matmul %421, %422, %cst_248 {dimension_numbers = #tpu.dot_dimension_numbers<[1], [0], [0], [1], [0, 0, 1, 1], [], []>} : vector<32x32xf32>, vector<32x32xf32>, vector<32x32xf32> -> vector<32x32xf32>
    %c4_249 = arith.constant 4 : index
    %c0_250 = arith.constant 0 : index
    %c0_251 = arith.constant 0 : index
    %424 = vector.load %arg14[%c4_249, %c0_250, %c0_251] : memref<5x1x32xf32, #tpu.memory_space<vmem>>, vector<1x1x32xf32>
    %425 = vector.shape_cast %424 : vector<1x1x32xf32> to vector<1x32xf32>
    %426 = vector.broadcast %425 : vector<1x32xf32> to vector<32x32xf32>
    %427 = arith.addf %423, %426 : vector<32x32xf32>
    %cst_252 = arith.constant 0.000000e+00 : f32
    %428 = vector.broadcast %cst_252 : f32 to vector<4x32xf32>
    %429 = arith.maximumf %417, %428 : vector<4x32xf32>
    %430 = vector.extract_strided_slice %413 {offsets = [32, 0], sizes = [32, 32], strides = [1, 1]} : vector<96x32xf32> to vector<32x32xf32>
    %cst_253 = arith.constant dense<0.000000e+00> : vector<4x32xf32>
    %431 = tpu.matmul %429, %430, %cst_253 {dimension_numbers = #tpu.dot_dimension_numbers<[1], [0], [0], [1], [0, 0, 1, 1], [], []>} : vector<4x32xf32>, vector<32x32xf32>, vector<4x32xf32> -> vector<4x32xf32>
    %cst_254 = arith.constant 0.000000e+00 : f32
    %432 = vector.broadcast %cst_254 : f32 to vector<1x32xf32>
    %433 = arith.maximumf %419, %432 : vector<1x32xf32>
    %434 = vector.extract_strided_slice %413 {offsets = [64, 0], sizes = [32, 32], strides = [1, 1]} : vector<96x32xf32> to vector<32x32xf32>
    %cst_255 = arith.constant dense<0.000000e+00> : vector<1x32xf32>
    %435 = tpu.matmul %433, %434, %cst_255 {dimension_numbers = #tpu.dot_dimension_numbers<[1], [0], [0], [1], [0, 0, 1, 1], [], []>} : vector<1x32xf32>, vector<32x32xf32>, vector<1x32xf32> -> vector<1x32xf32>
    %436 = vector.broadcast %435 : vector<1x32xf32> to vector<4x32xf32>
    %437 = arith.addf %431, %436 : vector<4x32xf32>
    %438 = vector.shape_cast %427 : vector<32x32xf32> to vector<4x8x32xf32>
    %439 = vector.shape_cast %437 : vector<4x32xf32> to vector<4x1x32xf32>
    %440 = vector.broadcast %439 : vector<4x1x32xf32> to vector<4x8x32xf32>
    %441 = arith.addf %438, %440 : vector<4x8x32xf32>
    %442 = vector.shape_cast %441 : vector<4x8x32xf32> to vector<32x32xf32>
    %cst_256 = arith.constant 0.000000e+00 : f32
    %443 = vector.broadcast %cst_256 : f32 to vector<32x32xf32>
    %444 = arith.maximumf %442, %443 : vector<32x32xf32>
    %c4_257 = arith.constant 4 : index
    %c0_258 = arith.constant 0 : index
    %c0_259 = arith.constant 0 : index
    %445 = vector.load %arg15[%c4_257, %c0_258, %c0_259] : memref<5x32x32xf32, #tpu.memory_space<vmem>>, vector<1x32x32xf32>
    %446 = vector.shape_cast %445 : vector<1x32x32xf32> to vector<32x32xf32>
    %cst_260 = arith.constant dense<0.000000e+00> : vector<32x32xf32>
    %447 = tpu.matmul %444, %446, %cst_260 {dimension_numbers = #tpu.dot_dimension_numbers<[1], [0], [0], [1], [0, 0, 1, 1], [], []>} : vector<32x32xf32>, vector<32x32xf32>, vector<32x32xf32> -> vector<32x32xf32>
    %c4_261 = arith.constant 4 : index
    %c0_262 = arith.constant 0 : index
    %c0_263 = arith.constant 0 : index
    %448 = vector.load %arg16[%c4_261, %c0_262, %c0_263] : memref<5x1x32xf32, #tpu.memory_space<vmem>>, vector<1x1x32xf32>
    %449 = vector.shape_cast %448 : vector<1x1x32xf32> to vector<1x32xf32>
    %450 = vector.broadcast %449 : vector<1x32xf32> to vector<32x32xf32>
    %451 = arith.addf %447, %450 : vector<32x32xf32>
    %452 = vector.extract_strided_slice %415 {offsets = [0, 0], sizes = [32, 32], strides = [1, 1]} : vector<96x32xf32> to vector<32x32xf32>
    %cst_264 = arith.constant dense<0.000000e+00> : vector<32x32xf32>
    %453 = tpu.matmul %411, %452, %cst_264 {dimension_numbers = #tpu.dot_dimension_numbers<[1], [0], [0], [1], [0, 0, 1, 1], [], []>} : vector<32x32xf32>, vector<32x32xf32>, vector<32x32xf32> -> vector<32x32xf32>
    %454 = vector.extract_strided_slice %415 {offsets = [32, 0], sizes = [32, 32], strides = [1, 1]} : vector<96x32xf32> to vector<32x32xf32>
    %cst_265 = arith.constant dense<0.000000e+00> : vector<4x32xf32>
    %455 = tpu.matmul %417, %454, %cst_265 {dimension_numbers = #tpu.dot_dimension_numbers<[1], [0], [0], [1], [0, 0, 1, 1], [], []>} : vector<4x32xf32>, vector<32x32xf32>, vector<4x32xf32> -> vector<4x32xf32>
    %456 = vector.extract_strided_slice %415 {offsets = [64, 0], sizes = [32, 32], strides = [1, 1]} : vector<96x32xf32> to vector<32x32xf32>
    %cst_266 = arith.constant dense<0.000000e+00> : vector<1x32xf32>
    %457 = tpu.matmul %419, %456, %cst_266 {dimension_numbers = #tpu.dot_dimension_numbers<[1], [0], [0], [1], [0, 0, 1, 1], [], []>} : vector<1x32xf32>, vector<32x32xf32>, vector<1x32xf32> -> vector<1x32xf32>
    %458 = vector.broadcast %457 : vector<1x32xf32> to vector<4x32xf32>
    %459 = arith.addf %455, %458 : vector<4x32xf32>
    %460 = vector.shape_cast %453 : vector<32x32xf32> to vector<4x8x32xf32>
    %461 = vector.shape_cast %459 : vector<4x32xf32> to vector<4x1x32xf32>
    %462 = vector.broadcast %461 : vector<4x1x32xf32> to vector<4x8x32xf32>
    %463 = arith.addf %460, %462 : vector<4x8x32xf32>
    %464 = vector.shape_cast %463 : vector<4x8x32xf32> to vector<32x32xf32>
    %465 = arith.addf %464, %451 : vector<32x32xf32>
    %466 = vector.shape_cast %465 : vector<32x32xf32> to vector<4x8x32xf32>
    %cst_267 = arith.constant dense<0xFF800000> : vector<4x32xf32>
    %467 = vector.multi_reduction <maximumf>, %466, %cst_267 [1] : vector<4x8x32xf32> to vector<4x32xf32>
    %cst_268 = arith.constant 0.000000e+00 : f32
    %468 = vector.broadcast %cst_268 : f32 to vector<4x32xf32>
    %469 = arith.maximumf %467, %468 : vector<4x32xf32>
    %c0_269 = arith.constant 0 : index
    %c0_270 = arith.constant 0 : index
    %470 = vector.load %arg18[%c0_269, %c0_270] : memref<32x16xf32, #tpu.memory_space<vmem>>, vector<32x16xf32>
    %cst_271 = arith.constant dense<0.000000e+00> : vector<4x16xf32>
    %471 = tpu.matmul %469, %470, %cst_271 {dimension_numbers = #tpu.dot_dimension_numbers<[1], [0], [0], [1], [0, 0, 1, 1], [], []>} : vector<4x32xf32>, vector<32x16xf32>, vector<4x16xf32> -> vector<4x16xf32>
    %c0_272 = arith.constant 0 : index
    %c0_273 = arith.constant 0 : index
    %472 = vector.load %arg19[%c0_272, %c0_273] : memref<1x16xf32, #tpu.memory_space<vmem>>, vector<1x16xf32>
    %473 = vector.broadcast %472 : vector<1x16xf32> to vector<4x16xf32>
    %474 = arith.addf %471, %473 : vector<4x16xf32>
    %c0_274 = arith.constant 0 : index
    %c0_275 = arith.constant 0 : index
    %475 = vector.load %arg20[%c0_274, %c0_275] : memref<32x16xf32, #tpu.memory_space<vmem>>, vector<32x16xf32>
    %476 = vector.extract_strided_slice %475 {offsets = [0, 0], sizes = [16, 16], strides = [1, 1]} : vector<32x16xf32> to vector<16x16xf32>
    %cst_276 = arith.constant dense<0.000000e+00> : vector<4x16xf32>
    %477 = tpu.matmul %206, %476, %cst_276 {dimension_numbers = #tpu.dot_dimension_numbers<[1], [0], [0], [1], [0, 0, 1, 1], [], []>} : vector<4x16xf32>, vector<16x16xf32>, vector<4x16xf32> -> vector<4x16xf32>
    %478 = vector.extract_strided_slice %475 {offsets = [16, 0], sizes = [16, 16], strides = [1, 1]} : vector<32x16xf32> to vector<16x16xf32>
    %cst_277 = arith.constant dense<0.000000e+00> : vector<4x16xf32>
    %479 = tpu.matmul %474, %478, %cst_277 {dimension_numbers = #tpu.dot_dimension_numbers<[1], [0], [0], [1], [0, 0, 1, 1], [], []>} : vector<4x16xf32>, vector<16x16xf32>, vector<4x16xf32> -> vector<4x16xf32>
    %480 = arith.addf %477, %479 : vector<4x16xf32>
    %c0_278 = arith.constant 0 : index
    %c0_279 = arith.constant 0 : index
    %481 = vector.load %arg21[%c0_278, %c0_279] : memref<1x16xf32, #tpu.memory_space<vmem>>, vector<1x16xf32>
    %482 = vector.broadcast %481 : vector<1x16xf32> to vector<4x16xf32>
    %483 = arith.addf %480, %482 : vector<4x16xf32>
    %c0_280 = arith.constant 0 : index
    %c0_281 = arith.constant 0 : index
    %c0_282 = arith.constant 0 : index
    %484 = vector.load %arg23[%c0_280, %c0_281, %c0_282] : memref<1x4x16xf32, #tpu.memory_space<vmem>>, vector<1x4x16xf32>
    %485 = vector.shape_cast %484 : vector<1x4x16xf32> to vector<4x16xf32>
    %486 = vector.shape_cast %483 : vector<4x16xf32> to vector<1x4x16xf32>
    tpu.vector_store %arg23[%c0_280, %c0_281, %c0_282], %486 {strides = array<i32>} : memref<1x4x16xf32, #tpu.memory_space<vmem>>, vector<1x4x16xf32>,
    return
  }
  func.func @transform_0(%arg0: i32) -> (i32, i32, i32, i32) {
    %c0_i32 = arith.constant 0 : i32
    %c0_i32_0 = arith.constant 0 : i32
    %c0_i32_1 = arith.constant 0 : i32
    %c0_i32_2 = arith.constant 0 : i32
    return %arg0, %c0_i32, %c0_i32_0, %c0_i32_1 : i32, i32, i32, i32
  }
  func.func @transform_1(%arg0: i32) -> (i32, i32) {
    %c0_i32 = arith.constant 0 : i32
    %c0_i32_0 = arith.constant 0 : i32
    %c0_i32_1 = arith.constant 0 : i32
    return %c0_i32, %c0_i32_0 : i32, i32
  }
  func.func @transform_2(%arg0: i32) -> (i32, i32) {
    %c0_i32 = arith.constant 0 : i32
    %c0_i32_0 = arith.constant 0 : i32
    %c0_i32_1 = arith.constant 0 : i32
    return %c0_i32, %c0_i32_0 : i32, i32
  }
  func.func @transform_3(%arg0: i32) -> (i32, i32, i32) {
    %c0_i32 = arith.constant 0 : i32
    %c0_i32_0 = arith.constant 0 : i32
    %c0_i32_1 = arith.constant 0 : i32
    %c0_i32_2 = arith.constant 0 : i32
    return %c0_i32, %c0_i32_0, %c0_i32_1 : i32, i32, i32
  }
  func.func @transform_4(%arg0: i32) -> (i32, i32, i32) {
    %c0_i32 = arith.constant 0 : i32
    %c0_i32_0 = arith.constant 0 : i32
    %c0_i32_1 = arith.constant 0 : i32
    %c0_i32_2 = arith.constant 0 : i32
    return %c0_i32, %c0_i32_0, %c0_i32_1 : i32, i32, i32
  }
  func.func @transform_5(%arg0: i32) -> (i32, i32, i32) {
    %c0_i32 = arith.constant 0 : i32
    %c0_i32_0 = arith.constant 0 : i32
    %c0_i32_1 = arith.constant 0 : i32
    %c0_i32_2 = arith.constant 0 : i32
    return %c0_i32, %c0_i32_0, %c0_i32_1 : i32, i32, i32
  }
  func.func @transform_6(%arg0: i32) -> (i32, i32, i32) {
    %c0_i32 = arith.constant 0 : i32
    %c0_i32_0 = arith.constant 0 : i32
    %c0_i32_1 = arith.constant 0 : i32
    %c0_i32_2 = arith.constant 0 : i32
    return %c0_i32, %c0_i32_0, %c0_i32_1 : i32, i32, i32
  }
  func.func @transform_7(%arg0: i32) -> (i32, i32, i32) {
    %c0_i32 = arith.constant 0 : i32
    %c0_i32_0 = arith.constant 0 : i32
    %c0_i32_1 = arith.constant 0 : i32
    %c0_i32_2 = arith.constant 0 : i32
    return %c0_i32, %c0_i32_0, %c0_i32_1 : i32, i32, i32
  }
  func.func @transform_8(%arg0: i32) -> (i32, i32) {
    %c0_i32 = arith.constant 0 : i32
    %c0_i32_0 = arith.constant 0 : i32
    %c0_i32_1 = arith.constant 0 : i32
    return %c0_i32, %c0_i32_0 : i32, i32
  }
  func.func @transform_9(%arg0: i32) -> (i32, i32) {
    %c0_i32 = arith.constant 0 : i32
    %c0_i32_0 = arith.constant 0 : i32
    %c0_i32_1 = arith.constant 0 : i32
    return %c0_i32, %c0_i32_0 : i32, i32
  }
  func.func @transform_10(%arg0: i32) -> (i32, i32) {
    %c0_i32 = arith.constant 0 : i32
    %c0_i32_0 = arith.constant 0 : i32
    %c0_i32_1 = arith.constant 0 : i32
    return %c0_i32, %c0_i32_0 : i32, i32
  }
  func.func @transform_11(%arg0: i32) -> (i32, i32) {
    %c0_i32 = arith.constant 0 : i32
    %c0_i32_0 = arith.constant 0 : i32
    %c0_i32_1 = arith.constant 0 : i32
    return %c0_i32, %c0_i32_0 : i32, i32
  }
  func.func @transform_12(%arg0: i32) -> (i32, i32, i32) {
    %c0_i32 = arith.constant 0 : i32
    %c0_i32_0 = arith.constant 0 : i32
    %c0_i32_1 = arith.constant 0 : i32
    %c0_i32_2 = arith.constant 0 : i32
    return %c0_i32, %c0_i32_0, %c0_i32_1 : i32, i32, i32
  }
  func.func @transform_13(%arg0: i32) -> (i32, i32, i32) {
    %c0_i32 = arith.constant 0 : i32
    %c0_i32_0 = arith.constant 0 : i32
    %c0_i32_1 = arith.constant 0 : i32
    %c0_i32_2 = arith.constant 0 : i32
    return %c0_i32, %c0_i32_0, %c0_i32_1 : i32, i32, i32
  }
  func.func @transform_14(%arg0: i32) -> (i32, i32, i32) {
    %c0_i32 = arith.constant 0 : i32
    %c0_i32_0 = arith.constant 0 : i32
    %c0_i32_1 = arith.constant 0 : i32
    %c0_i32_2 = arith.constant 0 : i32
    return %c0_i32, %c0_i32_0, %c0_i32_1 : i32, i32, i32
  }
  func.func @transform_15(%arg0: i32) -> (i32, i32, i32) {
    %c0_i32 = arith.constant 0 : i32
    %c0_i32_0 = arith.constant 0 : i32
    %c0_i32_1 = arith.constant 0 : i32
    %c0_i32_2 = arith.constant 0 : i32
    return %c0_i32, %c0_i32_0, %c0_i32_1 : i32, i32, i32
  }
  func.func @transform_16(%arg0: i32) -> (i32, i32, i32) {
    %c0_i32 = arith.constant 0 : i32
    %c0_i32_0 = arith.constant 0 : i32
    %c0_i32_1 = arith.constant 0 : i32
    %c0_i32_2 = arith.constant 0 : i32
    return %c0_i32, %c0_i32_0, %c0_i32_1 : i32, i32, i32
  }
  func.func @transform_17(%arg0: i32) -> (i32, i32) {
    %c0_i32 = arith.constant 0 : i32
    %c0_i32_0 = arith.constant 0 : i32
    %c0_i32_1 = arith.constant 0 : i32
    return %c0_i32, %c0_i32_0 : i32, i32
  }
  func.func @transform_18(%arg0: i32) -> (i32, i32) {
    %c0_i32 = arith.constant 0 : i32
    %c0_i32_0 = arith.constant 0 : i32
    %c0_i32_1 = arith.constant 0 : i32
    return %c0_i32, %c0_i32_0 : i32, i32
  }
  func.func @transform_19(%arg0: i32) -> (i32, i32) {
    %c0_i32 = arith.constant 0 : i32
    %c0_i32_0 = arith.constant 0 : i32
    %c0_i32_1 = arith.constant 0 : i32
    return %c0_i32, %c0_i32_0 : i32, i32
  }
  func.func @transform_20(%arg0: i32) -> (i32, i32) {
    %c0_i32 = arith.constant 0 : i32
    %c0_i32_0 = arith.constant 0 : i32
    %c0_i32_1 = arith.constant 0 : i32
    return %c0_i32, %c0_i32_0 : i32, i32
  }
  func.func @transform_21(%arg0: i32) -> (i32, i32, i32) {
    %c0_i32 = arith.constant 0 : i32
    %c0_i32_0 = arith.constant 0 : i32
    %c0_i32_1 = arith.constant 0 : i32
    return %arg0, %c0_i32, %c0_i32_0 : i32, i32, i32
  }
  func.func @transform_22(%arg0: i32) -> (i32, i32, i32) {
    %c0_i32 = arith.constant 0 : i32
    %c0_i32_0 = arith.constant 0 : i32
    %c0_i32_1 = arith.constant 0 : i32
    return %arg0, %c0_i32, %c0_i32_0 : i32, i32, i32
  }
}

</mosaic_0001>

<bundles_post_ra>
// kernel: forward.1
= control target key start
LH: loop header
LB: loop body
LE: loop exit
PB: predicated region body
PF: predicated region fallthrough
CT: control target
= control target key end

     0   :  { %s12009_s0 = inlined_call_operand.vmem [shape: f32[2,4,8,3], index: 0, kind: input, shape index: {}]   ;;  %s12010_s1 = inlined_call_operand.vmem [shape: f32[3,64], index: 1, kind: input, shape index: {}]   ;;  %s12011_s2 = inlined_call_operand.vmem [shape: f32[1,64], index: 2, kind: input, shape index: {}]   ;;  %s12012_s3 = inlined_call_operand.vmem [shape: f32[5,64,32], index: 3, kind: input, shape index: {}]   ;;  %s12013_s4 = inlined_call_operand.vmem [shape: f32[5,1,32], index: 4, kind: input, shape index: {}]   ;;  %s12014_s5 = inlined_call_operand.vmem [shape: f32[5,32,32], index: 5, kind: input, shape index: {}]   ;;  %s12015_s6 = inlined_call_operand.vmem [shape: f32[5,1,32], index: 6, kind: input, shape index: {}]   ;;  %s12016_s7 = inlined_call_operand.vmem [shape: f32[5,64,32], index: 7, kind: input, shape index: {}]   ;;  %s12017_s8 = inlined_call_operand.vmem [shape: f32[32,16], index: 8, kind: input, shape index: {}]   ;;  %s12018_s9 = inlined_call_operand.vmem [shape: f32[1,16], index: 9, kind: input, shape index: {}]   ;;  %s12019_s10 = inlined_call_operand.vmem [shape: f32[4,96], index: 10, kind: input, shape index: {}]   ;;  %s12020_s11 = inlined_call_operand.vmem [shape: f32[1,96], index: 11, kind: input, shape index: {}]   ;;  %s12021_s12 = inlined_call_operand.vmem [shape: f32[5,96,32], index: 12, kind: input, shape index: {}]   ;;  %s12022_s13 = inlined_call_operand.vmem [shape: f32[5,1,32], index: 13, kind: input, shape index: {}]   ;;  %s12023_s14 = inlined_call_operand.vmem [shape: f32[5,32,32], index: 14, kind: input, shape index: {}]   ;;  %s12024_s15 = inlined_call_operand.vmem [shape: f32[5,1,32], index: 15, kind: input, shape index: {}]   ;;  %s12025_s16 = inlined_call_operand.vmem [shape: f32[5,96,32], index: 16, kind: input, shape index: {}]   ;;  %s12026_s17 = inlined_call_operand.vmem [shape: f32[32,16], index: 17, kind: input, shape index: {}]   ;;  %s12027_s18 = inlined_call_operand.vmem [shape: f32[1,16], index: 18, kind: input, shape index: {}]   ;;  %s12028_s19 = inlined_call_operand.vmem [shape: f32[32,16], index: 19, kind: input, shape index: {}]   ;;  %s12029_s20 = inlined_call_operand.vmem [shape: f32[1,16], index: 20, kind: input, shape index: {}]   ;;  %s12030_s21 = inlined_call_operand.hbm [shape: f32[2,4,16], index: 21, kind: output, shape index: {0}]   ;;  %s12031_s22 = inlined_call_operand.hbm [shape: f32[2,4,16], index: 22, kind: output, shape index: {1}]  }
   0x1   :  { %12046 = sst [smem:[#allocation14_spill]] %s12009_s0 }
   0x2   :  { %12047 = sst [smem:[#allocation15_spill]] %s12010_s1 }
   0x3   :  { %12048 = sst [smem:[#allocation16_spill]] %s12011_s2 }
   0x4   :  { %12049 = sst [smem:[#allocation17_spill]] %s12012_s3 }
   0x5   :  { %12050 = sst [smem:[#allocation18_spill]] %s12013_s4 }
   0x6   :  { %12051 = sst [smem:[#allocation19_spill]] %s12014_s5 }
   0x7   :  { %12052 = sst [smem:[#allocation20_spill]] %s12015_s6 }
   0x8   :  { %12053 = sst [smem:[#allocation21_spill]] %s12016_s7 }
   0x9   :  { %12054 = sst [smem:[#allocation22_spill]] %s12017_s8 }
   0xa   :  { %12055 = sst [smem:[#allocation23_spill]] %s12018_s9 }
   0xb   :  { %12056 = sst [smem:[#allocation24_spill]] %s12019_s10 }
   0xc   :  { %12057 = sst [smem:[#allocation25_spill]] %s12031_s22 }
   0xd   :  { %28 = vsyncpa [#allocation3], 0 }
   0xe   :  { %30 = vsyncpa [#allocation3 + $0x1], 0 }
   0xf   :  { %31 = vsyncpa [#allocation5], 0 }
  0x10   :  { %33 = vsyncpa [#allocation5 + $0x1], 0  ;;  %s10321_s3 = smov 0   ;;  %s10323_s28 = smov 0  }
  0x11   :  { %s10325_s29 = smov 0   ;;  %s10327_s30 = smov 0  }
  0x12 LB: > { %12058 = sst [smem:[#allocation8_spill]] %s10186_s3  ;;  %s10342_s4 = sadd.s32 4294967295, %s10198_s30   ;;  %s10198_s30 = sphi %s10327_s30, %s12083_s30   ;;  %s10194_s29 = sphi %s10325_s29, %s12085_s29   ;;  %s10190_s28 = sphi %s10323_s28, %s12087_s28   ;;  %s10186_s3 = sphi %s10321_s3, %s12086_s3  }
  0x13   : > { %12059 = sst [smem:[#allocation9_spill]] %s10194_s29  ;;  %s7890_s0 = sadd.s32 4294967294, %s10198_s30  }
  0x14   : > { %12060 = sst [smem:[#allocation10_spill]] %s10198_s30  ;;  %s10346_s23 = sadd.s32 1, %s10198_s30  }
  0x15   : > { %12061 = sst [smem:[#allocation11_spill]] %s10346_s23  ;;  %s492_s1 = sadd.s32 1, %s10194_s29 }
  0x16   : > { %s489_s5 = ssub.s32 %s10198_s30, %s10346_s23  ;;  %p502_p0 = scmp.ne.s32.totalorder %s10194_s29, %s10190_s28 }
  0x17   : > { %p490_p1 = scmp.eq.s32.totalorder %s489_s5, 0  ;;  %p503_p2 = scmp.eq.s32.totalorder %s10342_s4, 1 }
  0x18   : > { %p508_p3 = scmp.ne.s32.totalorder %s10190_s28, %s10186_s3  ;;  %p509_p4 = scmp.eq.s32.totalorder %s7890_s0, 1 }
  0x19   : > { %s10357_s24 = scalar_select %p490_p1, %s10194_s29, %s492_s1  }
  0x1a   : > { %p10359_p5 = por %p503_p2, %p502_p0  ;;  %p10363_p6 = por %p509_p4, %p508_p3 }
  0x1b   : > { %12062 = sst [smem:[#allocation12_spill]] %s10357_s24  ;;  %p7893_p7 = scmp.ge.s32.totalorder %s10198_s30, 1 }
  0x1c   : > { %s12064_s25 = scalar_select %p10363_p6, 1, 0 }
  0x1d   : > { %p621_p8 = scmp.lt.s32.totalorder %s10198_s30, 3 }
  0x1e   : > { %12065 = sst [smem:[#allocation13_spill]] %s12064_s25 }
  0x1f   : > { %p622_p9 = pnand %p7893_p7, %p621_p8 }
  0x20   : > { %s12066_s27 = sld [smem:[#allocation15_spill]] (!%p622_p9)  ;;  %vm718_vm0 = vcmask (!%p622_p9), 1042432   ;;  %p688_p10 = scmp.lt.s32.totalorder (!%p622_p9), %s10342_s4, 1  ;;  %vm705_vm1 = vcmask (!%p622_p9), 23552   ;;  %vm839_vm2 = vcmask (!%p622_p9), 523264   ;;  %vm947_vm3 = vcmask (!%p622_p9), 261120  }
  0x21   : > { %625 = sbr.rel (%p622_p9) target bundleno = 5672 (0x1628), region = 104  ;;  %s12067_s5 = sld [smem:[#allocation17_spill]] (!%p622_p9)  ;;  %vm10201_vm4 = vmmov (!%p622_p9), 0   ;;  %vm1305_vm5 = vcmask (!%p622_p9), 1041409   ;;  %vm1307_vm6 = vcmask (!%p622_p9), 1042434   ;;  %vm1309_vm7 = vcmask (!%p622_p9), 1043459  }
  0x22   : > { %s12068_s26 = sld [smem:[#allocation14_spill]] (!%p622_p9)  ;;  %s12069_s23 = sld [smem:[#allocation19_spill]] (!%p622_p9)  ;;  %vm3787_vm8 = vcmask (!%p622_p9), 125952   ;;  %vm3983_vm9 = vcmask (!%p622_p9), 785408   ;;  %vm7611_vm10 = vcmask (!%p622_p9), 130048  }
  0x23   : > { %s12070_s30 = sld [smem:[#allocation16_spill]] (!%p622_p9)  ;;  %s12071_s7 = sld [smem:[#allocation21_spill]] (!%p622_p9) }
  0x24   : > { %s12072_s25 = sld [smem:[#allocation18_spill]] (!%p622_p9)  ;;  %s12074_s8 = sld [smem:[#allocation22_spill]] (!%p622_p9) }
  0x25   : > { %s12075_s10 = sld [smem:[#allocation24_spill]] (!%p622_p9)  ;;  %s12076_s9 = sld [smem:[#allocation23_spill]] (!%p622_p9) }
  0x26   : > { %v697_v0 = vld [vmem:[%s12066_s27] sm:$0x7] (!%p622_p9) }
  0x27   : > { %v807_v1 = vld [vmem:[%s12067_s5] sm:$0xff] (!%p622_p9)  ;;  %8706 = vmatprep.subr.msk.mxu0 (!%p622_p9), %vm718_vm0, %v697_v0  ;;  %v808_v2 = vld [vmem:[%s12067_s5 + $0x8] sm:$0xff] (!%p622_p9)  ;;  %v809_v3 = vld [vmem:[%s12067_s5 + $0x10] sm:$0xff] (!%p622_p9) }
  0x28   : > { %v810_v4 = vld [vmem:[%s12067_s5 + $0x18] sm:$0xff]  ;;  %8707 = vmatpush3.msk.msra.mxu0 %vm718_vm0, %v697_v0  ;;  %s689_s27 = scalar_select %p688_p10, %s10342_s4, 1  ;;  %v9490_v5 = vpack.c.bf16 %v808_v2, %v807_v1  ;;  %v811_v7 = vld [vmem:[%s12067_s5 + $0x20] sm:$0xff]  ;;  %v812_v8 = vld [vmem:[%s12067_s5 + $0x28] sm:$0xff] }
  0x29   : > { %v9494_v6 = vpack.c.bf16 %v810_v4, %v809_v3  ;;  %v9498_v12 = vpack.c.bf16 %v812_v8, %v811_v7  ;;  %v813_v14 = vld [vmem:[%s12067_s5 + $0x30] sm:$0xff]  ;;  %v814_v15 = vld [vmem:[%s12067_s5 + $0x38] sm:$0xff]  ;;  %v816_v17 = vld [vmem:[%s12069_s23] sm:$0xff]  ;;  %v10200_v3 = vmov 0.0|0.0  }
  0x2a   : > { %s8295_s24 = sshll.u32 %s689_s27, 5  ;;  %9491 = vmatprep.subr.bf16.mxu1 %v9490_v5  ;;  %v9502_v16 = vpack.c.bf16 %v814_v15, %v813_v14  ;;  %v817_v18 = vld [vmem:[%s12069_s23 + $0x8] sm:$0xff]  ;;  %v7898_v20 = vld [vmem:[%s12070_s30] ss:$0 sm:$0xff]  ;;  %v818_v33 = vld [vmem:[%s12069_s23 + $0x10] sm:$0xff]  ;;  %s12073_s27 = sld [smem:[#allocation20_spill]] }
  0x2b   : > { %s10397_s2 = scalar_lea.vmem %s12068_s26, %s8295_s24  ;;  %9493 = vmatpush3.bf16.msra.mxu1 %v9490_v5  ;;  %v9506_v19 = vpack.c.bf16 %v817_v18, %v816_v17  ;;  %v819_v34 = vld [vmem:[%s12069_s23 + $0x18] sm:$0xff]  ;;  %v821_v36 = vld [vmem:[%s12071_s7] sm:$0xff]  ;;  %v822_v37 = vld [vmem:[%s12071_s7 + $0x8] sm:$0xff]  ;;  %s11098_s30 = sand.u32 1, %s10190_s28  }
  0x2c   : > { %v693_v9 = vld [vmem:[%s10397_s2] sm:$0xff]  ;;  %v694_v10 = vld [vmem:[%s10397_s2 + $0x8] sm:$0xff]  ;;  %v695_v11 = vld [vmem:[%s10397_s2 + $0x10] sm:$0xff]  ;;  %9495 = vmatprep.subr.bf16.mxu1 %v9494_v6  ;;  %v9510_v35 = vpack.c.bf16 %v819_v34, %v818_v33  ;;  %v9514_v38 = vpack.c.bf16 %v822_v37, %v821_v36  ;;  %s12044_s0 = sshll.u32 %s11098_s30, 2  ;;  %s10204_s26 = smov [#allocation2]  }
  0x2d   : > { %8708 = vmatprep.mubr.msk.f32.mxu0 %vm705_vm1, %v693_v9  ;;  %v696_v13 = vld [vmem:[%s10397_s2 + $0x18] sm:$0xff]  ;;  %9507 = vmatprep.subr.bf16.mxu0 %v9506_v19  ;;  %v7918_v39 = vld [vmem:[%s12067_s5 + $0x40] sm:$0xff]  ;;  %v7919_v40 = vld [vmem:[%s12067_s5 + $0x48] sm:$0xff]  ;;  %s11114_s24 = scalar_lea.vmem [#allocation2], %s12044_s0  ;;  %s7768_s0 = scalar_lea.sflag [#allocation3], %s11098_s30 }
  0x2e   : > { %8709 = vmatmul.mubr.msk.f32.vlgmr.msra.gmra.mrb[0].mxu0 %vm705_vm1, %v694_v10  ;;  %v9530_v41 = vpack.c.bf16 %v7919_v40, %v7918_v39  ;;  %v7904_v42 = vld [vmem:[%s12072_s25] ss:$0 sm:$0xff]  ;;  %v823_v47 = vld [vmem:[%s12071_s7 + $0x10] sm:$0xff]  ;;  %v824_v48 = vld [vmem:[%s12071_s7 + $0x18] sm:$0xff]  ;;  %s10108_s22 = sshll.u32 %s10204_s26, 4  ;;  %s10109_s22 = int_to_ptr.vmem [resolvable:$false] %s10108_s22 }
  0x2f   : > { %8711 = vmatprep.mubr.msk.f32.mxu0 %vm705_vm1, %v695_v11  ;;  %9497 = vmatpush3.bf16.msra.mxu1 %v9494_v6  ;;  %v9518_v54 = vpack.c.bf16 %v824_v48, %v823_v47  ;;  %v825_v56 = vld [vmem:[%s12071_s7 + $0x20] sm:$0xff]  ;;  %v826_v57 = vld [vmem:[%s12071_s7 + $0x28] sm:$0xff]  ;;  %v827_v61 = vld [vmem:[%s12071_s7 + $0x30] sm:$0xff] }
  0x30   : > { %9499 = vmatprep.subr.bf16.mxu1 %v9498_v12  ;;  %9509 = vmatpush3.bf16.msra.mxu0 %v9506_v19  ;;  %v9522_v60 = vpack.c.bf16 %v826_v57, %v825_v56  ;;  %v828_v62 = vld [vmem:[%s12071_s7 + $0x38] sm:$0xff]  ;;  %v7920_v0 = vld [vmem:[%s12067_s5 + $0x50] sm:$0xff]  ;;  %v7909_v4 = vld [vmem:[%s12073_s27] ss:$0 sm:$0xff] }
  0x31   : > { %9511 = vmatprep.subr.bf16.mxu0 %v9510_v35  ;;  %v9526_v63 = vpack.c.bf16 %v828_v62, %v827_v61  ;;  %v7921_v1 = vld [vmem:[%s12067_s5 + $0x58] sm:$0xff]  ;;  %v7922_v8 = vld [vmem:[%s12067_s5 + $0x60] sm:$0xff]  ;;  %v7923_v9 = vld [vmem:[%s12067_s5 + $0x68] sm:$0xff] }
  0x32   : > { %8712 = vmatmul.mubr.msk.f32.gmra.mrb[2].mxu0 %vm705_vm1, %v696_v13  ;;  %v9534_v2 = vpack.c.bf16 %v7921_v1, %v7920_v0  ;;  %v7924_v17 = vld [vmem:[%s12067_s5 + $0x70] sm:$0xff]  ;;  %v7925_v18 = vld [vmem:[%s12067_s5 + $0x78] sm:$0xff] }
  0x33   : > { %9501 = vmatpush3.bf16.msra.mxu1 %v9498_v12  ;;  %v7932_v61 = vld [vmem:[%s12071_s7 + $0x70] sm:$0xff]  ;;  %v7933_v62 = vld [vmem:[%s12071_s7 + $0x78] sm:$0xff] }
  0x34   : > { %9503 = vmatprep.subr.bf16.mxu1 %v9502_v16  ;;  %9513 = vmatpush3.bf16.msra.mxu0 %v9510_v35  ;;  %v9564_v0 = vpack.c.bf16 %v7933_v62, %v7932_v61  ;;  %v7960_v62 = vld [vmem:[%s12067_s5 + $0xa0] sm:$0xff] }
  0x35   : > { %9515 = vmatprep.subr.bf16.mxu0 %v9514_v38 }
  0x37   : > { %9505 = vmatpush3.bf16.msra.mxu1 %v9502_v16  ;;  %v9539_v16 = vpack.c.bf16 %v7923_v9, %v7922_v8  ;;  %v7943_v9 = vld [vmem:[%s12069_s23 + $0x30] sm:$0xff] }
  0x38   : > { %9531 = vmatprep.subr.bf16.mxu1 %v9530_v41 }
 0x101   : > { %v8710_v21 = vpop.f32.mrb[0].mxu0 }
 0x102   : > { %v10422_v22 = vadd.f32 %v8710_v21, %v7898_v20  ;;  %v788_v23 = vpop.f32.mrb[1].mxu0 }
 0x103   : > { %v789_v24 = vadd.f32 %v7898_v20, %v788_v23 }
 0x104   : > { %v830_v27 = vmax.f32 %v10422_v22, 0.0 }
 0x105   : > { %v8713_v25 = vpop.f32.mrb[2].mxu0  ;;  %v829_v26 = vmax.f32 %v789_v24, 0.0 }
 0x106   : > { %v804_v28 = vadd.f32 %v8713_v25, %v7898_v20  ;;  %v798_v29 = vpop.f32.mrb[3].mxu0 }
 0x107   : > { %v799_v30 = vadd.f32 %v7898_v20, %v798_v29  ;;  %8730 = vmatprep.mubr.msk.f32.mxu1 %vm839_vm2, %v829_v26 }
 0x108   : > { %v832_v31 = vmax.f32 %v804_v28, 0.0  ;;  %8731 = vmatmul.mubr.msk.f32.vlgmr.msra.gmra.mrb[0].mxu1 %vm839_vm2, %v830_v27  ;;  %v9542_v27 = vpack.c.bf16 %v7925_v18, %v7924_v17 }
 0x109   : > { %v831_v32 = vmax.f32 %v799_v30, 0.0  ;;  %9533 = vmatpush3.bf16.msra.mxu1 %v9530_v41  ;;  %v10202_v41 = vmov 0.0  }
 0x10a   : > { %9535 = vmatprep.subr.bf16.mxu1 %v9534_v2 }
 0x10b   : > { %8733 = vmatprep.mubr.msk.f32.mxu1 %vm839_vm2, %v831_v32 }
 0x10c   : > { %8734 = vmatmul.mubr.msk.f32.gmra.mrb[2].mxu1 %vm839_vm2, %v832_v31 }
 0x10d   : > { %9537 = vmatpush3.bf16.msra.mxu1 %v9534_v2 }
 0x10e   : > { %9538 = vmatprep.subr.bf16.mxu1 %v10200_v3 }
 0x1db   : > { %v8732_v43 = vpop.f32.mrb[0].mxu1 }
 0x1dc   : > { %v924_v44 = vadd.f32 %v8732_v43, %v7904_v42  ;;  %v918_v45 = vpop.f32.mrb[1].mxu1 }
 0x1dd   : > { %v919_v46 = vadd.f32 %v7904_v42, %v918_v45 }
 0x1de   : > { %v938_v51 = vmax.f32 %v924_v44, 0.0 }
 0x1df   : > { %v937_v49 = vmax.f32 %v919_v46, 0.0  ;;  %v8735_v50 = vpop.f32.mrb[2].mxu1 }
 0x1e0   : > { %v934_v52 = vadd.f32 %v8735_v50, %v7904_v42  ;;  %v928_v53 = vpop.f32.mrb[3].mxu1 }
 0x1e1   : > { %v929_v55 = vadd.f32 %v7904_v42, %v928_v53  ;;  %8744 = vmatprep.mubr.msk.f32.mxu0 %vm947_vm3, %v937_v49 }
 0x1e2   : > { %v940_v58 = vmax.f32 %v934_v52, 0.0  ;;  %8745 = vmatmul.mubr.msk.f32.vlgmr.msra.gmra.mrb[4].mxu0 %vm947_vm3, %v938_v51 }
 0x1e3   : > { %v939_v59 = vmax.f32 %v929_v55, 0.0  ;;  %9517 = vmatpush3.bf16.msra.mxu0 %v9514_v38  ;;  %v7931_v55 = vld [vmem:[%s12071_s7 + $0x68] sm:$0xff] }
 0x1e4   : > { %9519 = vmatprep.subr.bf16.mxu0 %v9518_v54 }
 0x1e5   : > { %8747 = vmatprep.mubr.msk.f32.mxu0 %vm947_vm3, %v939_v59 }
 0x1e6   : > { %8748 = vmatmul.mubr.msk.f32.gmra.mrb[6].mxu0 %vm947_vm3, %v940_v58 }
 0x1e7   : > { %9521 = vmatpush3.bf16.msra.mxu0 %v9518_v54  ;;  %8766 = vmatprep.mubr.msk.f32.mxu0 %vm839_vm2, %v789_v24  ;;  %v7930_v54 = vld [vmem:[%s12071_s7 + $0x60] sm:$0xff] }
 0x1e8   : > { %9523 = vmatprep.subr.bf16.mxu0 %v9522_v60  ;;  %v9561_v59 = vpack.c.bf16 %v7931_v55, %v7930_v54 }
 0x1eb   : > { %9525 = vmatpush3.bf16.msra.mxu0 %v9522_v60 }
 0x1ec   : > { %9527 = vmatprep.subr.bf16.mxu0 %v9526_v63 }
 0x1ef   : > { %9529 = vmatpush3.bf16.msra.mxu0 %v9526_v63 }
 0x1f2   : > { %8767 = vmatmul.mubr.msk.f32.vlgmr.msra.gmra.mrb[4].mxu0 %vm839_vm2, %v10422_v22 }
 0x1f3   : > { %8769 = vmatprep.mubr.msk.f32.mxu0 %vm839_vm2, %v799_v30 }
 0x1f6   : > { %8770 = vmatmul.mubr.msk.f32.gmra.mrb[6].mxu0 %vm839_vm2, %v804_v28 }
 0x2c5   : > { %v8768_v5 = vpop.f32.mrb[4].mxu0 }
 0x2c6   : > { %v10487_v6 = vadd.f32 %v8768_v5, %v7909_v4  ;;  %v1123_v7 = vpop.f32.mrb[5].mxu0  ;;  %v7941_v5 = vld [vmem:[%s12069_s23 + $0x20] sm:$0xff] }
 0x2c7   : > { %v10495_v10 = vadd.f32 %v7909_v4, %v1123_v7  ;;  %v7942_v7 = vld [vmem:[%s12069_s23 + $0x28] sm:$0xff] }
 0x2c8   : > { %v1167_v11 = vsel %vm947_vm3, %v10487_v6, -inf  ;;  %v1189_v19 = vmax.f32 %v10487_v6, 0.0  ;;  %v9544_v8 = vpack.c.bf16 %v7942_v7, %v7941_v5 }
 0x2c9   : > { %v1168_v12 = vrot.slane %v1167_v11, 4  ;;  %v1160_v13 = vsel %vm947_vm3, %v10495_v10, -inf  ;;  %v1188_v14 = vmax.f32 %v10495_v10, 0.0  ;;  %v8771_v15 = vpop.f32.mrb[6].mxu0 }
 0x2ca   : > { %v1161_v20 = vrot.slane %v1160_v13, 4  ;;  %v10509_v21 = vadd.f32 %v8771_v15, %v7909_v4  ;;  %v1133_v22 = vpop.f32.mrb[7].mxu0  ;;  %9545 = vmatprep.subr.bf16.mxu0 %v9544_v8 }
 0x2cb   : > { %v1169_v23 = vmax.f32 %v1167_v11, %v1168_v12  ;;  %v10511_v24 = vadd.f32 %v7909_v4, %v1133_v22  ;;  %8780 = vmatprep.mubr.msk.f32.mxu1 %vm947_vm3, %v1188_v14  ;;  %9547 = vmatpush3.bf16.msra.mxu0 %v9544_v8  ;;  %v7944_v11 = vld [vmem:[%s12069_s23 + $0x38] sm:$0xff]  ;;  %v7927_v14 = vld [vmem:[%s12071_s7 + $0x48] sm:$0xff] }
 0x2cc   : > { %v1162_v25 = vmax.f32 %v1160_v13, %v1161_v20  ;;  %v1181_v26 = vsel %vm947_vm3, %v10509_v21, -inf  ;;  %8781 = vmatmul.mubr.msk.f32.vlgmr.msra.gmra.mrb[4].mxu1 %vm947_vm3, %v1189_v19  ;;  %v1191_v33 = vmax.f32 %v10509_v21, 0.0  ;;  %v9548_v12 = vpack.c.bf16 %v7944_v11, %v7943_v9  ;;  %v7926_v13 = vld [vmem:[%s12071_s7 + $0x40] sm:$0xff] }
 0x2cd   : > { %v1170_v28 = vrot.slane %v1169_v23, 2  ;;  %v1182_v29 = vrot.slane %v1181_v26, 4  ;;  %v1174_v30 = vsel %vm947_vm3, %v10511_v24, -inf  ;;  %v1190_v31 = vmax.f32 %v10511_v24, 0.0  ;;  %9540 = vmatpush3.bf16.msra.mxu1 %v9539_v16  ;;  %v7946_v11 = vld [vmem:[%s12073_s27 + $0x1] ss:$0 sm:$0xff] }
 0x2ce   : > { %v1163_v32 = vrot.slane %v1162_v25, 2  ;;  %v1175_v34 = vrot.slane %v1174_v30, 4  ;;  %9541 = vmatprep.subr.bf16.mxu1 %v10200_v3  ;;  %9549 = vmatprep.subr.bf16.mxu0 %v9548_v12  ;;  %v9552_v15 = vpack.c.bf16 %v7927_v14, %v7926_v13  ;;  %v10203_v20 = vmov 1966171168  }
 0x2cf   : > { %v1171_v35 = vmax.f32 %v1169_v23, %v1170_v28  ;;  %v1183_v36 = vmax.f32 %v1181_v26, %v1182_v29  ;;  %8783 = vmatprep.mubr.msk.f32.mxu1 %vm947_vm3, %v1190_v31  ;;  %9551 = vmatpush3.bf16.msra.mxu0 %v9548_v12  ;;  %v1385_v22 = vunpack.c.l.s4 %v10203_v20  ;;  %v1387_v23 = vlaneseq }
 0x2d0   : > { %v1164_v37 = vmax.f32 %v1162_v25, %v1163_v32  ;;  %v1176_v38 = vmax.f32 %v1174_v30, %v1175_v34  ;;  %8784 = vmatmul.mubr.msk.f32.gmra.mrb[6].mxu1 %vm947_vm3, %v1191_v33  ;;  %9553 = vmatprep.subr.bf16.mxu0 %v9552_v15  ;;  %v7935_v32 = vld [vmem:[%s12072_s25 + $0x1] ss:$0 sm:$0xff] }
 0x2d1   : > { %v1172_v39 = vrot.slane %v1171_v35, 1  ;;  %v1184_v40 = vrot.slane %v1183_v36, 2  ;;  %9543 = vmatpush3.bf16.msra.mxu1 %v9542_v27  ;;  %8794 = vmatprep.mubr.msk.f32.mxu1 %vm10201_vm4, %v10202_v41  ;;  %v1386_v25 = vunpack.c.0.s8 %v1385_v22  ;;  %v10568_v26 = vshrl.u32 %v1387_v23, 7 }
 0x2d2   : > { %v1165_v42 = vrot.slane %v1164_v37, 1  ;;  %v1177_v43 = vrot.slane %v1176_v38, 2  ;;  %9560 = vmatprep.subr.bf16.mxu1 %v10200_v3 }
 0x2d3   : > { %v1173_v44 = vmax.f32 %v1171_v35, %v1172_v39  ;;  %v1185_v45 = vmax.f32 %v1183_v36, %v1184_v40  ;;  %v10571_v27 = vsub.s32 %v1386_v25, %v10568_v26  ;;  %v10575_v30 = vsub.s32 0, %v10568_v26 }
 0x2d4   : > { %v1166_v46 = vmax.f32 %v1164_v37, %v1165_v42  ;;  %v1178_v47 = vmax.f32 %v1176_v38, %v1177_v43 }
 0x2d5   : > { %v1186_v48 = vrot.slane %v1185_v45, 1  ;;  %v1298_v50 = vmax.f32 %v1173_v44, 0.0 }
 0x2d6   : > { %v1179_v49 = vrot.slane %v1178_v47, 1  ;;  %v1297_v51 = vmax.f32 %v1166_v46, 0.0  ;;  %v1647_v1 = vsel %vm1305_vm5, %v1173_v44, %v1166_v46 }
 0x2d7   : > { %v1187_v52 = vmax.f32 %v1185_v45, %v1186_v48  ;;  %v7929_v48 = vld [vmem:[%s12071_s7 + $0x58] sm:$0xff] }
 0x2d8   : > { %v1180_v53 = vmax.f32 %v1178_v47, %v1179_v49  ;;  %v1306_v58 = vsel %vm1305_vm5, %v1298_v50, %v1297_v51  ;;  %v7928_v47 = vld [vmem:[%s12071_s7 + $0x50] sm:$0xff] }
 0x2d9   : > { %v1300_v57 = vmax.f32 %v1187_v52, 0.0 }
 0x2da   : > { %v1299_v56 = vmax.f32 %v1180_v53, 0.0  ;;  %v1648_v2 = vsel %vm1307_vm6, %v1180_v53, %v1647_v1  ;;  %v7962_v1 = vld [vmem:[%s12067_s5 + $0xb0] sm:$0xff] }
 0x2db   : > { %v1649_v4 = vsel %vm1309_vm7, %v1187_v52, %v1648_v2  ;;  %v7963_v2 = vld [vmem:[%s12067_s5 + $0xb8] sm:$0xff] }
 0x2dc   : > { %v1308_v60 = vsel %vm1307_vm6, %v1299_v56, %v1306_v58  ;;  %v9556_v56 = vpack.c.bf16 %v7929_v48, %v7928_v47 }
 0x2dd   : > { %v1310_v63 = vsel %vm1309_vm7, %v1300_v57, %v1308_v60  ;;  %v7956_v60 = vld [vmem:[%s12067_s5 + $0x80] sm:$0xff] }
 0x2de   : > { %8795 = vmatmul.mubr.msk.f32.vlgmr.msra.gmra.mrb[8].mxu1 %vm947_vm3, %v1310_v63  ;;  %v7961_v63 = vld [vmem:[%s12067_s5 + $0xa8] sm:$0xff] }
 0x2df   : > { %9562 = vmatpush3.bf16.msra.mxu1 %v9561_v59  ;;  %8833 = vmatprep.mubr.msk.f32.mxu1 %vm10201_vm4, %v10202_v41 }
 0x2e0   : > { %9563 = vmatprep.subr.bf16.mxu1 %v10200_v3 }
 0x2e3   : > { %9565 = vmatpush3.bf16.msra.mxu1 %v9564_v0  ;;  %v9575_v0 = vpack.c.bf16 %v7961_v63, %v7960_v62 }
 0x2e6   : > { %8834 = vmatmul.mubr.msk.f32.vlgmr.msra.gmra.mrb[10].mxu1 %vm947_vm3, %v1649_v4  ;;  %v9578_v4 = vpack.c.bf16 %v7963_v2, %v7962_v1  ;;  %v7968_v2 = vld [vmem:[%s12071_s7 + $0xa0] sm:$0xff] }
 0x39f   : > { %v8782_v16 = vpop.f32.mrb[4].mxu1 }
 0x3a0   : > { %v1278_v17 = vpop.f32.mrb[5].mxu1  ;;  %v1284_v39 = vadd.f32 %v8782_v16, %v7935_v32 }
 0x3a1   : > { %v1279_v35 = vadd.f32 %v7935_v32, %v1278_v17 }
 0x3a3   : > { %v8785_v18 = vpop.f32.mrb[6].mxu1 }
 0x3a4   : > { %v1288_v19 = vpop.f32.mrb[7].mxu1  ;;  %v1294_v49 = vadd.f32 %v8785_v18, %v7935_v32 }
 0x3a5   : > { %v1289_v45 = vadd.f32 %v7935_v32, %v1288_v19 }
 0x3b1   : > { %v1379_v28 = vpop.f32.mrb[8].mxu1 }
 0x3b2   : > { %v1390_v29 = vrot.slane %v1379_v28, %v10571_v27  ;;  %v8796_v31 = vpop.f32.mrb[9].mxu1 }
 0x3b4   : > { %v1391_v33 = vcombine.high %v1390_v29, %v1390_v29  ;;  %v1398_v34 = vrot.slane %v1390_v29, %v10571_v27 }
 0x3b6   : > { %v1405_v36 = vrot.slane %v1391_v33, %v10571_v27  ;;  %v1406_v37 = vcombine.high %v1398_v34, %v1398_v34  ;;  %v1411_v38 = vrot.slane %v1398_v34, %v10575_v30 }
 0x3b8   : > { %v1407_v40 = vcombine.high %v1405_v36, %v1405_v36  ;;  %v1415_v42 = vrot.slane %v1405_v36, %v10575_v30  ;;  %v1419_v43 = vrot.slane %v1406_v37, %v10575_v30  ;;  %v1428_v44 = vadd.f32 %v1411_v38, %v1279_v35 }
 0x3b9   : > { %v1718_v46 = vpop.f32.mrb[10].mxu1 }
 0x3ba   : > { %v1423_v50 = vrot.slane %v1407_v40, %v10575_v30  ;;  %v1429_v51 = vadd.f32 %v1415_v42, %v1284_v39  ;;  %v1432_v52 = vmax.f32 %v1428_v44, 0.0  ;;  %v8835_v53 = vpop.f32.mrb[11].mxu1  ;;  %v1430_v54 = vadd.f32 %v1419_v43, %v1289_v45 }
 0x3bb   : > { %v1729_v5 = vrot.slane %v1718_v46, %v10571_v27 }
 0x3bc   : > { %v1433_v55 = vmax.f32 %v1429_v51, 0.0  ;;  %8805 = vmatprep.mubr.msk.f32.mxu0 %vm947_vm3, %v1432_v52  ;;  %v1431_v57 = vadd.f32 %v1423_v50, %v1294_v49  ;;  %v1434_v58 = vmax.f32 %v1430_v54, 0.0 }
 0x3bd   : > { %v1730_v7 = vcombine.high %v1729_v5, %v1729_v5  ;;  %v1737_v8 = vrot.slane %v1729_v5, %v10571_v27 }
 0x3be   : > { %8806 = vmatmul.mubr.msk.f32.vlgmr.msra.gmra.mrb[8].mxu0 %vm947_vm3, %v1433_v55  ;;  %v1435_v59 = vmax.f32 %v1431_v57, 0.0 }
 0x3bf   : > { %9555 = vmatpush3.bf16.msra.mxu0 %v9552_v15  ;;  %8808 = vmatprep.mubr.msk.f32.mxu0 %vm947_vm3, %v1434_v58  ;;  %v1744_v9 = vrot.slane %v1730_v7, %v10571_v27  ;;  %v1745_v13 = vcombine.high %v1737_v8, %v1737_v8  ;;  %v1750_v18 = vrot.slane %v1737_v8, %v10575_v30 }
 0x3c0   : > { %9557 = vmatprep.subr.bf16.mxu0 %v9556_v56 }
 0x3c1   : > { %v1754_v14 = vrot.slane %v1744_v9, %v10575_v30  ;;  %v1746_v17 = vcombine.high %v1744_v9, %v1744_v9  ;;  %v1758_v32 = vrot.slane %v1745_v13, %v10575_v30  ;;  %v7971_v13 = vld [vmem:[%s12071_s7 + $0xb8] sm:$0xff] }
 0x3c2   : > { %8809 = vmatmul.mubr.msk.f32.gmra.mrb[10].mxu0 %vm947_vm3, %v1435_v59 }
 0x3c3   : > { %9559 = vmatpush3.bf16.msra.mxu0 %v9556_v56  ;;  %8819 = vmatprep.mubr.msk.f32.mxu0 %vm947_vm3, %v10495_v10  ;;  %v7957_v10 = vld [vmem:[%s12067_s5 + $0x88] sm:$0xff]  ;;  %v1762_v28 = vrot.slane %v1746_v17, %v10575_v30 }
 0x3c4   : > { %9574 = vmatprep.subr.bf16.mxu0 %v10200_v3  ;;  %v9566_v61 = vpack.c.bf16 %v7957_v10, %v7956_v60 }
 0x3c6   : > { %8820 = vmatmul.mubr.msk.f32.vlgmr.msra.gmra.mrb[8].mxu0 %vm947_vm3, %v10487_v6  ;;  %9567 = vmatprep.subr.bf16.mxu1 %v9566_v61  ;;  %v7958_v6 = vld [vmem:[%s12067_s5 + $0x90] sm:$0xff] }
 0x3c7   : > { %8822 = vmatprep.mubr.msk.f32.mxu0 %vm947_vm3, %v10511_v24  ;;  %9569 = vmatpush3.bf16.msra.mxu1 %v9566_v61 }
 0x3c8   : > { %9576 = vmatpush3.bf16.msra.mxu0 %v9575_v0 }
 0x3c9   : > { %9577 = vmatprep.subr.bf16.mxu0 %v10200_v3 }
 0x3ca   : > { %8823 = vmatmul.mubr.msk.f32.gmra.mrb[10].mxu0 %vm947_vm3, %v10509_v21  ;;  %v7959_v21 = vld [vmem:[%s12067_s5 + $0x98] sm:$0xff] }
 0x3cb   : > { %8858 = vmatprep.mubr.msk.f32.mxu0 %vm10201_vm4, %v10202_v41  ;;  %v9570_v24 = vpack.c.bf16 %v7959_v21, %v7958_v6 }
 0x3cc   : > { %9579 = vmatpush3.bf16.msra.mxu0 %v9578_v4  ;;  %v7969_v4 = vld [vmem:[%s12071_s7 + $0xa8] sm:$0xff] }
 0x3cd   : > { %9571 = vmatprep.subr.bf16.mxu1 %v9570_v24  ;;  %9596 = vmatprep.subr.bf16.mxu0 %v10200_v3  ;;  %v9597_v9 = vpack.c.bf16 %v7969_v4, %v7968_v2 }
 0x3ce   : > { %9573 = vmatpush3.bf16.msra.mxu1 %v9570_v24 }
 0x499   : > { %v8821_v12 = vpop.f32.mrb[8].mxu0 }
 0x49a   : > { %v9944_v15 = vadd.f32 %v8821_v12, %v7946_v11  ;;  %v1624_v16 = vpop.f32.mrb[9].mxu0  ;;  %v7970_v12 = vld [vmem:[%s12071_s7 + $0xb0] sm:$0xff] }
 0x49b   : > { %v9946_v19 = vadd.f32 %v7946_v11, %v1624_v16 }
 0x49c   : > { %v10641_v20 = vadd.f32 %v9944_v15, %v1754_v14  ;;  %v9600_v15 = vpack.c.bf16 %v7971_v13, %v7970_v12  ;;  %v8000_v12 = vld [vmem:[%s12067_s5 + $0xf0] sm:$0xff]  ;;  %v8001_v13 = vld [vmem:[%s12067_s5 + $0xf8] sm:$0xff] }
 0x49d   : > { %v10643_v22 = vadd.f32 %v9946_v19, %v1750_v18  ;;  %v8824_v23 = vpop.f32.mrb[10].mxu0  ;;  %v7979_v19 = vld [vmem:[%s12069_s23 + $0x40] sm:$0xff] }
 0x49e   : > { %v1800_v25 = vsel %vm947_vm3, %v10641_v20, -inf  ;;  %v9948_v29 = vadd.f32 %v8824_v23, %v7946_v11  ;;  %v1634_v31 = vpop.f32.mrb[11].mxu0  ;;  %v1822_v37 = vmax.f32 %v10641_v20, 0.0  ;;  %v7980_v23 = vld [vmem:[%s12069_s23 + $0x48] sm:$0xff] }
 0x49f   : > { %v1801_v33 = vrot.slane %v1800_v25, 4  ;;  %v1793_v34 = vsel %vm947_vm3, %v10643_v22, -inf  ;;  %v1821_v35 = vmax.f32 %v10643_v22, 0.0  ;;  %v9950_v36 = vadd.f32 %v7946_v11, %v1634_v31 }
 0x4a0   : > { %v1794_v38 = vrot.slane %v1793_v34, 4  ;;  %v10653_v39 = vadd.f32 %v9948_v29, %v1762_v28  ;;  %v7981_v28 = vld [vmem:[%s12069_s23 + $0x50] sm:$0xff]  ;;  %v7982_v29 = vld [vmem:[%s12069_s23 + $0x58] sm:$0xff] }
 0x4a1   : > { %v1802_v40 = vmax.f32 %v1800_v25, %v1801_v33  ;;  %v10655_v42 = vadd.f32 %v9950_v36, %v1758_v32  ;;  %8844 = vmatprep.mubr.msk.f32.mxu1 %vm947_vm3, %v1821_v35  ;;  %v9580_v25 = vpack.c.bf16 %v7980_v23, %v7979_v19  ;;  %v9584_v31 = vpack.c.bf16 %v7982_v29, %v7981_v28  ;;  %v7964_v32 = vld [vmem:[%s12071_s7 + $0x80] sm:$0xff]  ;;  %v7965_v33 = vld [vmem:[%s12071_s7 + $0x88] sm:$0xff] }
 0x4a2   : > { %v1795_v43 = vmax.f32 %v1793_v34, %v1794_v38  ;;  %v1814_v44 = vsel %vm947_vm3, %v10653_v39, -inf  ;;  %8845 = vmatmul.mubr.msk.f32.vlgmr.msra.gmra.mrb[12].mxu1 %vm947_vm3, %v1822_v37  ;;  %v1824_v50 = vmax.f32 %v10653_v39, 0.0  ;;  %v9588_v34 = vpack.c.bf16 %v7965_v33, %v7964_v32  ;;  %v7984_v19 = vld [vmem:[%s12073_s27 + $0x2] ss:$0 sm:$0xff] }
 0x4a3   : > { %v1803_v45 = vrot.slane %v1802_v40, 2  ;;  %v1815_v46 = vrot.slane %v1814_v44, 4  ;;  %v1807_v47 = vsel %vm947_vm3, %v10655_v42, -inf  ;;  %v1823_v48 = vmax.f32 %v10655_v42, 0.0  ;;  %9581 = vmatprep.subr.bf16.mxu1 %v9580_v25 }
 0x4a4   : > { %v1796_v49 = vrot.slane %v1795_v43, 2  ;;  %v1808_v51 = vrot.slane %v1807_v47, 4  ;;  %9583 = vmatpush3.bf16.msra.mxu1 %v9580_v25 }
 0x4a5   : > { %v1804_v52 = vmax.f32 %v1802_v40, %v1803_v45  ;;  %v1816_v53 = vmax.f32 %v1814_v44, %v1815_v46  ;;  %8847 = vmatprep.mubr.msk.f32.mxu1 %vm947_vm3, %v1823_v48  ;;  %9585 = vmatprep.subr.bf16.mxu1 %v9584_v31  ;;  %v7973_v45 = vld [vmem:[%s12072_s25 + $0x2] ss:$0 sm:$0xff] }
 0x4a6   : > { %v1797_v54 = vmax.f32 %v1795_v43, %v1796_v49  ;;  %v1809_v55 = vmax.f32 %v1807_v47, %v1808_v51  ;;  %8848 = vmatmul.mubr.msk.f32.gmra.mrb[14].mxu1 %vm947_vm3, %v1824_v50 }
 0x4a7   : > { %v1805_v56 = vrot.slane %v1804_v52, 1  ;;  %v1817_v57 = vrot.slane %v1816_v53, 2 }
 0x4a8   : > { %v1798_v58 = vrot.slane %v1797_v54, 1  ;;  %v1810_v59 = vrot.slane %v1809_v55, 2  ;;  %9587 = vmatpush3.bf16.msra.mxu1 %v9584_v31 }
 0x4a9   : > { %v1806_v60 = vmax.f32 %v1804_v52, %v1805_v56  ;;  %v1818_v10 = vmax.f32 %v1816_v53, %v1817_v57  ;;  %9589 = vmatprep.subr.bf16.mxu1 %v9588_v34 }
 0x4aa   : > { %v1799_v61 = vmax.f32 %v1797_v54, %v1798_v58  ;;  %v1811_v6 = vmax.f32 %v1809_v55, %v1810_v59  ;;  %v7966_v59 = vld [vmem:[%s12071_s7 + $0x90] sm:$0xff] }
 0x4ab   : > { %v1819_v21 = vrot.slane %v1818_v10, 1  ;;  %v1931_v62 = vmax.f32 %v1806_v60, 0.0 }
 0x4ac   : > { %v1812_v24 = vrot.slane %v1811_v6, 1  ;;  %v1930_v63 = vmax.f32 %v1799_v61, 0.0  ;;  %v2277_v16 = vsel %vm1305_vm5, %v1806_v60, %v1799_v61  ;;  %v7967_v60 = vld [vmem:[%s12071_s7 + $0x98] sm:$0xff] }
 0x4ad   : > { %v1820_v0 = vmax.f32 %v1818_v10, %v1819_v21 }
 0x4ae   : > { %v1813_v1 = vmax.f32 %v1811_v6, %v1812_v24  ;;  %v1938_v8 = vsel %vm1305_vm5, %v1931_v62, %v1930_v63 }
 0x4af   : > { %v1933_v7 = vmax.f32 %v1820_v0, 0.0 }
 0x4b0   : > { %v1932_v5 = vmax.f32 %v1813_v1, 0.0  ;;  %v2278_v17 = vsel %vm1307_vm6, %v1813_v1, %v2277_v16 }
 0x4b1   : > { %v2279_v18 = vsel %vm1309_vm7, %v1820_v0, %v2278_v17  ;;  %v9592_v0 = vpack.c.bf16 %v7967_v60, %v7966_v59 }
 0x4b2   : > { %v1939_v11 = vsel %vm1307_vm6, %v1932_v5, %v1938_v8  ;;  %v7994_v5 = vld [vmem:[%s12067_s5 + $0xc0] sm:$0xff] }
 0x4b3   : > { %v1940_v14 = vsel %vm1309_vm7, %v1933_v7, %v1939_v11  ;;  %v7998_v8 = vld [vmem:[%s12067_s5 + $0xe0] sm:$0xff] }
 0x4b4   : > { %8859 = vmatmul.mubr.msk.f32.vlgmr.msra.gmra.mrb[12].mxu0 %vm947_vm3, %v1940_v14  ;;  %v9614_v14 = vpack.c.bf16 %v8001_v13, %v8000_v12  ;;  %v8006_v13 = vld [vmem:[%s12071_s7 + $0xe0] sm:$0xff] }
 0x4b5   : > { %9598 = vmatpush3.bf16.msra.mxu0 %v9597_v9  ;;  %8897 = vmatprep.mubr.msk.f32.mxu0 %vm10201_vm4, %v10202_v41  ;;  %v7999_v9 = vld [vmem:[%s12067_s5 + $0xe8] sm:$0xff] }
 0x4b6   : > { %9599 = vmatprep.subr.bf16.mxu0 %v10200_v3  ;;  %v9611_v11 = vpack.c.bf16 %v7999_v9, %v7998_v8 }
 0x4b9   : > { %9601 = vmatpush3.bf16.msra.mxu0 %v9600_v15 }
 0x4bc   : > { %8898 = vmatmul.mubr.msk.f32.vlgmr.msra.gmra.mrb[14].mxu0 %vm947_vm3, %v2279_v18 }
 0x575   : > { %v8846_v35 = vpop.f32.mrb[12].mxu1 }
 0x576   : > { %v1911_v36 = vpop.f32.mrb[13].mxu1  ;;  %v1917_v52 = vadd.f32 %v8846_v35, %v7973_v45 }
 0x577   : > { %v1912_v48 = vadd.f32 %v7973_v45, %v1911_v36 }
 0x579   : > { %v8849_v37 = vpop.f32.mrb[14].mxu1 }
 0x57a   : > { %v1921_v38 = vpop.f32.mrb[15].mxu1  ;;  %v1927_v10 = vadd.f32 %v8849_v37, %v7973_v45 }
 0x57b   : > { %v1922_v57 = vadd.f32 %v7973_v45, %v1921_v38 }
 0x587   : > { %v2009_v40 = vpop.f32.mrb[12].mxu0 }
 0x588   : > { %v2020_v43 = vrot.slane %v2009_v40, %v10571_v27  ;;  %v8860_v44 = vpop.f32.mrb[13].mxu0 }
 0x58a   : > { %v2021_v46 = vcombine.high %v2020_v43, %v2020_v43  ;;  %v2028_v47 = vrot.slane %v2020_v43, %v10571_v27 }
 0x58c   : > { %v2035_v49 = vrot.slane %v2021_v46, %v10571_v27  ;;  %v2036_v50 = vcombine.high %v2028_v47, %v2028_v47  ;;  %v2041_v51 = vrot.slane %v2028_v47, %v10575_v30 }
 0x58e   : > { %v2037_v53 = vcombine.high %v2035_v49, %v2035_v49  ;;  %v2045_v54 = vrot.slane %v2035_v49, %v10575_v30  ;;  %v2049_v55 = vrot.slane %v2036_v50, %v10575_v30  ;;  %v2058_v56 = vadd.f32 %v2041_v51, %v1912_v48 }
 0x58f   : > { %v2348_v58 = vpop.f32.mrb[14].mxu0 }
 0x590   : > { %v2053_v61 = vrot.slane %v2037_v53, %v10575_v30  ;;  %v2059_v6 = vadd.f32 %v2045_v54, %v1917_v52  ;;  %v2062_v21 = vmax.f32 %v2058_v56, 0.0  ;;  %v8899_v24 = vpop.f32.mrb[15].mxu0  ;;  %v2060_v62 = vadd.f32 %v2049_v55, %v1922_v57 }
 0x591   : > { %v2359_v15 = vrot.slane %v2348_v58, %v10571_v27 }
 0x592   : > { %v2063_v63 = vmax.f32 %v2059_v6, 0.0  ;;  %8869 = vmatprep.mubr.msk.f32.mxu1 %vm947_vm3, %v2062_v21  ;;  %v2061_v1 = vadd.f32 %v2053_v61, %v1927_v10  ;;  %v2064_v2 = vmax.f32 %v2060_v62, 0.0 }
 0x593   : > { %v2360_v16 = vcombine.high %v2359_v15, %v2359_v15  ;;  %v2367_v17 = vrot.slane %v2359_v15, %v10571_v27 }
 0x594   : > { %8870 = vmatmul.mubr.msk.f32.vlgmr.msra.gmra.mrb[16].mxu1 %vm947_vm3, %v2063_v63  ;;  %v2065_v4 = vmax.f32 %v2061_v1, 0.0 }
 0x595   : > { %9591 = vmatpush3.bf16.msra.mxu1 %v9588_v34  ;;  %8872 = vmatprep.mubr.msk.f32.mxu1 %vm947_vm3, %v2064_v2  ;;  %v2374_v18 = vrot.slane %v2360_v16, %v10571_v27  ;;  %v2375_v25 = vcombine.high %v2367_v17, %v2367_v17  ;;  %v2380_v33 = vrot.slane %v2367_v17, %v10575_v30 }
 0x596   : > { %9593 = vmatprep.subr.bf16.mxu1 %v9592_v0 }
 0x597   : > { %v2384_v28 = vrot.slane %v2374_v18, %v10575_v30  ;;  %v2376_v32 = vcombine.high %v2374_v18, %v2374_v18  ;;  %v2388_v45 = vrot.slane %v2375_v25, %v10575_v30  ;;  %v8009_v25 = vld [vmem:[%s12071_s7 + $0xf8] sm:$0xff] }
 0x598   : > { %8873 = vmatmul.mubr.msk.f32.gmra.mrb[18].mxu1 %vm947_vm3, %v2065_v4 }
 0x599   : > { %9595 = vmatpush3.bf16.msra.mxu1 %v9592_v0  ;;  %8883 = vmatprep.mubr.msk.f32.mxu1 %vm947_vm3, %v10643_v22  ;;  %v7995_v22 = vld [vmem:[%s12067_s5 + $0xc8] sm:$0xff]  ;;  %v2392_v40 = vrot.slane %v2376_v32, %v10575_v30 }
 0x59a   : > { %9610 = vmatprep.subr.bf16.mxu1 %v10200_v3  ;;  %v9602_v7 = vpack.c.bf16 %v7995_v22, %v7994_v5 }
 0x59c   : > { %8884 = vmatmul.mubr.msk.f32.vlgmr.msra.gmra.mrb[16].mxu1 %vm947_vm3, %v10641_v20  ;;  %9603 = vmatprep.subr.bf16.mxu0 %v9602_v7  ;;  %v7996_v20 = vld [vmem:[%s12067_s5 + $0xd0] sm:$0xff] }
 0x59d   : > { %8886 = vmatprep.mubr.msk.f32.mxu1 %vm947_vm3, %v10655_v42  ;;  %9605 = vmatpush3.bf16.msra.mxu0 %v9602_v7 }
 0x59e   : > { %9612 = vmatpush3.bf16.msra.mxu1 %v9611_v11 }
 0x59f   : > { %9613 = vmatprep.subr.bf16.mxu1 %v10200_v3 }
 0x5a0   : > { %8887 = vmatmul.mubr.msk.f32.gmra.mrb[18].mxu1 %vm947_vm3, %v10653_v39  ;;  %v7997_v39 = vld [vmem:[%s12067_s5 + $0xd8] sm:$0xff] }
 0x5a1   : > { %8922 = vmatprep.mubr.msk.f32.mxu1 %vm10201_vm4, %v10202_v41  ;;  %v9606_v42 = vpack.c.bf16 %v7997_v39, %v7996_v20 }
 0x5a2   : > { %9615 = vmatpush3.bf16.msra.mxu1 %v9614_v14  ;;  %v8007_v14 = vld [vmem:[%s12071_s7 + $0xe8] sm:$0xff] }
 0x5a3   : > { %9607 = vmatprep.subr.bf16.mxu0 %v9606_v42  ;;  %9632 = vmatprep.subr.bf16.mxu1 %v10200_v3  ;;  %v9633_v18 = vpack.c.bf16 %v8007_v14, %v8006_v13 }
 0x5a4   : > { %9609 = vmatpush3.bf16.msra.mxu0 %v9606_v42 }
 0x66f   : > { %v8885_v23 = vpop.f32.mrb[16].mxu1 }
 0x670   : > { %v9952_v29 = vadd.f32 %v8885_v23, %v7984_v19  ;;  %v2254_v31 = vpop.f32.mrb[17].mxu1  ;;  %v8008_v23 = vld [vmem:[%s12071_s7 + $0xf0] sm:$0xff] }
 0x671   : > { %v9954_v34 = vadd.f32 %v7984_v19, %v2254_v31 }
 0x672   : > { %v10773_v35 = vadd.f32 %v9952_v29, %v2384_v28  ;;  %v9636_v29 = vpack.c.bf16 %v8009_v25, %v8008_v23  ;;  %v8038_v23 = vld [vmem:[%s12067_s5 + $0x130] sm:$0xff]  ;;  %v8039_v25 = vld [vmem:[%s12067_s5 + $0x138] sm:$0xff] }
 0x673   : > { %v10775_v36 = vadd.f32 %v9954_v34, %v2380_v33  ;;  %v8888_v37 = vpop.f32.mrb[18].mxu1  ;;  %v8017_v34 = vld [vmem:[%s12069_s23 + $0x60] sm:$0xff] }
 0x674   : > { %v2430_v38 = vsel %vm947_vm3, %v10773_v35, -inf  ;;  %v9956_v43 = vadd.f32 %v8888_v37, %v7984_v19  ;;  %v2264_v44 = vpop.f32.mrb[19].mxu1  ;;  %v2452_v50 = vmax.f32 %v10773_v35, 0.0  ;;  %v8018_v37 = vld [vmem:[%s12069_s23 + $0x68] sm:$0xff] }
 0x675   : > { %v2431_v46 = vrot.slane %v2430_v38, 4  ;;  %v2423_v47 = vsel %vm947_vm3, %v10775_v36, -inf  ;;  %v2451_v48 = vmax.f32 %v10775_v36, 0.0  ;;  %v9958_v49 = vadd.f32 %v7984_v19, %v2264_v44 }
 0x676   : > { %v2424_v51 = vrot.slane %v2423_v47, 4  ;;  %v10785_v52 = vadd.f32 %v9956_v43, %v2392_v40  ;;  %v8019_v40 = vld [vmem:[%s12069_s23 + $0x70] sm:$0xff]  ;;  %v8020_v43 = vld [vmem:[%s12069_s23 + $0x78] sm:$0xff] }
 0x677   : > { %v2432_v53 = vmax.f32 %v2430_v38, %v2431_v46  ;;  %v10787_v54 = vadd.f32 %v9958_v49, %v2388_v45  ;;  %8908 = vmatprep.mubr.msk.f32.mxu0 %vm947_vm3, %v2451_v48  ;;  %v9616_v38 = vpack.c.bf16 %v8018_v37, %v8017_v34  ;;  %v9620_v44 = vpack.c.bf16 %v8020_v43, %v8019_v40  ;;  %v8002_v45 = vld [vmem:[%s12071_s7 + $0xc0] sm:$0xff]  ;;  %v8003_v46 = vld [vmem:[%s12071_s7 + $0xc8] sm:$0xff] }
 0x678   : > { %v2425_v55 = vmax.f32 %v2423_v47, %v2424_v51  ;;  %v2444_v56 = vsel %vm947_vm3, %v10785_v52, -inf  ;;  %8909 = vmatmul.mubr.msk.f32.vlgmr.msra.gmra.mrb[16].mxu0 %vm947_vm3, %v2452_v50  ;;  %v2454_v61 = vmax.f32 %v10785_v52, 0.0  ;;  %v9624_v47 = vpack.c.bf16 %v8003_v46, %v8002_v45  ;;  %v8022_v34 = vld [vmem:[%s12073_s27 + $0x3] ss:$0 sm:$0xff] }
 0x679   : > { %v2433_v57 = vrot.slane %v2432_v53, 2  ;;  %v2445_v58 = vrot.slane %v2444_v56, 4  ;;  %v2437_v59 = vsel %vm947_vm3, %v10787_v54, -inf  ;;  %v2453_v60 = vmax.f32 %v10787_v54, 0.0  ;;  %9617 = vmatprep.subr.bf16.mxu0 %v9616_v38 }
 0x67a   : > { %v2426_v10 = vrot.slane %v2425_v55, 2  ;;  %v2438_v6 = vrot.slane %v2437_v59, 4  ;;  %9619 = vmatpush3.bf16.msra.mxu0 %v9616_v38 }
 0x67b   : > { %v2434_v21 = vmax.f32 %v2432_v53, %v2433_v57  ;;  %v2446_v24 = vmax.f32 %v2444_v56, %v2445_v58  ;;  %8911 = vmatprep.mubr.msk.f32.mxu0 %vm947_vm3, %v2453_v60  ;;  %9621 = vmatprep.subr.bf16.mxu0 %v9620_v44  ;;  %v8011_v57 = vld [vmem:[%s12072_s25 + $0x3] ss:$0 sm:$0xff] }
 0x67c   : > { %v2427_v62 = vmax.f32 %v2425_v55, %v2426_v10  ;;  %v2439_v63 = vmax.f32 %v2437_v59, %v2438_v6  ;;  %8912 = vmatmul.mubr.msk.f32.gmra.mrb[18].mxu0 %vm947_vm3, %v2454_v61 }
 0x67d   : > { %v2435_v0 = vrot.slane %v2434_v21, 1  ;;  %v2447_v1 = vrot.slane %v2446_v24, 2 }
 0x67e   : > { %v2428_v2 = vrot.slane %v2427_v62, 1  ;;  %v2440_v4 = vrot.slane %v2439_v63, 2  ;;  %9623 = vmatpush3.bf16.msra.mxu0 %v9620_v44 }
 0x67f   : > { %v2436_v5 = vmax.f32 %v2434_v21, %v2435_v0  ;;  %v2448_v22 = vmax.f32 %v2446_v24, %v2447_v1  ;;  %9625 = vmatprep.subr.bf16.mxu0 %v9624_v47 }
 0x680   : > { %v2429_v7 = vmax.f32 %v2427_v62, %v2428_v2  ;;  %v2441_v20 = vmax.f32 %v2439_v63, %v2440_v4  ;;  %v8004_v4 = vld [vmem:[%s12071_s7 + $0xd0] sm:$0xff] }
 0x681   : > { %v2449_v39 = vrot.slane %v2448_v22, 1  ;;  %v2561_v8 = vmax.f32 %v2436_v5, 0.0 }
 0x682   : > { %v2442_v42 = vrot.slane %v2441_v20, 1  ;;  %v2560_v9 = vmax.f32 %v2429_v7, 0.0  ;;  %v2907_v31 = vsel %vm1305_vm5, %v2436_v5, %v2429_v7  ;;  %v8005_v5 = vld [vmem:[%s12071_s7 + $0xd8] sm:$0xff] }
 0x683   : > { %v2450_v11 = vmax.f32 %v2448_v22, %v2449_v39 }
 0x684   : > { %v2443_v12 = vmax.f32 %v2441_v20, %v2442_v42  ;;  %v2568_v17 = vsel %vm1305_vm5, %v2561_v8, %v2560_v9 }
 0x685   : > { %v2563_v16 = vmax.f32 %v2450_v11, 0.0 }
 0x686   : > { %v2562_v15 = vmax.f32 %v2443_v12, 0.0  ;;  %v2908_v32 = vsel %vm1307_vm6, %v2443_v12, %v2907_v31 }
 0x687   : > { %v2909_v33 = vsel %vm1309_vm7, %v2450_v11, %v2908_v32  ;;  %v9628_v11 = vpack.c.bf16 %v8005_v5, %v8004_v4 }
 0x688   : > { %v2569_v19 = vsel %vm1307_vm6, %v2562_v15, %v2568_v17  ;;  %v8032_v15 = vld [vmem:[%s12067_s5 + $0x100] sm:$0xff] }
 0x689   : > { %v2570_v28 = vsel %vm1309_vm7, %v2563_v16, %v2569_v19  ;;  %v8036_v17 = vld [vmem:[%s12067_s5 + $0x120] sm:$0xff] }
 0x68a   : > { %8923 = vmatmul.mubr.msk.f32.vlgmr.msra.gmra.mrb[20].mxu1 %vm947_vm3, %v2570_v28  ;;  %v9650_v28 = vpack.c.bf16 %v8039_v25, %v8038_v23  ;;  %v8044_v25 = vld [vmem:[%s12071_s7 + $0x120] sm:$0xff] }
 0x68b   : > { %9634 = vmatpush3.bf16.msra.mxu1 %v9633_v18  ;;  %8961 = vmatprep.mubr.msk.f32.mxu1 %vm10201_vm4, %v10202_v41  ;;  %v8037_v18 = vld [vmem:[%s12067_s5 + $0x128] sm:$0xff] }
 0x68c   : > { %9635 = vmatprep.subr.bf16.mxu1 %v10200_v3  ;;  %v9647_v19 = vpack.c.bf16 %v8037_v18, %v8036_v17 }
 0x68f   : > { %9637 = vmatpush3.bf16.msra.mxu1 %v9636_v29 }
 0x692   : > { %8962 = vmatmul.mubr.msk.f32.vlgmr.msra.gmra.mrb[22].mxu1 %vm947_vm3, %v2909_v33 }
 0x74b   : > { %v8910_v48 = vpop.f32.mrb[16].mxu0 }
 0x74c   : > { %v2541_v49 = vpop.f32.mrb[17].mxu0  ;;  %v2547_v21 = vadd.f32 %v8910_v48, %v8011_v57 }
 0x74d   : > { %v2542_v60 = vadd.f32 %v8011_v57, %v2541_v49 }
 0x74f   : > { %v8913_v50 = vpop.f32.mrb[18].mxu0 }
 0x750   : > { %v2551_v51 = vpop.f32.mrb[19].mxu0  ;;  %v2557_v22 = vadd.f32 %v8913_v50, %v8011_v57 }
 0x751   : > { %v2552_v1 = vadd.f32 %v8011_v57, %v2551_v51 }
 0x75d   : > { %v2639_v53 = vpop.f32.mrb[20].mxu1 }
 0x75e   : > { %v2650_v55 = vrot.slane %v2639_v53, %v10571_v27  ;;  %v8924_v56 = vpop.f32.mrb[21].mxu1 }
 0x760   : > { %v2651_v58 = vcombine.high %v2650_v55, %v2650_v55  ;;  %v2658_v59 = vrot.slane %v2650_v55, %v10571_v27 }
 0x762   : > { %v2665_v10 = vrot.slane %v2651_v58, %v10571_v27  ;;  %v2666_v61 = vcombine.high %v2658_v59, %v2658_v59  ;;  %v2671_v6 = vrot.slane %v2658_v59, %v10575_v30 }
 0x764   : > { %v2667_v24 = vcombine.high %v2665_v10, %v2665_v10  ;;  %v2675_v62 = vrot.slane %v2665_v10, %v10575_v30  ;;  %v2679_v63 = vrot.slane %v2666_v61, %v10575_v30  ;;  %v2688_v0 = vadd.f32 %v2671_v6, %v2542_v60 }
 0x765   : > { %v2978_v2 = vpop.f32.mrb[22].mxu1 }
 0x766   : > { %v2683_v7 = vrot.slane %v2667_v24, %v10575_v30  ;;  %v2689_v20 = vadd.f32 %v2675_v62, %v2547_v21  ;;  %v2692_v39 = vmax.f32 %v2688_v0, 0.0  ;;  %v8963_v42 = vpop.f32.mrb[23].mxu1  ;;  %v2690_v8 = vadd.f32 %v2679_v63, %v2552_v1 }
 0x767   : > { %v2989_v29 = vrot.slane %v2978_v2, %v10571_v27 }
 0x768   : > { %v2693_v9 = vmax.f32 %v2689_v20, 0.0  ;;  %8933 = vmatprep.mubr.msk.f32.mxu0 %vm947_vm3, %v2692_v39  ;;  %v2691_v12 = vadd.f32 %v2683_v7, %v2557_v22  ;;  %v2694_v13 = vmax.f32 %v2690_v8, 0.0 }
 0x769   : > { %v2990_v31 = vcombine.high %v2989_v29, %v2989_v29  ;;  %v2997_v32 = vrot.slane %v2989_v29, %v10571_v27 }
 0x76a   : > { %8934 = vmatmul.mubr.msk.f32.vlgmr.msra.gmra.mrb[20].mxu0 %vm947_vm3, %v2693_v9  ;;  %v2695_v14 = vmax.f32 %v2691_v12, 0.0 }
 0x76b   : > { %9627 = vmatpush3.bf16.msra.mxu0 %v9624_v47  ;;  %8936 = vmatprep.mubr.msk.f32.mxu0 %vm947_vm3, %v2694_v13  ;;  %v3004_v33 = vrot.slane %v2990_v31, %v10571_v27  ;;  %v3005_v38 = vcombine.high %v2997_v32, %v2997_v32  ;;  %v3010_v46 = vrot.slane %v2997_v32, %v10575_v30 }
 0x76c   : > { %9629 = vmatprep.subr.bf16.mxu0 %v9628_v11 }
 0x76d   : > { %v3014_v40 = vrot.slane %v3004_v33, %v10575_v30  ;;  %v3006_v45 = vcombine.high %v3004_v33, %v3004_v33  ;;  %v3018_v57 = vrot.slane %v3005_v38, %v10575_v30  ;;  %v8047_v38 = vld [vmem:[%s12071_s7 + $0x138] sm:$0xff] }
 0x76e   : > { %8937 = vmatmul.mubr.msk.f32.gmra.mrb[22].mxu0 %vm947_vm3, %v2695_v14 }
 0x76f   : > { %9631 = vmatpush3.bf16.msra.mxu0 %v9628_v11  ;;  %8947 = vmatprep.mubr.msk.f32.mxu0 %vm947_vm3, %v10775_v36  ;;  %v8033_v36 = vld [vmem:[%s12067_s5 + $0x108] sm:$0xff]  ;;  %v3022_v53 = vrot.slane %v3006_v45, %v10575_v30 }
 0x770   : > { %9646 = vmatprep.subr.bf16.mxu0 %v10200_v3  ;;  %v9638_v16 = vpack.c.bf16 %v8033_v36, %v8032_v15 }
 0x772   : > { %8948 = vmatmul.mubr.msk.f32.vlgmr.msra.gmra.mrb[20].mxu0 %vm947_vm3, %v10773_v35  ;;  %9639 = vmatprep.subr.bf16.mxu1 %v9638_v16  ;;  %v8034_v35 = vld [vmem:[%s12067_s5 + $0x110] sm:$0xff] }
 0x773   : > { %8950 = vmatprep.mubr.msk.f32.mxu0 %vm947_vm3, %v10787_v54  ;;  %9641 = vmatpush3.bf16.msra.mxu1 %v9638_v16 }
 0x774   : > { %9648 = vmatpush3.bf16.msra.mxu0 %v9647_v19 }
 0x775   : > { %9649 = vmatprep.subr.bf16.mxu0 %v10200_v3 }
 0x776   : > { %8951 = vmatmul.mubr.msk.f32.gmra.mrb[22].mxu0 %vm947_vm3, %v10785_v52  ;;  %v8035_v52 = vld [vmem:[%s12067_s5 + $0x118] sm:$0xff]  ;;  %s12045_s5 = sshll.u32 %s10342_s4, 6 }
 0x777   : > { %8986 = vmatprep.mubr.msk.f32.mxu0 %vm10201_vm4, %v10202_v41  ;;  %v9642_v54 = vpack.c.bf16 %v8035_v52, %v8034_v35 }
 0x778   : > { %9651 = vmatpush3.bf16.msra.mxu0 %v9650_v28  ;;  %v8045_v28 = vld [vmem:[%s12071_s7 + $0x128] sm:$0xff] }
 0x779   : > { %9643 = vmatprep.subr.bf16.mxu1 %v9642_v54  ;;  %9668 = vmatprep.subr.bf16.mxu0 %v10200_v3  ;;  %v9669_v33 = vpack.c.bf16 %v8045_v28, %v8044_v25 }
 0x77a   : > { %9645 = vmatpush3.bf16.msra.mxu1 %v9642_v54 }
 0x845   : > { %v8949_v37 = vpop.f32.mrb[20].mxu0 }
 0x846   : > { %v9960_v43 = vadd.f32 %v8949_v37, %v8022_v34  ;;  %v2884_v44 = vpop.f32.mrb[21].mxu0  ;;  %v8046_v37 = vld [vmem:[%s12071_s7 + $0x130] sm:$0xff] }
 0x847   : > { %v9962_v47 = vadd.f32 %v8022_v34, %v2884_v44 }
 0x848   : > { %v10905_v48 = vadd.f32 %v9960_v43, %v3014_v40  ;;  %v9672_v43 = vpack.c.bf16 %v8047_v38, %v8046_v37  ;;  %v3945_v37 = vld [vmem:[%s12021_s12 + $0x10] sm:$0xff] }
 0x849   : > { %v10907_v49 = vadd.f32 %v9962_v47, %v3010_v46  ;;  %v8952_v50 = vpop.f32.mrb[22].mxu0  ;;  %v8055_v47 = vld [vmem:[%s12069_s23 + $0x80] sm:$0xff] }
 0x84a   : > { %v3060_v51 = vsel %vm947_vm3, %v10905_v48, -inf  ;;  %v9964_v55 = vadd.f32 %v8952_v50, %v8022_v34  ;;  %v2894_v56 = vpop.f32.mrb[23].mxu0  ;;  %v3082_v61 = vmax.f32 %v10905_v48, 0.0  ;;  %v8056_v50 = vld [vmem:[%s12069_s23 + $0x88] sm:$0xff] }
 0x84b   : > { %v3061_v58 = vrot.slane %v3060_v51, 4  ;;  %v3053_v59 = vsel %vm947_vm3, %v10907_v49, -inf  ;;  %v3081_v60 = vmax.f32 %v10907_v49, 0.0  ;;  %v9966_v10 = vadd.f32 %v8022_v34, %v2894_v56 }
 0x84c   : > { %v3054_v6 = vrot.slane %v3053_v59, 4  ;;  %v10917_v21 = vadd.f32 %v9964_v55, %v3022_v53  ;;  %v8057_v53 = vld [vmem:[%s12069_s23 + $0x90] sm:$0xff]  ;;  %v8058_v55 = vld [vmem:[%s12069_s23 + $0x98] sm:$0xff] }
 0x84d   : > { %v3062_v24 = vmax.f32 %v3060_v51, %v3061_v58  ;;  %v10919_v62 = vadd.f32 %v9966_v10, %v3018_v57  ;;  %8972 = vmatprep.mubr.msk.f32.mxu1 %vm947_vm3, %v3081_v60  ;;  %v9652_v51 = vpack.c.bf16 %v8056_v50, %v8055_v47  ;;  %v9656_v56 = vpack.c.bf16 %v8058_v55, %v8057_v53  ;;  %v8040_v57 = vld [vmem:[%s12071_s7 + $0x100] sm:$0xff]  ;;  %v8041_v58 = vld [vmem:[%s12071_s7 + $0x108] sm:$0xff] }
 0x84e   : > { %v3055_v63 = vmax.f32 %v3053_v59, %v3054_v6  ;;  %v3074_v0 = vsel %vm947_vm3, %v10917_v21, -inf  ;;  %8973 = vmatmul.mubr.msk.f32.vlgmr.msra.gmra.mrb[24].mxu1 %vm947_vm3, %v3082_v61  ;;  %v3084_v7 = vmax.f32 %v10917_v21, 0.0  ;;  %v9660_v59 = vpack.c.bf16 %v8041_v58, %v8040_v57  ;;  %v8060_v55 = vld [vmem:[%s12073_s27 + $0x4] ss:$0 sm:$0xff] }
 0x84f   : > { %v3063_v1 = vrot.slane %v3062_v24, 2  ;;  %v3075_v2 = vrot.slane %v3074_v0, 4  ;;  %v3067_v4 = vsel %vm947_vm3, %v10919_v62, -inf  ;;  %v3083_v5 = vmax.f32 %v10919_v62, 0.0  ;;  %9653 = vmatprep.subr.bf16.mxu1 %v9652_v51 }
 0x850   : > { %v3056_v22 = vrot.slane %v3055_v63, 2  ;;  %v3068_v20 = vrot.slane %v3067_v4, 4  ;;  %9655 = vmatpush3.bf16.msra.mxu1 %v9652_v51 }
 0x851   : > { %v3064_v39 = vmax.f32 %v3062_v24, %v3063_v1  ;;  %v3076_v42 = vmax.f32 %v3074_v0, %v3075_v2  ;;  %8975 = vmatprep.mubr.msk.f32.mxu1 %vm947_vm3, %v3083_v5  ;;  %9657 = vmatprep.subr.bf16.mxu1 %v9656_v56  ;;  %v8049_v1 = vld [vmem:[%s12072_s25 + $0x4] ss:$0 sm:$0xff] }
 0x852   : > { %v3057_v8 = vmax.f32 %v3055_v63, %v3056_v22  ;;  %v3069_v9 = vmax.f32 %v3067_v4, %v3068_v20  ;;  %8976 = vmatmul.mubr.msk.f32.gmra.mrb[26].mxu1 %vm947_vm3, %v3084_v7 }
 0x853   : > { %v3065_v11 = vrot.slane %v3064_v39, 1  ;;  %v3077_v12 = vrot.slane %v3076_v42, 2 }
 0x854   : > { %v3058_v13 = vrot.slane %v3057_v8, 1  ;;  %v3070_v14 = vrot.slane %v3069_v9, 2  ;;  %9659 = vmatpush3.bf16.msra.mxu1 %v9656_v56 }
 0x855   : > { %v3066_v15 = vmax.f32 %v3064_v39, %v3065_v11  ;;  %v3078_v36 = vmax.f32 %v3076_v42, %v3077_v12  ;;  %9661 = vmatprep.subr.bf16.mxu1 %v9660_v59 }
 0x856   : > { %v3059_v16 = vmax.f32 %v3057_v8, %v3058_v13  ;;  %v3071_v35 = vmax.f32 %v3069_v9, %v3070_v14  ;;  %v8042_v14 = vld [vmem:[%s12071_s7 + $0x110] sm:$0xff] }
 0x857   : > { %v3079_v52 = vrot.slane %v3078_v36, 1  ;;  %v3191_v17 = vmax.f32 %v3066_v15, 0.0 }
 0x858   : > { %v3072_v54 = vrot.slane %v3071_v35, 1  ;;  %v3190_v18 = vmax.f32 %v3059_v16, 0.0  ;;  %v3537_v44 = vsel %vm1305_vm5, %v3066_v15, %v3059_v16  ;;  %v8043_v15 = vld [vmem:[%s12071_s7 + $0x118] sm:$0xff]  ;;  %s7786_s7 = sshll.u32 %s11114_s24, 4  ;;  %s7787_s7 = int_to_ptr.vmem [resolvable:$true] %s7786_s7 }
 0x859   : > { %v3080_v19 = vmax.f32 %v3078_v36, %v3079_v52  ;;  %s10104_s29 = scalar_lea.vmem %s7787_s7, 64  ;;  %p10111_p0 = scmp.lt.s32.totalorder %s7787_s7, %s10109_s22 }
 0x85a   : > { %v3073_v23 = vmax.f32 %v3071_v35, %v3072_v54  ;;  %v3198_v32 = vsel %vm1305_vm5, %v3191_v17, %v3190_v18  ;;  %p10105_p11 = scmp.ne.s32.totalorder %s7787_s7, %s10104_s29 }
 0x85b   : > { %v3193_v31 = vmax.f32 %v3080_v19, 0.0 }
 0x85c   : > { %v3192_v29 = vmax.f32 %v3073_v23, 0.0  ;;  %v3538_v45 = vsel %vm1307_vm6, %v3073_v23, %v3537_v44  ;;  %v3947_v44 = vld [vmem:[%s12021_s12 + $0x20] sm:$0xff]  ;;  %p10106_p12 = pnand %p10105_p11, %p10359_p5 }
 0x85d   : > { %v3539_v46 = vsel %vm1309_vm7, %v3080_v19, %v3538_v45  ;;  %v9664_v19 = vpack.c.bf16 %v8043_v15, %v8042_v14  ;;  %v3948_v45 = vld [vmem:[%s12021_s12 + $0x28] sm:$0xff] }
 0x85e   : > { %v3199_v34 = vsel %vm1307_vm6, %v3192_v29, %v3198_v32  ;;  %v3697_v29 = vld [vmem:[%s12074_s8] sm:$0xff]  ;;  %p10107_p13 = pneg %p10106_p12 }
 0x85f   : > { %v3200_v40 = vsel %vm1309_vm7, %v3193_v31, %v3199_v34  ;;  %v3698_v31 = vld [vmem:[%s12074_s8 + $0x8] sm:$0xff] }
 0x860   : > { %8987 = vmatmul.mubr.msk.f32.vlgmr.msra.gmra.mrb[24].mxu0 %vm947_vm3, %v3200_v40  ;;  %v9675_v32 = vpack.c.bf16 %v3698_v31, %v3697_v29  ;;  %v3944_v34 = vld [vmem:[%s12021_s12 + $0x8] sm:$0xff]  ;;  %v3946_v40 = vld [vmem:[%s12021_s12 + $0x18] sm:$0xff] }
 0x861   : > { %9670 = vmatpush3.bf16.msra.mxu0 %v9669_v33  ;;  %9025 = vmatprep.mubr.msk.f32.mxu0 %vm10201_vm4, %v10202_v41  ;;  %v3943_v33 = vld [vmem:[%s12021_s12] sm:$0xff] }
 0x862   : > { %9671 = vmatprep.subr.bf16.mxu0 %v10200_v3  ;;  %v9680_v38 = vpack.c.bf16 %v3944_v34, %v3943_v33 }
 0x865   : > { %9673 = vmatpush3.bf16.msra.mxu0 %v9672_v43  ;;  %v9684_v43 = vpack.c.bf16 %v3946_v40, %v3945_v37 }
 0x866   : > { %9674 = vmatprep.subr.bf16.mxu0 %v10200_v3 }
 0x868   : > { %9026 = vmatmul.mubr.msk.f32.vlgmr.msra.gmra.mrb[26].mxu0 %vm947_vm3, %v3539_v46  ;;  %v9688_v46 = vpack.c.bf16 %v3948_v45, %v3947_v44 }
 0x869   : > { %9036 = vmatprep.mubr.msk.f32.mxu0 %vm10201_vm4, %v10202_v41  ;;  %9676 = vmatpush3.bf16.msra.mxu0 %v9675_v32 }
 0x86a   : > { %9677 = vmatprep.subr.bf16.mxu0 %v10200_v3 }
 0x921   : > { %v8974_v60 = vpop.f32.mrb[24].mxu1 }
 0x922   : > { %v3171_v10 = vpop.f32.mrb[25].mxu1  ;;  %v3177_v39 = vadd.f32 %v8974_v60, %v8049_v1 }
 0x923   : > { %v3172_v5 = vadd.f32 %v8049_v1, %v3171_v10 }
 0x925   : > { %v8977_v61 = vpop.f32.mrb[26].mxu1 }
 0x926   : > { %v3181_v6 = vpop.f32.mrb[27].mxu1  ;;  %v3187_v36 = vadd.f32 %v8977_v61, %v8049_v1 }
 0x927   : > { %v3182_v12 = vadd.f32 %v8049_v1, %v3181_v6 }
 0x933   : > { %v3269_v24 = vpop.f32.mrb[24].mxu0 }
 0x934   : > { %v3280_v63 = vrot.slane %v3269_v24, %v10571_v27  ;;  %v8988_v0 = vpop.f32.mrb[25].mxu0 }
 0x936   : > { %v3281_v2 = vcombine.high %v3280_v63, %v3280_v63  ;;  %v3288_v4 = vrot.slane %v3280_v63, %v10571_v27 }
 0x938   : > { %v3295_v22 = vrot.slane %v3281_v2, %v10571_v27  ;;  %v3296_v7 = vcombine.high %v3288_v4, %v3288_v4  ;;  %v3301_v20 = vrot.slane %v3288_v4, %v10575_v30 }
 0x93a   : > { %v3297_v42 = vcombine.high %v3295_v22, %v3295_v22  ;;  %v3305_v8 = vrot.slane %v3295_v22, %v10575_v30  ;;  %v3309_v9 = vrot.slane %v3296_v7, %v10575_v30  ;;  %v3318_v11 = vadd.f32 %v3301_v20, %v3172_v5 }
 0x93b   : > { %v3608_v13 = vpop.f32.mrb[26].mxu0 }
 0x93c   : > { %v3313_v16 = vrot.slane %v3297_v42, %v10575_v30  ;;  %v3319_v35 = vadd.f32 %v3305_v8, %v3177_v39  ;;  %v3322_v52 = vmax.f32 %v3318_v11, 0.0  ;;  %v9027_v54 = vpop.f32.mrb[27].mxu0  ;;  %v3320_v17 = vadd.f32 %v3309_v9, %v3182_v12 }
 0x93d   : > { %v3619_v47 = vrot.slane %v3608_v13, %v10571_v27 }
 0x93e   : > { %v3323_v18 = vmax.f32 %v3319_v35, 0.0  ;;  %8997 = vmatprep.mubr.msk.f32.mxu1 %vm947_vm3, %v3322_v52  ;;  %v3321_v23 = vadd.f32 %v3313_v16, %v3187_v36  ;;  %v3324_v25 = vmax.f32 %v3320_v17, 0.0 }
 0x93f   : > { %v3620_v50 = vcombine.high %v3619_v47, %v3619_v47  ;;  %v3627_v53 = vrot.slane %v3619_v47, %v10571_v27  ;;  %v10100_v47 = vld [vmem:[%s10397_s2] sm:$0xff] }
 0x940   : > { %8998 = vmatmul.mubr.msk.f32.vlgmr.msra.gmra.mrb[28].mxu1 %vm947_vm3, %v3323_v18  ;;  %v3325_v28 = vmax.f32 %v3321_v23, 0.0 }
 0x941   : > { %9663 = vmatpush3.bf16.msra.mxu1 %v9660_v59  ;;  %9000 = vmatprep.mubr.msk.f32.mxu1 %vm947_vm3, %v3324_v25  ;;  %v3634_v51 = vrot.slane %v3620_v50, %v10571_v27  ;;  %v3635_v10 = vcombine.high %v3627_v53, %v3627_v53  ;;  %v3640_v61 = vrot.slane %v3627_v53, %v10575_v30  ;;  %v10101_v50 = vld [vmem:[%s10397_s2 + $0x8] sm:$0xff]  ;;  %v10103_v53 = vld [vmem:[%s10397_s2 + $0x18] sm:$0xff] }
 0x942   : > { %9665 = vmatprep.subr.bf16.mxu1 %v9664_v19 }
 0x943   : > { %v3644_v57 = vrot.slane %v3634_v51, %v10575_v30  ;;  %v3636_v60 = vcombine.high %v3634_v51, %v3634_v51  ;;  %v3648_v20 = vrot.slane %v3635_v10, %v10575_v30  ;;  %v10102_v51 = vld [vmem:[%s10397_s2 + $0x10] sm:$0xff]  ;;  %s11934_s2 = scalar_lea.hbm %s12030_s21, %s12045_s5 }
 0x944   : > { %9001 = vmatmul.mubr.msk.f32.gmra.mrb[30].mxu1 %vm947_vm3, %v3325_v28  ;;  %v3953_v10 = vld [vmem:[%s12021_s12 + $0x50] sm:$0xff] }
 0x945   : > { %9667 = vmatpush3.bf16.msra.mxu1 %v9664_v19  ;;  %9011 = vmatprep.mubr.msk.f32.mxu1 %vm947_vm3, %v10907_v49  ;;  %v3700_v49 = vld [vmem:[%s12074_s8 + $0x18] sm:$0xff]  ;;  %v3652_v2 = vrot.slane %v3636_v60, %v10575_v30 }
 0x946   : > { %9681 = vmatprep.subr.bf16.mxu1 %v9680_v38 }
 0x948   : > { %9012 = vmatmul.mubr.msk.f32.vlgmr.msra.gmra.mrb[28].mxu1 %vm947_vm3, %v10905_v48  ;;  %v3699_v48 = vld [vmem:[%s12074_s8 + $0x10] sm:$0xff]  ;;  %s10110_s8 = scalar_lea.vmem %s10109_s22, 128 }
 0x949   : > { %9014 = vmatprep.mubr.msk.f32.mxu1 %vm947_vm3, %v10919_v62  ;;  %v11019_v62 = vld [vmem:[%s12075_s10] sm:$0xf]  ;;  %9683 = vmatpush3.bf16.msra.mxu1 %v9680_v38  ;;  %p10112_p1 = scmp.lt.s32.totalorder %s10110_s8, %s10104_s29 }
 0x94a   : > { %9685 = vmatprep.subr.bf16.mxu1 %v9684_v43 }
 0x94b   : > { %p10113_p2 = por %p10112_p1, %p10111_p0 }
 0x94c   : > { %9015 = vmatmul.mubr.msk.f32.gmra.mrb[30].mxu1 %vm947_vm3, %v10917_v21  ;;  %v9678_v21 = vpack.c.bf16 %v3700_v49, %v3699_v48 }
 0x94d   : > { %9687 = vmatpush3.bf16.msra.mxu1 %v9684_v43  ;;  %p10114_p3 = pnand %p10113_p2, %p10107_p13 }
 0x94e   : > { %9679 = vmatpush3.bf16.msra.mxu0 %v9678_v21  ;;  %9689 = vmatprep.subr.bf16.mxu1 %v9688_v46 }
 0x94f   : > { %9039 = vmatprep.subr.msk.mxu0 %vm718_vm0, %v11019_v62 }
 0x951   : > { %9691 = vmatpush3.bf16.msra.mxu1 %v9688_v46 }
 0xa1b   : > { %v9013_v56 = vpop.f32.mrb[28].mxu1 }
 0xa1c   : > { %v9968_v58 = vadd.f32 %v9013_v56, %v8060_v55  ;;  %v3514_v59 = vpop.f32.mrb[29].mxu1  ;;  %v3950_v56 = vld [vmem:[%s12021_s12 + $0x38] sm:$0xff] }
 0xa1d   : > { %v9970_v6 = vadd.f32 %v8060_v55, %v3514_v59  ;;  %v3952_v59 = vld [vmem:[%s12021_s12 + $0x48] sm:$0xff] }
 0xa1e   : > { %v9969_v24 = vadd.f32 %v9968_v58, %v3644_v57  ;;  %v3951_v58 = vld [vmem:[%s12021_s12 + $0x40] sm:$0xff] }
 0xa1f   : > { %v9971_v63 = vadd.f32 %v9970_v6, %v3640_v61  ;;  %v9016_v0 = vpop.f32.mrb[30].mxu1  ;;  %v9696_v60 = vpack.c.bf16 %v3952_v59, %v3951_v58  ;;  %v3954_v61 = vld [vmem:[%s12021_s12 + $0x58] sm:$0xff] }
 0xa20   : > { %v3672_v1 = vsel %vm947_vm3, %v9969_v24, -inf  ;;  %v9972_v4 = vadd.f32 %v9016_v0, %v8060_v55  ;;  %v3524_v5 = vpop.f32.mrb[31].mxu1  ;;  %v9700_v6 = vpack.c.bf16 %v3954_v61, %v3953_v10  ;;  %v3956_v24 = vld [vmem:[%s12023_s14] sm:$0xff]  ;;  %v3964_v58 = vld [vmem:[%s12025_s16 + $0x18] sm:$0xff] }
 0xa21   : > { %v3673_v22 = vrot.slane %v3672_v1, 4  ;;  %v3665_v7 = vsel %vm947_vm3, %v9971_v63, -inf  ;;  %v9974_v39 = vadd.f32 %v8060_v55, %v3524_v5  ;;  %v3949_v55 = vld [vmem:[%s12021_s12 + $0x30] sm:$0xff]  ;;  %v3957_v63 = vld [vmem:[%s12023_s14 + $0x8] sm:$0xff] }
 0xa22   : > { %v3666_v42 = vrot.slane %v3665_v7, 4  ;;  %v9973_v8 = vadd.f32 %v9972_v4, %v3652_v2  ;;  %v9692_v57 = vpack.c.bf16 %v3950_v56, %v3949_v55  ;;  %v9704_v0 = vpack.c.bf16 %v3957_v63, %v3956_v24 }
 0xa23   : > { %v3674_v9 = vmax.f32 %v3672_v1, %v3673_v22  ;;  %v9975_v11 = vadd.f32 %v9974_v39, %v3648_v20  ;;  %v3792_v1 = vcvt.s32.f32 %v10568_v26  ;;  %v3796_v2 = vsub.s32 3, %v10568_v26  ;;  %v8070_v39 = vld [vmem:[%s12076_s9] ss:$0 sm:$0xff] }
 0xa24   : > { %v3667_v12 = vmax.f32 %v3665_v7, %v3666_v42  ;;  %v3686_v13 = vsel %vm947_vm3, %v9973_v8, -inf  ;;  %9693 = vmatprep.subr.bf16.mxu1 %v9692_v57 }
 0xa25   : > { %v3675_v14 = vrot.slane %v3674_v9, 2  ;;  %v3687_v15 = vrot.slane %v3686_v13, 4  ;;  %v3679_v36 = vsel %vm947_vm3, %v9975_v11, -inf  ;;  %9695 = vmatpush3.bf16.msra.mxu1 %v9692_v57  ;;  %v3793_v4 = vmul.f32 0.33333334, %v3792_v1  ;;  %v3963_v57 = vld [vmem:[%s12025_s16 + $0x10] sm:$0xff] }
 0xa26   : > { %v3668_v16 = vrot.slane %v3667_v12, 2  ;;  %v3680_v35 = vrot.slane %v3679_v36, 4  ;;  %9697 = vmatprep.subr.bf16.mxu1 %v9696_v60  ;;  %v3797_v5 = vrot.slane %v11019_v62, %v3796_v2  ;;  %v8072_v11 = vld [vmem:[%s12020_s11] ss:$0 sm:$0xff]  ;;  %v9716_v24 = vpack.c.bf16 %v3964_v58, %v3963_v57  ;;  %v3966_v1 = vld [vmem:[%s12025_s16 + $0x28] sm:$0xff] }
 0xa27   : > { %v3676_v52 = vmax.f32 %v3674_v9, %v3675_v14  ;;  %v3688_v54 = vmax.f32 %v3686_v13, %v3687_v15 }
 0xa28   : > { %v3669_v17 = vmax.f32 %v3667_v12, %v3668_v16  ;;  %v3681_v18 = vmax.f32 %v3679_v36, %v3680_v35  ;;  %v3798_v22 = vmul.f32 %v3797_v5, %v3793_v4 }
 0xa29   : > { %v3677_v19 = vrot.slane %v3676_v52, 1  ;;  %v3689_v23 = vrot.slane %v3688_v54, 2  ;;  %9699 = vmatpush3.bf16.msra.mxu1 %v9696_v60 }
 0xa2a   : > { %v3670_v25 = vrot.slane %v3669_v17, 1  ;;  %v3682_v28 = vrot.slane %v3681_v18, 2  ;;  %9701 = vmatprep.subr.bf16.mxu1 %v9700_v6  ;;  %v3901_v7 = vrot.slane %v3798_v22, %v10571_v27  ;;  %v3967_v22 = vld [vmem:[%s12025_s16 + $0x30] sm:$0xff] }
 0xa2b   : > { %v3678_v29 = vmax.f32 %v3676_v52, %v3677_v19  ;;  %v3690_v31 = vmax.f32 %v3688_v54, %v3689_v23 }
 0xa2c   : > { %v3671_v32 = vmax.f32 %v3669_v17, %v3670_v25  ;;  %v3683_v48 = vmax.f32 %v3681_v18, %v3682_v28  ;;  %v3902_v20 = vcombine.high %v3901_v7, %v3901_v7  ;;  %v3909_v26 = vrot.slane %v3901_v7, %v10571_v27  ;;  %v3968_v7 = vld [vmem:[%s12025_s16 + $0x38] sm:$0xff] }
 0xa2d   : > { %v3694_v49 = vmax.f32 %v3678_v29, 0.0  ;;  %v3691_v21 = vrot.slane %v3690_v31, 1  ;;  %9703 = vmatpush3.bf16.msra.mxu1 %v9700_v6 }
 0xa2e   : > { %v3693_v33 = vmax.f32 %v3671_v32, 0.0  ;;  %v3684_v34 = vrot.slane %v3683_v48, 1  ;;  %v3916_v42 = vrot.slane %v3902_v20, %v10571_v27  ;;  %v3922_v15 = vrot.slane %v3909_v26, %v10575_v30 }
 0xa2f   : > { %v3692_v37 = vmax.f32 %v3690_v31, %v3691_v21  ;;  %v3917_v36 = vcombine.high %v3909_v26, %v3909_v26  ;;  %v9724_v20 = vpack.c.bf16 %v3968_v7, %v3967_v22  ;;  %v3971_v26 = vld [vmem:[%s12025_s16 + $0x50] sm:$0xff] }
 0xa30   : > { %v3685_v38 = vmax.f32 %v3683_v48, %v3684_v34  ;;  %v3712_v40 = vsel %vm1305_vm5, %v3694_v49, %v3693_v33  ;;  %v3926_v12 = vrot.slane %v3916_v42, %v10575_v30  ;;  %v3918_v13 = vcombine.high %v3916_v42, %v3916_v42  ;;  %v3958_v34 = vld [vmem:[%s12023_s14 + $0x10] sm:$0xff]  ;;  %v3970_v42 = vld [vmem:[%s12025_s16 + $0x48] sm:$0xff] }
 0xa31   : > { %v3696_v44 = vmax.f32 %v3692_v37, 0.0  ;;  %v3930_v23 = vrot.slane %v3917_v36, %v10575_v30  ;;  %v3959_v37 = vld [vmem:[%s12023_s14 + $0x18] sm:$0xff]  ;;  %v8097_v36 = vld [vmem:[%s12021_s12 + $0x88] sm:$0xff] }
 0xa32   : > { %v3695_v43 = vmax.f32 %v3685_v38, 0.0  ;;  %v3934_v17 = vrot.slane %v3918_v13, %v10575_v30  ;;  %v9708_v38 = vpack.c.bf16 %v3959_v37, %v3958_v34  ;;  %v8095_v13 = vld [vmem:[%s12021_s12 + $0x78] sm:$0xff]  ;;  %v8102_v34 = vld [vmem:[%s12021_s12 + $0xb0] sm:$0xff] }
 0xa33   : > { %v8103_v37 = vld [vmem:[%s12021_s12 + $0xb8] sm:$0xff] }
 0xa34   : > { %v3713_v45 = vsel %vm1307_vm6, %v3695_v43, %v3712_v40  ;;  %v3961_v40 = vld [vmem:[%s12025_s16] sm:$0xff]  ;;  %v3962_v43 = vld [vmem:[%s12025_s16 + $0x8] sm:$0xff] }
 0xa35   : > { %v3714_v46 = vsel %vm1309_vm7, %v3696_v44, %v3713_v45  ;;  %v9712_v44 = vpack.c.bf16 %v3962_v43, %v3961_v40  ;;  %v8092_v45 = vld [vmem:[%s12021_s12 + $0x60] sm:$0xff] }
 0xa36   : > { %9037 = vmatmul.mubr.msk.f32.vlgmr.msra.gmra.mrb[28].mxu0 %vm947_vm3, %v3714_v46  ;;  %v8093_v46 = vld [vmem:[%s12021_s12 + $0x68] sm:$0xff] }
 0xa37   : > { %9040 = vmatpush3.msk.msra.mxu0 %vm718_vm0, %v11019_v62  ;;  %9041 = vmatprep.mubr.msk.f32.mxu0 %vm705_vm1, %v10100_v47  ;;  %v9736_v47 = vpack.c.bf16 %v8093_v46, %v8092_v45 }
 0xa38   : > { %9705 = vmatprep.subr.bf16.mxu0 %v9704_v0 }
 0xa39   : > { %9737 = vmatprep.subr.bf16.mxu1 %v9736_v47 }
 0xa3a   : > { %9042 = vmatmul.mubr.msk.f32.vlgmr.msra.gmra.mrb[30].mxu0 %vm705_vm1, %v10101_v50  ;;  %v8078_v50 = vld [vmem:[%s12022_s13] ss:$0 sm:$0xff] }
 0xa3b   : > { %9044 = vmatprep.mubr.msk.f32.mxu0 %vm705_vm1, %v10102_v51  ;;  %9707 = vmatpush3.bf16.msra.mxu0 %v9704_v0  ;;  %v3965_v0 = vld [vmem:[%s12025_s16 + $0x20] sm:$0xff] }
 0xa3c   : > { %9709 = vmatprep.subr.bf16.mxu0 %v9708_v38  ;;  %v9720_v5 = vpack.c.bf16 %v3966_v1, %v3965_v0 }
 0xa3e   : > { %9045 = vmatmul.mubr.msk.f32.gmra.mrb[32].mxu0 %vm705_vm1, %v10103_v53 }
 0xa3f   : > { %9711 = vmatpush3.bf16.msra.mxu0 %v9708_v38 }
 0xa40   : > { %9713 = vmatprep.subr.bf16.mxu0 %v9712_v44 }
 0xb09   : > { %v3783_v8 = vpop.f32.mrb[28].mxu0 }
 0xb0a   : > { %v11106_v62 = vadd.f32 %v8070_v39, %v3783_v8  ;;  %v9038_v9 = vpop.f32.mrb[29].mxu0  ;;  %v3969_v39 = vld [vmem:[%s12025_s16 + $0x40] sm:$0xff] }
 0xb0b   : > { %v9728_v8 = vpack.c.bf16 %v3970_v42, %v3969_v39  ;;  %v3972_v9 = vld [vmem:[%s12025_s16 + $0x58] sm:$0xff] }
 0xb0c   : > { %3788 = vst.msk [vmem:[%s11114_s24] sm:$0xf] %vm3787_vm8, %v11106_v62 }
 0xb0d   : > { %v9043_v14 = vpop.f32.mrb[30].mxu0 }
 0xb0e   : > { %v3881_v16 = vadd.f32 %v9043_v14, %v8072_v11  ;;  %v3875_v35 = vpop.f32.mrb[31].mxu0 }
 0xb0f   : > { %v3876_v52 = vadd.f32 %v8072_v11, %v3875_v35  ;;  %v8098_v35 = vld [vmem:[%s12021_s12 + $0x90] sm:$0xff] }
 0xb10   : > { %v11120_v54 = vadd.f32 %v3926_v12, %v3881_v16  ;;  %v8094_v12 = vld [vmem:[%s12021_s12 + $0x70] sm:$0xff] }
 0xb11   : > { %v3939_v18 = vadd.f32 %v3922_v15, %v3876_v52  ;;  %v9046_v19 = vpop.f32.mrb[32].mxu0  ;;  %v9740_v14 = vpack.c.bf16 %v8095_v13, %v8094_v12  ;;  %v8096_v15 = vld [vmem:[%s12021_s12 + $0x80] sm:$0xff]  ;;  %v8099_v52 = vld [vmem:[%s12021_s12 + $0x98] sm:$0xff] }
 0xb12   : > { %v3891_v25 = vadd.f32 %v9046_v19, %v8072_v11  ;;  %v3885_v28 = vpop.f32.mrb[33].mxu0  ;;  %v3974_v32 = vmax.f32 %v11120_v54, 0.0  ;;  %v9751_v16 = vpack.c.bf16 %v8097_v36, %v8096_v15 }
 0xb13   : > { %v3973_v29 = vmax.f32 %v3939_v18, 0.0  ;;  %v3886_v31 = vadd.f32 %v8072_v11, %v3885_v28  ;;  %v9732_v11 = vpack.c.bf16 %v3972_v9, %v3971_v26  ;;  %v8101_v28 = vld [vmem:[%s12021_s12 + $0xa8] sm:$0xff]  ;;  %v8112_v9 = vld [vmem:[%s12025_s16 + $0xa0] sm:$0xff] }
 0xb14   : > { %v11125_v48 = vadd.f32 %v3934_v17, %v3891_v25  ;;  %v8083_v17 = vld [vmem:[%s12024_s15] ss:$0 sm:$0xff] }
 0xb15   : > { %v11127_v49 = vadd.f32 %v3930_v23, %v3886_v31  ;;  %9071 = vmatprep.mubr.msk.f32.mxu1 %vm3983_vm9, %v3973_v29  ;;  %v8100_v25 = vld [vmem:[%s12021_s12 + $0xa0] sm:$0xff] }
 0xb16   : > { %v3976_v21 = vmax.f32 %v11125_v48, 0.0  ;;  %9072 = vmatmul.mubr.msk.f32.vlgmr.msra.gmra.mrb[32].mxu1 %vm3983_vm9, %v3974_v32 }
 0xb17   : > { %v3975_v33 = vmax.f32 %v11127_v49, 0.0  ;;  %9739 = vmatpush3.bf16.msra.mxu1 %v9736_v47 }
 0xb18   : > { %9741 = vmatprep.subr.bf16.mxu1 %v9740_v14 }
 0xb19   : > { %9074 = vmatprep.mubr.msk.f32.mxu1 %vm3983_vm9, %v3975_v33  ;;  %v9745_v33 = vpack.c.bf16 %v8101_v28, %v8100_v25  ;;  %v8114_v25 = vld [vmem:[%s12025_s16 + $0xb0] sm:$0xff]  ;;  %v8115_v28 = vld [vmem:[%s12025_s16 + $0xb8] sm:$0xff] }
 0xb1a   : > { %9075 = vmatmul.mubr.msk.f32.gmra.mrb[34].mxu1 %vm3983_vm9, %v3976_v21 }
 0xb1b   : > { %9743 = vmatpush3.bf16.msra.mxu1 %v9740_v14 }
 0xb1c   : > { %9744 = vmatprep.subr.bf16.mxu1 %v10200_v3 }
 0xbe9   : > { %v9073_v51 = vpop.f32.mrb[32].mxu1 }
 0xbea   : > { %v4068_v53 = vadd.f32 %v9073_v51, %v8078_v50  ;;  %v4062_v55 = vpop.f32.mrb[33].mxu1  ;;  %v9748_v51 = vpack.c.bf16 %v8103_v37, %v8102_v34  ;;  %v8110_v37 = vld [vmem:[%s12025_s16 + $0x90] sm:$0xff] }
 0xbeb   : > { %v4063_v56 = vadd.f32 %v8078_v50, %v4062_v55 }
 0xbec   : > { %v4082_v10 = vmax.f32 %v4068_v53, 0.0 }
 0xbed   : > { %v4081_v59 = vmax.f32 %v4063_v56, 0.0  ;;  %v9076_v60 = vpop.f32.mrb[34].mxu1 }
 0xbee   : > { %v4078_v61 = vadd.f32 %v9076_v60, %v8078_v50  ;;  %v4072_v6 = vpop.f32.mrb[35].mxu1 }
 0xbef   : > { %v4073_v63 = vadd.f32 %v8078_v50, %v4072_v6  ;;  %9085 = vmatprep.mubr.msk.f32.mxu0 %vm947_vm3, %v4081_v59 }
 0xbf0   : > { %v4084_v2 = vmax.f32 %v4078_v61, 0.0  ;;  %9086 = vmatmul.mubr.msk.f32.vlgmr.msra.gmra.mrb[34].mxu0 %vm947_vm3, %v4082_v10 }
 0xbf1   : > { %v4083_v4 = vmax.f32 %v4073_v63, 0.0  ;;  %9715 = vmatpush3.bf16.msra.mxu0 %v9712_v44 }
 0xbf2   : > { %9717 = vmatprep.subr.bf16.mxu0 %v9716_v24 }
 0xbf3   : > { %9088 = vmatprep.mubr.msk.f32.mxu0 %vm947_vm3, %v4083_v4 }
 0xbf4   : > { %9089 = vmatmul.mubr.msk.f32.gmra.mrb[36].mxu0 %vm947_vm3, %v4084_v2 }
 0xbf5   : > { %9719 = vmatpush3.bf16.msra.mxu0 %v9716_v24  ;;  %9115 = vmatprep.mubr.msk.f32.mxu0 %vm3983_vm9, %v3939_v18 }
 0xbf6   : > { %9721 = vmatprep.subr.bf16.mxu0 %v9720_v5 }
 0xbf9   : > { %9723 = vmatpush3.bf16.msra.mxu0 %v9720_v5 }
 0xbfa   : > { %9725 = vmatprep.subr.bf16.mxu0 %v9724_v20 }
 0xbfd   : > { %9727 = vmatpush3.bf16.msra.mxu0 %v9724_v20 }
 0xbfe   : > { %9729 = vmatprep.subr.bf16.mxu0 %v9728_v8 }
 0xc01   : > { %9731 = vmatpush3.bf16.msra.mxu0 %v9728_v8 }
 0xc02   : > { %9733 = vmatprep.subr.bf16.mxu0 %v9732_v11 }
 0xc05   : > { %9735 = vmatpush3.bf16.msra.mxu0 %v9732_v11  ;;  %v8113_v11 = vld [vmem:[%s12025_s16 + $0xa8] sm:$0xff] }
 0xc06   : > { %9750 = vmatprep.subr.bf16.mxu0 %v10200_v3 }
 0xc08   : > { %9116 = vmatmul.mubr.msk.f32.vlgmr.msra.gmra.mrb[34].mxu0 %vm3983_vm9, %v11120_v54  ;;  %v9754_v54 = vpack.c.bf16 %v8099_v52, %v8098_v35  ;;  %v9773_v35 = vpack.c.bf16 %v8113_v11, %v8112_v9 }
 0xc09   : > { %9118 = vmatprep.mubr.msk.f32.mxu0 %vm3983_vm9, %v11127_v49  ;;  %9752 = vmatpush3.bf16.msra.mxu0 %v9751_v16 }
 0xc0a   : > { %9753 = vmatprep.subr.bf16.mxu0 %v10200_v3 }
 0xc0c   : > { %9119 = vmatmul.mubr.msk.f32.gmra.mrb[36].mxu0 %vm3983_vm9, %v11125_v48 }
 0xc0d   : > { %9154 = vmatprep.mubr.msk.f32.mxu0 %vm10201_vm4, %v10202_v41  ;;  %9755 = vmatpush3.bf16.msra.mxu0 %v9754_v54 }
 0xc0e   : > { %9772 = vmatprep.subr.bf16.mxu0 %v10200_v3 }
 0xcdb   : > { %v9117_v18 = vpop.f32.mrb[34].mxu0 }
 0xcdc   : > { %v11224_v19 = vadd.f32 %v9117_v18, %v8083_v17  ;;  %v4266_v23 = vpop.f32.mrb[35].mxu0 }
 0xcdd   : > { %v11232_v29 = vadd.f32 %v8083_v17, %v4266_v23 }
 0xcde   : > { %v4318_v31 = vsel %vm947_vm3, %v11224_v19, -inf  ;;  %v4347_v38 = vmax.f32 %v11224_v19, 0.0 }
 0xcdf   : > { %v4319_v32 = vrot.slane %v4318_v31, 4  ;;  %v4311_v48 = vsel %vm947_vm3, %v11232_v29, -inf  ;;  %v4346_v49 = vmax.f32 %v11232_v29, 0.0  ;;  %v9120_v21 = vpop.f32.mrb[36].mxu0 }
 0xce0   : > { %v4312_v40 = vrot.slane %v4311_v48, 4  ;;  %v11246_v43 = vadd.f32 %v9120_v21, %v8083_v17  ;;  %v4276_v44 = vpop.f32.mrb[37].mxu0  ;;  %v8108_v21 = vld [vmem:[%s12025_s16 + $0x80] sm:$0xff] }
 0xce1   : > { %v4320_v45 = vmax.f32 %v4318_v31, %v4319_v32  ;;  %v11248_v46 = vadd.f32 %v8083_v17, %v4276_v44  ;;  %9129 = vmatprep.mubr.msk.f32.mxu1 %vm947_vm3, %v4346_v49  ;;  %v9776_v49 = vpack.c.bf16 %v8115_v28, %v8114_v25 }
 0xce2   : > { %v4313_v47 = vmax.f32 %v4311_v48, %v4312_v40  ;;  %v4332_v50 = vsel %vm947_vm3, %v11246_v43, -inf  ;;  %9130 = vmatmul.mubr.msk.f32.vlgmr.msra.gmra.mrb[36].mxu1 %vm947_vm3, %v4347_v38  ;;  %v4349_v59 = vmax.f32 %v11246_v43, 0.0  ;;  %v8111_v38 = vld [vmem:[%s12025_s16 + $0x98] sm:$0xff] }
 0xce3   : > { %v4321_v53 = vrot.slane %v4320_v45, 2  ;;  %v4333_v55 = vrot.slane %v4332_v50, 4  ;;  %v4325_v56 = vsel %vm947_vm3, %v11248_v46, -inf  ;;  %v4348_v57 = vmax.f32 %v11248_v46, 0.0  ;;  %9746 = vmatpush3.bf16.msra.mxu1 %v9745_v33  ;;  %v8109_v33 = vld [vmem:[%s12025_s16 + $0x88] sm:$0xff] }
 0xce4   : > { %v4314_v58 = vrot.slane %v4313_v47, 2  ;;  %v4326_v60 = vrot.slane %v4325_v56, 4  ;;  %9747 = vmatprep.subr.bf16.mxu1 %v10200_v3  ;;  %v9779_v34 = vpack.c.bf16 %v8109_v33, %v8108_v21  ;;  %v9782_v40 = vpack.c.bf16 %v8111_v38, %v8110_v37 }
 0xce5   : > { %v4322_v10 = vmax.f32 %v4320_v45, %v4321_v53  ;;  %v4334_v61 = vmax.f32 %v4332_v50, %v4333_v55  ;;  %9132 = vmatprep.mubr.msk.f32.mxu1 %vm947_vm3, %v4348_v57  ;;  %v8124_v50 = vld [vmem:[%s12023_s14 + $0x20] sm:$0xff]  ;;  %v8126_v55 = vld [vmem:[%s12023_s14 + $0x30] sm:$0xff] }
 0xce6   : > { %v4315_v6 = vmax.f32 %v4313_v47, %v4314_v58  ;;  %v4327_v24 = vmax.f32 %v4325_v56, %v4326_v60  ;;  %9133 = vmatmul.mubr.msk.f32.gmra.mrb[38].mxu1 %vm947_vm3, %v4349_v59  ;;  %v8127_v56 = vld [vmem:[%s12023_s14 + $0x38] sm:$0xff]  ;;  %v8104_v58 = vld [vmem:[%s12025_s16 + $0x60] sm:$0xff]  ;;  %v8105_v59 = vld [vmem:[%s12025_s16 + $0x68] sm:$0xff] }
 0xce7   : > { %v4323_v63 = vrot.slane %v4322_v10, 1  ;;  %v4335_v0 = vrot.slane %v4334_v61, 2  ;;  %9749 = vmatpush3.bf16.msra.mxu1 %v9748_v51  ;;  %9143 = vmatprep.mubr.msk.f32.mxu1 %vm10201_vm4, %v10202_v41  ;;  %v8125_v51 = vld [vmem:[%s12023_s14 + $0x28] sm:$0xff]  ;;  %v9760_v57 = vpack.c.bf16 %v8127_v56, %v8126_v55  ;;  %v9764_v60 = vpack.c.bf16 %v8105_v59, %v8104_v58 }
 0xce8   : > { %v4316_v1 = vrot.slane %v4315_v6, 1  ;;  %v4328_v2 = vrot.slane %v4327_v24, 2  ;;  %v9756_v53 = vpack.c.bf16 %v8125_v51, %v8124_v50  ;;  %v8150_v51 = vld [vmem:[%s12021_s12 + $0x110] sm:$0xff] }
 0xce9   : > { %v4324_v4 = vmax.f32 %v4322_v10, %v4323_v63  ;;  %v4336_v5 = vmax.f32 %v4334_v61, %v4335_v0 }
 0xcea   : > { %v4317_v22 = vmax.f32 %v4315_v6, %v4316_v1  ;;  %v4329_v7 = vmax.f32 %v4327_v24, %v4328_v2  ;;  %9757 = vmatprep.subr.bf16.mxu1 %v9756_v53 }
 0xceb   : > { %v4337_v20 = vrot.slane %v4336_v5, 1  ;;  %v4456_v42 = vmax.f32 %v4324_v4, 0.0  ;;  %v4340_v12 = vsel %vm947_vm3, %v4324_v4, -inf }
 0xcec   : > { %v4330_v39 = vrot.slane %v4329_v7, 1  ;;  %v4455_v8 = vmax.f32 %v4317_v22, 0.0  ;;  %v4339_v13 = vsel %vm947_vm3, %v4317_v22, -inf  ;;  %v4957_v44 = vsel %vm1305_vm5, %v4324_v4, %v4317_v22 }
 0xced   : > { %v4338_v26 = vmax.f32 %v4336_v5, %v4337_v20  ;;  %v4343_v52 = vmax.f32 %v4339_v13, %v4340_v12  ;;  %v8117_v20 = vld [vmem:[%s12022_s13 + $0x1] ss:$0 sm:$0xff] }
 0xcee   : > { %v4331_v14 = vmax.f32 %v4329_v7, %v4330_v39  ;;  %v4541_v18 = vsel %vm1305_vm5, %v4456_v42, %v4455_v8 }
 0xcef   : > { %v4342_v15 = vsel %vm947_vm3, %v4338_v26, -inf  ;;  %v4458_v17 = vmax.f32 %v4338_v26, 0.0 }
 0xcf0   : > { %v4341_v36 = vsel %vm947_vm3, %v4331_v14, -inf  ;;  %v4457_v16 = vmax.f32 %v4331_v14, 0.0  ;;  %v4958_v45 = vsel %vm1307_vm6, %v4331_v14, %v4957_v44  ;;  %v8141_v44 = vld [vmem:[%s12021_s12 + $0xc8] sm:$0xff] }
 0xcf1   : > { %v4344_v54 = vmax.f32 %v4341_v36, %v4342_v15  ;;  %v4959_v47 = vsel %vm1309_vm7, %v4338_v26, %v4958_v45 }
 0xcf2   : > { %v4542_v23 = vsel %vm1307_vm6, %v4457_v16, %v4541_v18  ;;  %v8107_v18 = vld [vmem:[%s12025_s16 + $0x78] sm:$0xff] }
 0xcf3   : > { %v4345_v31 = vmax.f32 %v4343_v52, %v4344_v54  ;;  %v4543_v32 = vsel %vm1309_vm7, %v4458_v17, %v4542_v23  ;;  %v8106_v17 = vld [vmem:[%s12025_s16 + $0x70] sm:$0xff] }
 0xcf4   : > { %9155 = vmatmul.mubr.msk.f32.vlgmr.msra.gmra.mrb[38].mxu0 %vm947_vm3, %v4543_v32 }
 0xcf5   : > { %9774 = vmatpush3.bf16.msra.mxu0 %v9773_v35  ;;  %v4459_v48 = vmax.f32 %v4345_v31, 0.0  ;;  %9193 = vmatprep.mubr.msk.f32.mxu0 %vm10201_vm4, %v10202_v41 }
 0xcf6   : > { %9775 = vmatprep.subr.bf16.mxu0 %v10200_v3 }
 0xcf7   : > { %9144 = vmatmul.mubr.msk.f32.vlgmr.msra.gmra.mrb[40].mxu1 %vm947_vm3, %v4459_v48 }
 0xcf8   : > { %9759 = vmatpush3.bf16.msra.mxu1 %v9756_v53  ;;  %v8151_v53 = vld [vmem:[%s12021_s12 + $0x118] sm:$0xff] }
 0xcf9   : > { %9777 = vmatpush3.bf16.msra.mxu0 %v9776_v49  ;;  %9761 = vmatprep.subr.bf16.mxu1 %v9760_v57  ;;  %v9796_v55 = vpack.c.bf16 %v8151_v53, %v8150_v51 }
 0xcfa   : > { %9778 = vmatprep.subr.bf16.mxu0 %v10200_v3 }
 0xcfc   : > { %9194 = vmatmul.mubr.msk.f32.vlgmr.msra.gmra.mrb[40].mxu0 %vm947_vm3, %v4345_v31  ;;  %9763 = vmatpush3.bf16.msra.mxu1 %v9760_v57 }
 0xcfd   : > { %9780 = vmatpush3.bf16.msra.mxu0 %v9779_v34  ;;  %9204 = vmatprep.mubr.msk.f32.mxu0 %vm10201_vm4, %v10202_v41  ;;  %v9768_v34 = vpack.c.bf16 %v8107_v18, %v8106_v17 }
 0xcfe   : > { %9781 = vmatprep.subr.bf16.mxu0 %v10200_v3  ;;  %9765 = vmatprep.subr.bf16.mxu1 %v9764_v60 }
 0xd01   : > { %9783 = vmatpush3.bf16.msra.mxu0 %v9782_v40  ;;  %v8140_v40 = vld [vmem:[%s12021_s12 + $0xc0] sm:$0xff] }
 0xd02   : > { %9792 = vmatprep.subr.bf16.mxu0 %v10200_v3  ;;  %v9784_v45 = vpack.c.bf16 %v8141_v44, %v8140_v40 }
 0xd04   : > { %9205 = vmatmul.mubr.msk.f32.vlgmr.msra.gmra.mrb[42].mxu0 %vm947_vm3, %v4959_v47  ;;  %v8149_v47 = vld [vmem:[%s12021_s12 + $0x108] sm:$0xff] }
 0xd05   : > { %9229 = vmatprep.mubr.msk.f32.mxu0 %vm10201_vm4, %v10202_v41 }
 0xdb5   : > { %v9131_v10 = vpop.f32.mrb[36].mxu1 }
 0xdb6   : > { %v4436_v61 = vpop.f32.mrb[37].mxu1  ;;  %v4442_v13 = vadd.f32 %v9131_v10, %v8117_v20 }
 0xdb7   : > { %v4437_v26 = vadd.f32 %v8117_v20, %v4436_v61 }
 0xdb9   : > { %v9134_v6 = vpop.f32.mrb[38].mxu1 }
 0xdba   : > { %v4446_v24 = vpop.f32.mrb[39].mxu1  ;;  %v4452_v52 = vadd.f32 %v9134_v6, %v8117_v20 }
 0xdbb   : > { %v4447_v14 = vadd.f32 %v8117_v20, %v4446_v24 }
 0xdc7   : > { %v4612_v63 = vpop.f32.mrb[38].mxu0 }
 0xdc8   : > { %v9156_v0 = vpop.f32.mrb[39].mxu0 }
 0xdca   : > { %v4529_v1 = vpop.f32.mrb[40].mxu1 }
 0xdcb   : > { %v4536_v2 = vrot.slane %v4529_v1, %v10575_v30  ;;  %v9145_v4 = vpop.f32.mrb[41].mxu1 }
 0xdcc   : > { %v8144_v4 = vld [vmem:[%s12021_s12 + $0xe0] sm:$0xff] }
 0xdcd   : > { %v4613_v5 = vadd.f32 %v4612_v63, %v4536_v2 }
 0xdcf   : > { %v4623_v22 = vrot.slane %v4613_v5, %v10571_v27  ;;  %v4945_v7 = vpop.f32.mrb[40].mxu0  ;;  %v8145_v5 = vld [vmem:[%s12021_s12 + $0xe8] sm:$0xff] }
 0xdd0   : > { %v9195_v39 = vpop.f32.mrb[41].mxu0  ;;  %v4952_v54 = vrot.slane %v4945_v7, %v10575_v30 }
 0xdd1   : > { %v4624_v42 = vcombine.high %v4623_v22, %v4623_v22  ;;  %v4631_v8 = vrot.slane %v4623_v22, %v10571_v27 }
 0xdd3   : > { %v4638_v9 = vrot.slane %v4624_v42, %v10571_v27  ;;  %v4639_v11 = vcombine.high %v4631_v8, %v4631_v8  ;;  %v4644_v12 = vrot.slane %v4631_v8, %v10575_v30 }
 0xdd5   : > { %v4640_v15 = vcombine.high %v4638_v9, %v4638_v9  ;;  %v4648_v36 = vrot.slane %v4638_v9, %v10575_v30  ;;  %v4661_v16 = vadd.f32 %v4644_v12, %v4437_v26  ;;  %v4652_v35 = vrot.slane %v4639_v11, %v10575_v30 }
 0xdd6   : > { %v9799_v11 = vpack.c.bf16 %v8145_v5, %v8144_v4 }
 0xdd7   : > { %v5028_v23 = vpop.f32.mrb[42].mxu0  ;;  %v4665_v25 = vmax.f32 %v4661_v16, 0.0  ;;  %v4662_v28 = vadd.f32 %v4648_v36, %v4442_v13  ;;  %v4663_v31 = vadd.f32 %v4652_v35, %v4447_v14  ;;  %v4656_v32 = vrot.slane %v4640_v15, %v10575_v30  ;;  %v8146_v36 = vld [vmem:[%s12021_s12 + $0xf0] sm:$0xff]  ;;  %v8147_v16 = vld [vmem:[%s12021_s12 + $0xf8] sm:$0xff] }
 0xdd8   : > { %v5029_v48 = vadd.f32 %v5028_v23, %v4952_v54  ;;  %v9206_v49 = vpop.f32.mrb[43].mxu0 }
 0xdd9   : > { %9165 = vmatprep.mubr.msk.f32.mxu1 %vm947_vm3, %v4665_v25  ;;  %v4666_v21 = vmax.f32 %v4662_v28, 0.0  ;;  %v4667_v33 = vmax.f32 %v4663_v31, 0.0  ;;  %v4664_v37 = vadd.f32 %v4656_v32, %v4452_v52  ;;  %v9802_v28 = vpack.c.bf16 %v8147_v16, %v8146_v36  ;;  %v8158_v36 = vld [vmem:[%s12025_s16 + $0xf0] sm:$0xff]  ;;  %v8159_v16 = vld [vmem:[%s12025_s16 + $0xf8] sm:$0xff] }
 0xdda   : > { %v5039_v56 = vrot.slane %v5029_v48, %v10571_v27 }
 0xddb   : > { %9166 = vmatmul.mubr.msk.f32.vlgmr.msra.gmra.mrb[42].mxu1 %vm947_vm3, %v4666_v21  ;;  %v4668_v38 = vmax.f32 %v4664_v37, 0.0 }
 0xddc   : > { %9767 = vmatpush3.bf16.msra.mxu1 %v9764_v60  ;;  %9168 = vmatprep.mubr.msk.f32.mxu1 %vm947_vm3, %v4667_v33  ;;  %v5040_v57 = vcombine.high %v5039_v56, %v5039_v56  ;;  %v5047_v58 = vrot.slane %v5039_v56, %v10571_v27  ;;  %v8129_v60 = vld [vmem:[%s12024_s15 + $0x1] ss:$0 sm:$0xff] }
 0xddd   : > { %9769 = vmatprep.subr.bf16.mxu1 %v9768_v34 }
 0xdde   : > { %v5054_v59 = vrot.slane %v5040_v57, %v10571_v27  ;;  %v5055_v61 = vcombine.high %v5047_v58, %v5047_v58  ;;  %v5060_v1 = vrot.slane %v5047_v58, %v10575_v30 }
 0xddf   : > { %9169 = vmatmul.mubr.msk.f32.gmra.mrb[44].mxu1 %vm947_vm3, %v4668_v38 }
 0xde0   : > { %9771 = vmatpush3.bf16.msra.mxu1 %v9768_v34  ;;  %9179 = vmatprep.mubr.msk.f32.mxu1 %vm947_vm3, %v11232_v29  ;;  %v8143_v29 = vld [vmem:[%s12021_s12 + $0xd8] sm:$0xff]  ;;  %v5064_v6 = vrot.slane %v5054_v59, %v10575_v30  ;;  %v5056_v0 = vcombine.high %v5054_v59, %v5054_v59  ;;  %v5068_v39 = vrot.slane %v5055_v61, %v10575_v30  ;;  %v8160_v59 = vld [vmem:[%s12025_s16 + $0x100] sm:$0xff] }
 0xde1   : > { %9785 = vmatprep.subr.bf16.mxu1 %v9784_v45 }
 0xde2   : > { %v5072_v8 = vrot.slane %v5056_v0, %v10575_v30 }
 0xde3   : > { %9180 = vmatmul.mubr.msk.f32.vlgmr.msra.gmra.mrb[42].mxu1 %vm947_vm3, %v11224_v19  ;;  %v8142_v19 = vld [vmem:[%s12021_s12 + $0xd0] sm:$0xff] }
 0xde4   : > { %9182 = vmatprep.mubr.msk.f32.mxu1 %vm947_vm3, %v11248_v46  ;;  %9787 = vmatpush3.bf16.msra.mxu1 %v9784_v45  ;;  %v8148_v46 = vld [vmem:[%s12021_s12 + $0x100] sm:$0xff] }
 0xde5   : > { %v9793_v50 = vpack.c.bf16 %v8149_v47, %v8148_v46 }
 0xde7   : > { %9183 = vmatmul.mubr.msk.f32.gmra.mrb[44].mxu1 %vm947_vm3, %v11246_v43  ;;  %v9788_v43 = vpack.c.bf16 %v8143_v29, %v8142_v19  ;;  %9794 = vmatpush3.bf16.msra.mxu0 %v9793_v50 }
 0xde8   : > { %9795 = vmatprep.subr.bf16.mxu0 %v10200_v3 }
 0xde9   : > { %9789 = vmatprep.subr.bf16.mxu1 %v9788_v43 }
 0xdea   : > { %9791 = vmatpush3.bf16.msra.mxu1 %v9788_v43 }
 0xdeb   : > { %9798 = vmatprep.subr.bf16.mxu1 %v10200_v3  ;;  %9797 = vmatpush3.bf16.msra.mxu0 %v9796_v55 }
 0xeb6   : > { %v9181_v10 = vpop.f32.mrb[42].mxu1 }
 0xeb7   : > { %v9980_v24 = vadd.f32 %v9181_v10, %v8129_v60  ;;  %v4857_v63 = vpop.f32.mrb[43].mxu1 }
 0xeb8   : > { %v9982_v2 = vadd.f32 %v8129_v60, %v4857_v63 }
 0xeb9   : > { %v11399_v22 = vadd.f32 %v9980_v24, %v5064_v6 }
 0xeba   : > { %v11401_v7 = vadd.f32 %v9982_v2, %v5060_v1  ;;  %v9184_v20 = vpop.f32.mrb[44].mxu1 }
 0xebb   : > { %v5118_v42 = vsel %vm947_vm3, %v11399_v22, -inf  ;;  %v9984_v26 = vadd.f32 %v9184_v20, %v8129_v60  ;;  %v4867_v9 = vpop.f32.mrb[45].mxu1  ;;  %v5147_v35 = vmax.f32 %v11399_v22, 0.0 }
 0xebc   : > { %v5119_v12 = vrot.slane %v5118_v42, 4  ;;  %v5111_v13 = vsel %vm947_vm3, %v11401_v7, -inf  ;;  %v5146_v14 = vmax.f32 %v11401_v7, 0.0  ;;  %v9986_v15 = vadd.f32 %v8129_v60, %v4867_v9  ;;  %v8161_v60 = vld [vmem:[%s12025_s16 + $0x108] sm:$0xff] }
 0xebd   : > { %v5112_v52 = vrot.slane %v5111_v13, 4  ;;  %v11417_v54 = vadd.f32 %v9984_v26, %v5072_v8  ;;  %v9821_v1 = vpack.c.bf16 %v8161_v60, %v8160_v59  ;;  %v8163_v8 = vld [vmem:[%s12025_s16 + $0x118] sm:$0xff] }
 0xebe   : > { %v5120_v17 = vmax.f32 %v5118_v42, %v5119_v12  ;;  %v11419_v18 = vadd.f32 %v9986_v15, %v5068_v39  ;;  %9215 = vmatprep.mubr.msk.f32.mxu1 %vm947_vm3, %v5146_v14  ;;  %v8162_v42 = vld [vmem:[%s12025_s16 + $0x110] sm:$0xff]  ;;  %v8157_v14 = vld [vmem:[%s12025_s16 + $0xe8] sm:$0xff] }
 0xebf   : > { %v5113_v23 = vmax.f32 %v5111_v13, %v5112_v52  ;;  %v5132_v25 = vsel %vm947_vm3, %v11417_v54, -inf  ;;  %9216 = vmatmul.mubr.msk.f32.vlgmr.msra.gmra.mrb[46].mxu1 %vm947_vm3, %v5147_v35  ;;  %v5149_v33 = vmax.f32 %v11417_v54, 0.0  ;;  %v9824_v12 = vpack.c.bf16 %v8163_v8, %v8162_v42  ;;  %v8156_v13 = vld [vmem:[%s12025_s16 + $0xe0] sm:$0xff] }
 0xec0   : > { %v5121_v31 = vrot.slane %v5120_v17, 2  ;;  %v5133_v32 = vrot.slane %v5132_v25, 4  ;;  %v5125_v48 = vsel %vm947_vm3, %v11419_v18, -inf  ;;  %v5148_v49 = vmax.f32 %v11419_v18, 0.0  ;;  %9800 = vmatpush3.bf16.msra.mxu1 %v9799_v11 }
 0xec1   : > { %v5114_v21 = vrot.slane %v5113_v23, 2  ;;  %v5126_v34 = vrot.slane %v5125_v48, 4  ;;  %9801 = vmatprep.subr.bf16.mxu1 %v10200_v3  ;;  %v9827_v15 = vpack.c.bf16 %v8157_v14, %v8156_v13  ;;  %v9830_v35 = vpack.c.bf16 %v8159_v16, %v8158_v36 }
 0xec2   : > { %v5122_v37 = vmax.f32 %v5120_v17, %v5121_v31  ;;  %v5134_v38 = vmax.f32 %v5132_v25, %v5133_v32  ;;  %9218 = vmatprep.mubr.msk.f32.mxu1 %vm947_vm3, %v5148_v49  ;;  %v8172_v25 = vld [vmem:[%s12023_s14 + $0x40] sm:$0xff]  ;;  %v8174_v32 = vld [vmem:[%s12023_s14 + $0x50] sm:$0xff] }
 0xec3   : > { %v5115_v40 = vmax.f32 %v5113_v23, %v5114_v21  ;;  %v5127_v44 = vmax.f32 %v5125_v48, %v5126_v34  ;;  %9219 = vmatmul.mubr.msk.f32.gmra.mrb[48].mxu1 %vm947_vm3, %v5149_v33  ;;  %v8175_v48 = vld [vmem:[%s12023_s14 + $0x58] sm:$0xff]  ;;  %v8152_v21 = vld [vmem:[%s12025_s16 + $0xc0] sm:$0xff]  ;;  %v8153_v33 = vld [vmem:[%s12025_s16 + $0xc8] sm:$0xff] }
 0xec4   : > { %v5123_v45 = vrot.slane %v5122_v37, 1  ;;  %v5135_v19 = vrot.slane %v5134_v38, 2  ;;  %9803 = vmatpush3.bf16.msra.mxu1 %v9802_v28  ;;  %9240 = vmatprep.mubr.msk.f32.mxu1 %vm10201_vm4, %v10202_v41  ;;  %v8173_v28 = vld [vmem:[%s12023_s14 + $0x48] sm:$0xff]  ;;  %v9808_v49 = vpack.c.bf16 %v8175_v48, %v8174_v32  ;;  %v9812_v34 = vpack.c.bf16 %v8153_v33, %v8152_v21 }
 0xec5   : > { %v5116_v29 = vrot.slane %v5115_v40, 1  ;;  %v5128_v43 = vrot.slane %v5127_v44, 2  ;;  %9820 = vmatprep.subr.bf16.mxu1 %v10200_v3  ;;  %v9804_v31 = vpack.c.bf16 %v8173_v28, %v8172_v25  ;;  %v8198_v28 = vld [vmem:[%s12021_s12 + $0x170] sm:$0xff] }
 0xec6   : > { %v5124_v46 = vmax.f32 %v5122_v37, %v5123_v45  ;;  %v5136_v47 = vmax.f32 %v5134_v38, %v5135_v19 }
 0xec7   : > { %v5117_v50 = vmax.f32 %v5115_v40, %v5116_v29  ;;  %v5129_v51 = vmax.f32 %v5127_v44, %v5128_v43  ;;  %9805 = vmatprep.subr.bf16.mxu0 %v9804_v31 }
 0xec8   : > { %v5137_v53 = vrot.slane %v5136_v47, 1  ;;  %v5256_v56 = vmax.f32 %v5124_v46, 0.0  ;;  %v5140_v10 = vsel %vm947_vm3, %v5124_v46, -inf }
 0xec9   : > { %v5130_v55 = vrot.slane %v5129_v51, 1  ;;  %v5255_v57 = vmax.f32 %v5117_v50, 0.0  ;;  %v5139_v61 = vsel %vm947_vm3, %v5117_v50, -inf  ;;  %v5757_v52 = vsel %vm1305_vm5, %v5124_v46, %v5117_v50 }
 0xeca   : > { %v5138_v58 = vmax.f32 %v5136_v47, %v5137_v53  ;;  %v5143_v5 = vmax.f32 %v5139_v61, %v5140_v10  ;;  %v8165_v53 = vld [vmem:[%s12022_s13 + $0x2] ss:$0 sm:$0xff] }
 0xecb   : > { %v5131_v6 = vmax.f32 %v5129_v51, %v5130_v55  ;;  %v5341_v4 = vsel %vm1305_vm5, %v5256_v56, %v5255_v57 }
 0xecc   : > { %v5142_v24 = vsel %vm947_vm3, %v5138_v58, -inf  ;;  %v5258_v2 = vmax.f32 %v5138_v58, 0.0 }
 0xecd   : > { %v5141_v63 = vsel %vm947_vm3, %v5131_v6, -inf  ;;  %v5257_v0 = vmax.f32 %v5131_v6, 0.0  ;;  %v5758_v17 = vsel %vm1307_vm6, %v5131_v6, %v5757_v52  ;;  %v8189_v52 = vld [vmem:[%s12021_s12 + $0x128] sm:$0xff] }
 0xece   : > { %v5144_v20 = vmax.f32 %v5141_v63, %v5142_v24  ;;  %v5759_v23 = vsel %vm1309_vm7, %v5138_v58, %v5758_v17 }
 0xecf   : > { %v5342_v39 = vsel %vm1307_vm6, %v5257_v0, %v5341_v4 }
 0xed0   : > { %v5343_v26 = vsel %vm1309_vm7, %v5258_v2, %v5342_v39  ;;  %v5145_v9 = vmax.f32 %v5143_v5, %v5144_v20  ;;  %v8154_v5 = vld [vmem:[%s12025_s16 + $0xd0] sm:$0xff]  ;;  %v8155_v20 = vld [vmem:[%s12025_s16 + $0xd8] sm:$0xff] }
 0xed1   : > { %9241 = vmatmul.mubr.msk.f32.vlgmr.msra.gmra.mrb[50].mxu1 %vm947_vm3, %v5343_v26 }
 0xed2   : > { %9822 = vmatpush3.bf16.msra.mxu1 %v9821_v1  ;;  %v5259_v11 = vmax.f32 %v5145_v9, 0.0  ;;  %9279 = vmatprep.mubr.msk.f32.mxu1 %vm10201_vm4, %v10202_v41 }
 0xed3   : > { %9823 = vmatprep.subr.bf16.mxu1 %v10200_v3 }
 0xed4   : > { %9230 = vmatmul.mubr.msk.f32.vlgmr.msra.gmra.mrb[44].mxu0 %vm947_vm3, %v5259_v11 }
 0xed5   : > { %9807 = vmatpush3.bf16.msra.mxu0 %v9804_v31  ;;  %v8199_v31 = vld [vmem:[%s12021_s12 + $0x178] sm:$0xff] }
 0xed6   : > { %9825 = vmatpush3.bf16.msra.mxu1 %v9824_v12  ;;  %9809 = vmatprep.subr.bf16.mxu0 %v9808_v49  ;;  %v9844_v32 = vpack.c.bf16 %v8199_v31, %v8198_v28 }
 0xed7   : > { %9826 = vmatprep.subr.bf16.mxu1 %v10200_v3 }
 0xed9   : > { %9280 = vmatmul.mubr.msk.f32.vlgmr.msra.gmra.mrb[52].mxu1 %vm947_vm3, %v5145_v9  ;;  %9811 = vmatpush3.bf16.msra.mxu0 %v9808_v49 }
 0xeda   : > { %9828 = vmatpush3.bf16.msra.mxu1 %v9827_v15  ;;  %9290 = vmatprep.mubr.msk.f32.mxu1 %vm10201_vm4, %v10202_v41  ;;  %v9816_v15 = vpack.c.bf16 %v8155_v20, %v8154_v5 }
 0xedb   : > { %9829 = vmatprep.subr.bf16.mxu1 %v10200_v3  ;;  %9813 = vmatprep.subr.bf16.mxu0 %v9812_v34 }
 0xede   : > { %9831 = vmatpush3.bf16.msra.mxu1 %v9830_v35  ;;  %v8188_v35 = vld [vmem:[%s12021_s12 + $0x120] sm:$0xff] }
 0xedf   : > { %9840 = vmatprep.subr.bf16.mxu1 %v10200_v3  ;;  %v9832_v17 = vpack.c.bf16 %v8189_v52, %v8188_v35 }
 0xee1   : > { %9291 = vmatmul.mubr.msk.f32.vlgmr.msra.gmra.mrb[54].mxu1 %vm947_vm3, %v5759_v23  ;;  %v8197_v23 = vld [vmem:[%s12021_s12 + $0x168] sm:$0xff] }
 0xee2   : > { %9315 = vmatprep.mubr.msk.f32.mxu1 %vm10201_vm4, %v10202_v41 }
 0xf92   : > { %v9217_v37 = vpop.f32.mrb[46].mxu1 }
 0xf93   : > { %v5236_v38 = vpop.f32.mrb[47].mxu1  ;;  %v5242_v61 = vadd.f32 %v9217_v37, %v8165_v53 }
 0xf94   : > { %v5237_v58 = vadd.f32 %v8165_v53, %v5236_v38 }
 0xf96   : > { %v9220_v40 = vpop.f32.mrb[48].mxu1 }
 0xf97   : > { %v5246_v44 = vpop.f32.mrb[49].mxu1  ;;  %v5252_v2 = vadd.f32 %v9220_v40, %v8165_v53 }
 0xf98   : > { %v5247_v6 = vadd.f32 %v8165_v53, %v5246_v44 }
 0xfa4   : > { %v5412_v45 = vpop.f32.mrb[50].mxu1 }
 0xfa5   : > { %v9242_v19 = vpop.f32.mrb[51].mxu1 }
 0xfa7   : > { %v5329_v29 = vpop.f32.mrb[44].mxu0 }
 0xfa8   : > { %v5336_v43 = vrot.slane %v5329_v29, %v10575_v30  ;;  %v9231_v46 = vpop.f32.mrb[45].mxu0 }
 0xfa9   : > { %v8192_v46 = vld [vmem:[%s12021_s12 + $0x140] sm:$0xff] }
 0xfaa   : > { %v5413_v47 = vadd.f32 %v5412_v45, %v5336_v43 }
 0xfac   : > { %v5423_v50 = vrot.slane %v5413_v47, %v10571_v27  ;;  %v5745_v51 = vpop.f32.mrb[52].mxu1  ;;  %v8193_v47 = vld [vmem:[%s12021_s12 + $0x148] sm:$0xff] }
 0xfad   : > { %v9281_v55 = vpop.f32.mrb[53].mxu1  ;;  %v5752_v4 = vrot.slane %v5745_v51, %v10575_v30 }
 0xfae   : > { %v5424_v56 = vcombine.high %v5423_v50, %v5423_v50  ;;  %v5431_v57 = vrot.slane %v5423_v50, %v10571_v27 }
 0xfb0   : > { %v5438_v59 = vrot.slane %v5424_v56, %v10571_v27  ;;  %v5439_v60 = vcombine.high %v5431_v57, %v5431_v57  ;;  %v5444_v10 = vrot.slane %v5431_v57, %v10575_v30 }
 0xfb2   : > { %v5440_v24 = vcombine.high %v5438_v59, %v5438_v59  ;;  %v5448_v63 = vrot.slane %v5438_v59, %v10575_v30  ;;  %v5461_v0 = vadd.f32 %v5444_v10, %v5237_v58  ;;  %v5452_v1 = vrot.slane %v5439_v60, %v10575_v30 }
 0xfb3   : > { %v9847_v60 = vpack.c.bf16 %v8193_v47, %v8192_v46 }
 0xfb4   : > { %v5828_v39 = vpop.f32.mrb[54].mxu1  ;;  %v5465_v42 = vmax.f32 %v5461_v0, 0.0  ;;  %v5462_v8 = vadd.f32 %v5448_v63, %v5242_v61  ;;  %v5463_v26 = vadd.f32 %v5452_v1, %v5247_v6  ;;  %v5456_v9 = vrot.slane %v5440_v24, %v10575_v30  ;;  %v8194_v63 = vld [vmem:[%s12021_s12 + $0x150] sm:$0xff]  ;;  %v8195_v0 = vld [vmem:[%s12021_s12 + $0x158] sm:$0xff] }
 0xfb5   : > { %v5829_v11 = vadd.f32 %v5828_v39, %v5752_v4  ;;  %v9292_v12 = vpop.f32.mrb[55].mxu1 }
 0xfb6   : > { %9251 = vmatprep.mubr.msk.f32.mxu0 %vm947_vm3, %v5465_v42  ;;  %v5466_v13 = vmax.f32 %v5462_v8, 0.0  ;;  %v5467_v14 = vmax.f32 %v5463_v26, 0.0  ;;  %v5464_v36 = vadd.f32 %v5456_v9, %v5252_v2  ;;  %v9850_v8 = vpack.c.bf16 %v8195_v0, %v8194_v63  ;;  %v8206_v63 = vld [vmem:[%s12025_s16 + $0x150] sm:$0xff]  ;;  %v8207_v0 = vld [vmem:[%s12025_s16 + $0x158] sm:$0xff] }
 0xfb7   : > { %v5839_v48 = vrot.slane %v5829_v11, %v10571_v27 }
 0xfb8   : > { %9252 = vmatmul.mubr.msk.f32.vlgmr.msra.gmra.mrb[46].mxu0 %vm947_vm3, %v5466_v13  ;;  %v5468_v16 = vmax.f32 %v5464_v36, 0.0 }
 0xfb9   : > { %9815 = vmatpush3.bf16.msra.mxu0 %v9812_v34  ;;  %9254 = vmatprep.mubr.msk.f32.mxu0 %vm947_vm3, %v5467_v14  ;;  %v5840_v49 = vcombine.high %v5839_v48, %v5839_v48  ;;  %v5847_v21 = vrot.slane %v5839_v48, %v10571_v27  ;;  %v8177_v34 = vld [vmem:[%s12024_s15 + $0x2] ss:$0 sm:$0xff] }
 0xfba   : > { %9817 = vmatprep.subr.bf16.mxu0 %v9816_v15 }
 0xfbb   : > { %v5854_v33 = vrot.slane %v5840_v49, %v10571_v27  ;;  %v5855_v38 = vcombine.high %v5847_v21, %v5847_v21  ;;  %v5860_v29 = vrot.slane %v5847_v21, %v10575_v30 }
 0xfbc   : > { %9255 = vmatmul.mubr.msk.f32.gmra.mrb[48].mxu0 %vm947_vm3, %v5468_v16 }
 0xfbd   : > { %9819 = vmatpush3.bf16.msra.mxu0 %v9816_v15  ;;  %9265 = vmatprep.mubr.msk.f32.mxu0 %vm947_vm3, %v11401_v7  ;;  %v8191_v7 = vld [vmem:[%s12021_s12 + $0x138] sm:$0xff]  ;;  %v5864_v40 = vrot.slane %v5854_v33, %v10575_v30  ;;  %v5856_v19 = vcombine.high %v5854_v33, %v5854_v33  ;;  %v5868_v55 = vrot.slane %v5855_v38, %v10575_v30  ;;  %v8208_v33 = vld [vmem:[%s12025_s16 + $0x160] sm:$0xff] }
 0xfbe   : > { %9833 = vmatprep.subr.bf16.mxu0 %v9832_v17 }
 0xfbf   : > { %v5872_v57 = vrot.slane %v5856_v19, %v10575_v30 }
 0xfc0   : > { %9266 = vmatmul.mubr.msk.f32.vlgmr.msra.gmra.mrb[46].mxu0 %vm947_vm3, %v11399_v22  ;;  %v8190_v22 = vld [vmem:[%s12021_s12 + $0x130] sm:$0xff] }
 0xfc1   : > { %9268 = vmatprep.mubr.msk.f32.mxu0 %vm947_vm3, %v11419_v18  ;;  %9835 = vmatpush3.bf16.msra.mxu0 %v9832_v17  ;;  %v8196_v18 = vld [vmem:[%s12021_s12 + $0x160] sm:$0xff] }
 0xfc2   : > { %v9841_v25 = vpack.c.bf16 %v8197_v23, %v8196_v18 }
 0xfc4   : > { %9269 = vmatmul.mubr.msk.f32.gmra.mrb[48].mxu0 %vm947_vm3, %v11417_v54  ;;  %v9836_v54 = vpack.c.bf16 %v8191_v7, %v8190_v22  ;;  %9842 = vmatpush3.bf16.msra.mxu1 %v9841_v25 }
 0xfc5   : > { %9843 = vmatprep.subr.bf16.mxu1 %v10200_v3 }
 0xfc6   : > { %9837 = vmatprep.subr.bf16.mxu0 %v9836_v54 }
 0xfc7   : > { %9839 = vmatpush3.bf16.msra.mxu0 %v9836_v54 }
 0xfc8   : > { %9846 = vmatprep.subr.bf16.mxu0 %v10200_v3  ;;  %9845 = vmatpush3.bf16.msra.mxu1 %v9844_v32 }
0x1093   : > { %v9267_v37 = vpop.f32.mrb[46].mxu0 }
0x1094   : > { %v9988_v44 = vadd.f32 %v9267_v37, %v8177_v34  ;;  %v5657_v45 = vpop.f32.mrb[47].mxu0 }
0x1095   : > { %v9990_v43 = vadd.f32 %v8177_v34, %v5657_v45 }
0x1096   : > { %v11571_v50 = vadd.f32 %v9988_v44, %v5864_v40 }
0x1097   : > { %v11573_v51 = vadd.f32 %v9990_v43, %v5860_v29  ;;  %v9270_v53 = vpop.f32.mrb[48].mxu0 }
0x1098   : > { %v5918_v56 = vsel %vm947_vm3, %v11571_v50, -inf  ;;  %v9992_v58 = vadd.f32 %v9270_v53, %v8177_v34  ;;  %v5667_v59 = vpop.f32.mrb[49].mxu0  ;;  %v5947_v1 = vmax.f32 %v11571_v50, 0.0 }
0x1099   : > { %v5919_v10 = vrot.slane %v5918_v56, 4  ;;  %v5911_v61 = vsel %vm947_vm3, %v11573_v51, -inf  ;;  %v5946_v6 = vmax.f32 %v11573_v51, 0.0  ;;  %v9994_v24 = vadd.f32 %v8177_v34, %v5667_v59  ;;  %v8209_v34 = vld [vmem:[%s12025_s16 + $0x168] sm:$0xff] }
0x109a   : > { %v5912_v2 = vrot.slane %v5911_v61, 4  ;;  %v11589_v4 = vadd.f32 %v9992_v58, %v5872_v57  ;;  %v9869_v29 = vpack.c.bf16 %v8209_v34, %v8208_v33  ;;  %v8211_v57 = vld [vmem:[%s12025_s16 + $0x178] sm:$0xff] }
0x109b   : > { %v5920_v5 = vmax.f32 %v5918_v56, %v5919_v10  ;;  %v11591_v20 = vadd.f32 %v9994_v24, %v5868_v55  ;;  %9301 = vmatprep.mubr.msk.f32.mxu0 %vm947_vm3, %v5946_v6  ;;  %v8210_v56 = vld [vmem:[%s12025_s16 + $0x170] sm:$0xff]  ;;  %v8205_v6 = vld [vmem:[%s12025_s16 + $0x148] sm:$0xff] }
0x109c   : > { %v5913_v39 = vmax.f32 %v5911_v61, %v5912_v2  ;;  %v5932_v42 = vsel %vm947_vm3, %v11589_v4, -inf  ;;  %9302 = vmatmul.mubr.msk.f32.vlgmr.msra.gmra.mrb[50].mxu0 %vm947_vm3, %v5947_v1  ;;  %v5949_v14 = vmax.f32 %v11589_v4, 0.0  ;;  %v9872_v10 = vpack.c.bf16 %v8211_v57, %v8210_v56  ;;  %v8204_v61 = vld [vmem:[%s12025_s16 + $0x140] sm:$0xff] }
0x109d   : > { %v5921_v26 = vrot.slane %v5920_v5, 2  ;;  %v5933_v9 = vrot.slane %v5932_v42, 4  ;;  %v5925_v11 = vsel %vm947_vm3, %v11591_v20, -inf  ;;  %v5948_v12 = vmax.f32 %v11591_v20, 0.0  ;;  %9848 = vmatpush3.bf16.msra.mxu0 %v9847_v60 }
0x109e   : > { %v5914_v13 = vrot.slane %v5913_v39, 2  ;;  %v5926_v15 = vrot.slane %v5925_v11, 4  ;;  %9849 = vmatprep.subr.bf16.mxu0 %v10200_v3  ;;  %v9875_v24 = vpack.c.bf16 %v8205_v6, %v8204_v61  ;;  %v9878_v1 = vpack.c.bf16 %v8207_v0, %v8206_v63 }
0x109f   : > { %v5922_v36 = vmax.f32 %v5920_v5, %v5921_v26  ;;  %v5934_v16 = vmax.f32 %v5932_v42, %v5933_v9  ;;  %9304 = vmatprep.mubr.msk.f32.mxu0 %vm947_vm3, %v5948_v12  ;;  %v8220_v42 = vld [vmem:[%s12023_s14 + $0x60] sm:$0xff]  ;;  %v8222_v9 = vld [vmem:[%s12023_s14 + $0x70] sm:$0xff] }
0x10a0   : > { %v5915_v35 = vmax.f32 %v5913_v39, %v5914_v13  ;;  %v5927_v52 = vmax.f32 %v5925_v11, %v5926_v15  ;;  %9305 = vmatmul.mubr.msk.f32.gmra.mrb[52].mxu0 %vm947_vm3, %v5949_v14  ;;  %v8223_v11 = vld [vmem:[%s12023_s14 + $0x78] sm:$0xff]  ;;  %v8200_v13 = vld [vmem:[%s12025_s16 + $0x120] sm:$0xff]  ;;  %v8201_v14 = vld [vmem:[%s12025_s16 + $0x128] sm:$0xff] }
0x10a1   : > { %v5923_v17 = vrot.slane %v5922_v36, 1  ;;  %v5935_v22 = vrot.slane %v5934_v16, 2  ;;  %9851 = vmatpush3.bf16.msra.mxu0 %v9850_v8  ;;  %9326 = vmatprep.mubr.msk.f32.mxu0 %vm10201_vm4, %v10202_v41  ;;  %v8221_v8 = vld [vmem:[%s12023_s14 + $0x68] sm:$0xff]  ;;  %v9856_v12 = vpack.c.bf16 %v8223_v11, %v8222_v9  ;;  %v9860_v15 = vpack.c.bf16 %v8201_v14, %v8200_v13 }
0x10a2   : > { %v5916_v7 = vrot.slane %v5915_v35, 1  ;;  %v5928_v54 = vrot.slane %v5927_v52, 2  ;;  %9868 = vmatprep.subr.bf16.mxu0 %v10200_v3  ;;  %v9852_v26 = vpack.c.bf16 %v8221_v8, %v8220_v42  ;;  %v8246_v8 = vld [vmem:[%s12021_s12 + $0x1d0] sm:$0xff] }
0x10a3   : > { %v5924_v18 = vmax.f32 %v5922_v36, %v5923_v17  ;;  %v5936_v23 = vmax.f32 %v5934_v16, %v5935_v22 }
0x10a4   : > { %v5917_v25 = vmax.f32 %v5915_v35, %v5916_v7  ;;  %v5929_v28 = vmax.f32 %v5927_v52, %v5928_v54  ;;  %9853 = vmatprep.subr.bf16.mxu1 %v9852_v26 }
0x10a5   : > { %v5937_v31 = vrot.slane %v5936_v23, 1  ;;  %v6056_v48 = vmax.f32 %v5924_v18, 0.0  ;;  %v5940_v37 = vsel %vm947_vm3, %v5924_v18, -inf }
0x10a6   : > { %v5930_v32 = vrot.slane %v5929_v28, 1  ;;  %v6055_v49 = vmax.f32 %v5917_v25, 0.0  ;;  %v5939_v38 = vsel %vm947_vm3, %v5917_v25, -inf  ;;  %v6557_v2 = vsel %vm1305_vm5, %v5924_v18, %v5917_v25 }
0x10a7   : > { %v5938_v21 = vmax.f32 %v5936_v23, %v5937_v31  ;;  %v5943_v47 = vmax.f32 %v5939_v38, %v5940_v37  ;;  %v8213_v31 = vld [vmem:[%s12022_s13 + $0x3] ss:$0 sm:$0xff] }
0x10a8   : > { %v5931_v40 = vmax.f32 %v5929_v28, %v5930_v32  ;;  %v6141_v46 = vsel %vm1305_vm5, %v6056_v48, %v6055_v49 }
0x10a9   : > { %v5942_v44 = vsel %vm947_vm3, %v5938_v21, -inf  ;;  %v6058_v43 = vmax.f32 %v5938_v21, 0.0 }
0x10aa   : > { %v5941_v45 = vsel %vm947_vm3, %v5931_v40, -inf  ;;  %v6057_v19 = vmax.f32 %v5931_v40, 0.0  ;;  %v6558_v5 = vsel %vm1307_vm6, %v5931_v40, %v6557_v2  ;;  %v8237_v2 = vld [vmem:[%s12021_s12 + $0x188] sm:$0xff] }
0x10ab   : > { %v5944_v53 = vmax.f32 %v5941_v45, %v5942_v44  ;;  %v6559_v39 = vsel %vm1309_vm7, %v5938_v21, %v6558_v5 }
0x10ac   : > { %v6142_v55 = vsel %vm1307_vm6, %v6057_v19, %v6141_v46 }
0x10ad   : > { %v6143_v58 = vsel %vm1309_vm7, %v6058_v43, %v6142_v55  ;;  %v5945_v59 = vmax.f32 %v5943_v47, %v5944_v53  ;;  %v8202_v47 = vld [vmem:[%s12025_s16 + $0x130] sm:$0xff]  ;;  %v8203_v53 = vld [vmem:[%s12025_s16 + $0x138] sm:$0xff] }
0x10ae   : > { %9327 = vmatmul.mubr.msk.f32.vlgmr.msra.gmra.mrb[54].mxu0 %vm947_vm3, %v6143_v58 }
0x10af   : > { %9870 = vmatpush3.bf16.msra.mxu0 %v9869_v29  ;;  %v6059_v60 = vmax.f32 %v5945_v59, 0.0  ;;  %9365 = vmatprep.mubr.msk.f32.mxu0 %vm10201_vm4, %v10202_v41 }
0x10b0   : > { %9871 = vmatprep.subr.bf16.mxu0 %v10200_v3 }
0x10b1   : > { %9316 = vmatmul.mubr.msk.f32.vlgmr.msra.gmra.mrb[56].mxu1 %vm947_vm3, %v6059_v60 }
0x10b2   : > { %9855 = vmatpush3.bf16.msra.mxu1 %v9852_v26  ;;  %v8247_v26 = vld [vmem:[%s12021_s12 + $0x1d8] sm:$0xff] }
0x10b3   : > { %9873 = vmatpush3.bf16.msra.mxu0 %v9872_v10  ;;  %9857 = vmatprep.subr.bf16.mxu1 %v9856_v12  ;;  %v9892_v9 = vpack.c.bf16 %v8247_v26, %v8246_v8 }
0x10b4   : > { %9874 = vmatprep.subr.bf16.mxu0 %v10200_v3 }
0x10b6   : > { %9366 = vmatmul.mubr.msk.f32.vlgmr.msra.gmra.mrb[56].mxu0 %vm947_vm3, %v5945_v59  ;;  %9859 = vmatpush3.bf16.msra.mxu1 %v9856_v12 }
0x10b7   : > { %9876 = vmatpush3.bf16.msra.mxu0 %v9875_v24  ;;  %9376 = vmatprep.mubr.msk.f32.mxu0 %vm10201_vm4, %v10202_v41  ;;  %v9864_v24 = vpack.c.bf16 %v8203_v53, %v8202_v47 }
0x10b8   : > { %9877 = vmatprep.subr.bf16.mxu0 %v10200_v3  ;;  %9861 = vmatprep.subr.bf16.mxu1 %v9860_v15 }
0x10bb   : > { %9879 = vmatpush3.bf16.msra.mxu0 %v9878_v1  ;;  %v8236_v1 = vld [vmem:[%s12021_s12 + $0x180] sm:$0xff] }
0x10bc   : > { %9888 = vmatprep.subr.bf16.mxu0 %v10200_v3  ;;  %v9880_v5 = vpack.c.bf16 %v8237_v2, %v8236_v1 }
0x10be   : > { %9377 = vmatmul.mubr.msk.f32.vlgmr.msra.gmra.mrb[58].mxu0 %vm947_vm3, %v6559_v39  ;;  %v8245_v39 = vld [vmem:[%s12021_s12 + $0x1c8] sm:$0xff] }
0x10bf   : > { %9401 = vmatprep.mubr.msk.f32.mxu0 %vm10201_vm4, %v10202_v41 }
0x116f   : > { %v9303_v36 = vpop.f32.mrb[50].mxu0 }
0x1170   : > { %v6036_v16 = vpop.f32.mrb[51].mxu0  ;;  %v6042_v38 = vadd.f32 %v9303_v36, %v8213_v31 }
0x1171   : > { %v6037_v21 = vadd.f32 %v8213_v31, %v6036_v16 }
0x1173   : > { %v9306_v35 = vpop.f32.mrb[52].mxu0 }
0x1174   : > { %v6046_v52 = vpop.f32.mrb[53].mxu0  ;;  %v6052_v43 = vadd.f32 %v9306_v35, %v8213_v31 }
0x1175   : > { %v6047_v40 = vadd.f32 %v8213_v31, %v6046_v52 }
0x1181   : > { %v6212_v17 = vpop.f32.mrb[54].mxu0 }
0x1182   : > { %v9328_v22 = vpop.f32.mrb[55].mxu0 }
0x1184   : > { %v6129_v7 = vpop.f32.mrb[56].mxu1 }
0x1185   : > { %v6136_v54 = vrot.slane %v6129_v7, %v10575_v30  ;;  %v9317_v18 = vpop.f32.mrb[57].mxu1 }
0x1186   : > { %v8240_v18 = vld [vmem:[%s12021_s12 + $0x1a0] sm:$0xff] }
0x1187   : > { %v6213_v23 = vadd.f32 %v6212_v17, %v6136_v54 }
0x1189   : > { %v6223_v25 = vrot.slane %v6213_v23, %v10571_v27  ;;  %v6545_v28 = vpop.f32.mrb[56].mxu0  ;;  %v8241_v23 = vld [vmem:[%s12021_s12 + $0x1a8] sm:$0xff] }
0x118a   : > { %v9367_v32 = vpop.f32.mrb[57].mxu0  ;;  %v6552_v46 = vrot.slane %v6545_v28, %v10575_v30 }
0x118b   : > { %v6224_v48 = vcombine.high %v6223_v25, %v6223_v25  ;;  %v6231_v49 = vrot.slane %v6223_v25, %v10571_v27 }
0x118d   : > { %v6238_v33 = vrot.slane %v6224_v48, %v10571_v27  ;;  %v6239_v34 = vcombine.high %v6231_v49, %v6231_v49  ;;  %v6244_v37 = vrot.slane %v6231_v49, %v10575_v30 }
0x118f   : > { %v6240_v44 = vcombine.high %v6238_v33, %v6238_v33  ;;  %v6248_v45 = vrot.slane %v6238_v33, %v10575_v30  ;;  %v6261_v19 = vadd.f32 %v6244_v37, %v6037_v21  ;;  %v6252_v29 = vrot.slane %v6239_v34, %v10575_v30 }
0x1190   : > { %v9895_v34 = vpack.c.bf16 %v8241_v23, %v8240_v18 }
0x1191   : > { %v6628_v55 = vpop.f32.mrb[58].mxu0  ;;  %v6265_v56 = vmax.f32 %v6261_v19, 0.0  ;;  %v6262_v57 = vadd.f32 %v6248_v45, %v6042_v38  ;;  %v6263_v58 = vadd.f32 %v6252_v29, %v6047_v40  ;;  %v6256_v59 = vrot.slane %v6240_v44, %v10575_v30  ;;  %v8242_v45 = vld [vmem:[%s12021_s12 + $0x1b0] sm:$0xff]  ;;  %v8243_v19 = vld [vmem:[%s12021_s12 + $0x1b8] sm:$0xff] }
0x1192   : > { %v6629_v60 = vadd.f32 %v6628_v55, %v6552_v46  ;;  %v9378_v10 = vpop.f32.mrb[59].mxu0 }
0x1193   : > { %9337 = vmatprep.mubr.msk.f32.mxu1 %vm947_vm3, %v6265_v56  ;;  %v6266_v61 = vmax.f32 %v6262_v57, 0.0  ;;  %v6267_v6 = vmax.f32 %v6263_v58, 0.0  ;;  %v6264_v63 = vadd.f32 %v6256_v59, %v6052_v43  ;;  %v9898_v57 = vpack.c.bf16 %v8243_v19, %v8242_v45  ;;  %v8254_v45 = vld [vmem:[%s12025_s16 + $0x1b0] sm:$0xff]  ;;  %v8255_v19 = vld [vmem:[%s12025_s16 + $0x1b8] sm:$0xff] }
0x1194   : > { %v6639_v11 = vrot.slane %v6629_v60, %v10571_v27 }
0x1195   : > { %9338 = vmatmul.mubr.msk.f32.vlgmr.msra.gmra.mrb[58].mxu1 %vm947_vm3, %v6266_v61  ;;  %v6268_v0 = vmax.f32 %v6264_v63, 0.0 }
0x1196   : > { %9863 = vmatpush3.bf16.msra.mxu1 %v9860_v15  ;;  %9340 = vmatprep.mubr.msk.f32.mxu1 %vm947_vm3, %v6267_v6  ;;  %v6640_v12 = vcombine.high %v6639_v11, %v6639_v11  ;;  %v6647_v13 = vrot.slane %v6639_v11, %v10571_v27  ;;  %v8225_v15 = vld [vmem:[%s12024_s15 + $0x3] ss:$0 sm:$0xff] }
0x1197   : > { %9865 = vmatprep.subr.bf16.mxu1 %v9864_v24 }
0x1198   : > { %v6654_v14 = vrot.slane %v6640_v12, %v10571_v27  ;;  %v6655_v16 = vcombine.high %v6647_v13, %v6647_v13  ;;  %v6660_v7 = vrot.slane %v6647_v13, %v10575_v30 }
0x1199   : > { %9341 = vmatmul.mubr.msk.f32.gmra.mrb[60].mxu1 %vm947_vm3, %v6268_v0 }
0x119a   : > { %9867 = vmatpush3.bf16.msra.mxu1 %v9864_v24  ;;  %9351 = vmatprep.mubr.msk.f32.mxu1 %vm947_vm3, %v11573_v51  ;;  %v8239_v51 = vld [vmem:[%s12021_s12 + $0x198] sm:$0xff]  ;;  %v6664_v35 = vrot.slane %v6654_v14, %v10575_v30  ;;  %v6656_v22 = vcombine.high %v6654_v14, %v6654_v14  ;;  %v6668_v32 = vrot.slane %v6655_v16, %v10575_v30  ;;  %v8256_v14 = vld [vmem:[%s12025_s16 + $0x1c0] sm:$0xff] }
0x119b   : > { %9881 = vmatprep.subr.bf16.mxu1 %v9880_v5 }
0x119c   : > { %v6672_v49 = vrot.slane %v6656_v22, %v10575_v30 }
0x119d   : > { %9352 = vmatmul.mubr.msk.f32.vlgmr.msra.gmra.mrb[58].mxu1 %vm947_vm3, %v11571_v50  ;;  %v8238_v50 = vld [vmem:[%s12021_s12 + $0x190] sm:$0xff] }
0x119e   : > { %9354 = vmatprep.mubr.msk.f32.mxu1 %vm947_vm3, %v11591_v20  ;;  %9883 = vmatpush3.bf16.msra.mxu1 %v9880_v5  ;;  %v8244_v20 = vld [vmem:[%s12021_s12 + $0x1c0] sm:$0xff] }
0x119f   : > { %v9889_v42 = vpack.c.bf16 %v8245_v39, %v8244_v20 }
0x11a1   : > { %9355 = vmatmul.mubr.msk.f32.gmra.mrb[60].mxu1 %vm947_vm3, %v11589_v4  ;;  %v9884_v4 = vpack.c.bf16 %v8239_v51, %v8238_v50  ;;  %9890 = vmatpush3.bf16.msra.mxu0 %v9889_v42 }
0x11a2   : > { %9891 = vmatprep.subr.bf16.mxu0 %v10200_v3 }
0x11a3   : > { %9885 = vmatprep.subr.bf16.mxu1 %v9884_v4 }
0x11a4   : > { %9887 = vmatpush3.bf16.msra.mxu1 %v9884_v4 }
0x11a5   : > { %9894 = vmatprep.subr.bf16.mxu1 %v10200_v3  ;;  %9893 = vmatpush3.bf16.msra.mxu0 %v9892_v9 }
0x1270   : > { %v9353_v36 = vpop.f32.mrb[58].mxu1 }
0x1271   : > { %v9996_v52 = vadd.f32 %v9353_v36, %v8225_v15  ;;  %v6457_v17 = vpop.f32.mrb[59].mxu1 }
0x1272   : > { %v9998_v54 = vadd.f32 %v8225_v15, %v6457_v17 }
0x1273   : > { %v11743_v25 = vadd.f32 %v9996_v52, %v6664_v35 }
0x1274   : > { %v11745_v28 = vadd.f32 %v9998_v54, %v6660_v7  ;;  %v9356_v31 = vpop.f32.mrb[60].mxu1 }
0x1275   : > { %v6718_v48 = vsel %vm947_vm3, %v11743_v25, -inf  ;;  %v10000_v21 = vadd.f32 %v9356_v31, %v8225_v15  ;;  %v6467_v33 = vpop.f32.mrb[61].mxu1  ;;  %v6747_v29 = vmax.f32 %v11743_v25, 0.0 }
0x1276   : > { %v6719_v37 = vrot.slane %v6718_v48, 4  ;;  %v6711_v38 = vsel %vm947_vm3, %v11745_v28, -inf  ;;  %v6746_v40 = vmax.f32 %v11745_v28, 0.0  ;;  %v10002_v44 = vadd.f32 %v8225_v15, %v6467_v33  ;;  %v8257_v15 = vld [vmem:[%s12025_s16 + $0x1c8] sm:$0xff] }
0x1277   : > { %v6712_v43 = vrot.slane %v6711_v38, 4  ;;  %v11761_v46 = vadd.f32 %v10000_v21, %v6672_v49  ;;  %v9917_v7 = vpack.c.bf16 %v8257_v15, %v8256_v14  ;;  %v8259_v49 = vld [vmem:[%s12025_s16 + $0x1d8] sm:$0xff] }
0x1278   : > { %v6720_v47 = vmax.f32 %v6718_v48, %v6719_v37  ;;  %v11763_v53 = vadd.f32 %v10002_v44, %v6668_v32  ;;  %9387 = vmatprep.mubr.msk.f32.mxu1 %vm947_vm3, %v6746_v40  ;;  %v8258_v48 = vld [vmem:[%s12025_s16 + $0x1d0] sm:$0xff]  ;;  %v8253_v40 = vld [vmem:[%s12025_s16 + $0x1a8] sm:$0xff] }
0x1279   : > { %v6713_v55 = vmax.f32 %v6711_v38, %v6712_v43  ;;  %v6732_v56 = vsel %vm947_vm3, %v11761_v46, -inf  ;;  %9388 = vmatmul.mubr.msk.f32.vlgmr.msra.gmra.mrb[62].mxu1 %vm947_vm3, %v6747_v29  ;;  %v6749_v6 = vmax.f32 %v11761_v46, 0.0  ;;  %v9920_v37 = vpack.c.bf16 %v8259_v49, %v8258_v48  ;;  %v8252_v38 = vld [vmem:[%s12025_s16 + $0x1a0] sm:$0xff] }
0x127a   : > { %v6721_v58 = vrot.slane %v6720_v47, 2  ;;  %v6733_v59 = vrot.slane %v6732_v56, 4  ;;  %v6725_v60 = vsel %vm947_vm3, %v11763_v53, -inf  ;;  %v6748_v10 = vmax.f32 %v11763_v53, 0.0  ;;  %9896 = vmatpush3.bf16.msra.mxu1 %v9895_v34 }
0x127b   : > { %v6714_v61 = vrot.slane %v6713_v55, 2  ;;  %v6726_v24 = vrot.slane %v6725_v60, 4  ;;  %9897 = vmatprep.subr.bf16.mxu1 %v10200_v3  ;;  %v9923_v44 = vpack.c.bf16 %v8253_v40, %v8252_v38  ;;  %v9926_v29 = vpack.c.bf16 %v8255_v19, %v8254_v45 }
0x127c   : > { %v6722_v63 = vmax.f32 %v6720_v47, %v6721_v58  ;;  %v6734_v0 = vmax.f32 %v6732_v56, %v6733_v59  ;;  %9390 = vmatprep.mubr.msk.f32.mxu1 %vm947_vm3, %v6748_v10  ;;  %v8268_v56 = vld [vmem:[%s12023_s14 + $0x80] sm:$0xff]  ;;  %v8270_v59 = vld [vmem:[%s12023_s14 + $0x90] sm:$0xff] }
0x127d   : > { %v6715_v1 = vmax.f32 %v6713_v55, %v6714_v61  ;;  %v6727_v2 = vmax.f32 %v6725_v60, %v6726_v24  ;;  %9391 = vmatmul.mubr.msk.f32.gmra.mrb[64].mxu1 %vm947_vm3, %v6749_v6  ;;  %v8271_v60 = vld [vmem:[%s12023_s14 + $0x98] sm:$0xff]  ;;  %v8248_v61 = vld [vmem:[%s12025_s16 + $0x180] sm:$0xff]  ;;  %v8249_v6 = vld [vmem:[%s12025_s16 + $0x188] sm:$0xff] }
0x127e   : > { %v6723_v5 = vrot.slane %v6722_v63, 1  ;;  %v6735_v50 = vrot.slane %v6734_v0, 2  ;;  %9899 = vmatpush3.bf16.msra.mxu1 %v9898_v57  ;;  %9412 = vmatprep.mubr.msk.f32.mxu1 %vm10201_vm4, %v10202_v41  ;;  %v8269_v57 = vld [vmem:[%s12023_s14 + $0x88] sm:$0xff]  ;;  %v9904_v10 = vpack.c.bf16 %v8271_v60, %v8270_v59  ;;  %v9908_v24 = vpack.c.bf16 %v8249_v6, %v8248_v61 }
0x127f   : > { %v6716_v51 = vrot.slane %v6715_v1, 1  ;;  %v6728_v4 = vrot.slane %v6727_v2, 2  ;;  %9916 = vmatprep.subr.bf16.mxu1 %v10200_v3  ;;  %v9900_v58 = vpack.c.bf16 %v8269_v57, %v8268_v56 }
0x1280   : > { %v6724_v20 = vmax.f32 %v6722_v63, %v6723_v5  ;;  %v6736_v39 = vmax.f32 %v6734_v0, %v6735_v50 }
0x1281   : > { %v6717_v42 = vmax.f32 %v6715_v1, %v6716_v51  ;;  %v6729_v8 = vmax.f32 %v6727_v2, %v6728_v4  ;;  %9901 = vmatprep.subr.bf16.mxu0 %v9900_v58 }
0x1282   : > { %v6737_v26 = vrot.slane %v6736_v39, 1  ;;  %v6856_v11 = vmax.f32 %v6724_v20, 0.0  ;;  %v6740_v36 = vsel %vm947_vm3, %v6724_v20, -inf }
0x1283   : > { %v6730_v9 = vrot.slane %v6729_v8, 1  ;;  %v6855_v12 = vmax.f32 %v6717_v42, 0.0  ;;  %v6739_v16 = vsel %vm947_vm3, %v6717_v42, -inf  ;;  %v7357_v43 = vsel %vm1305_vm5, %v6724_v20, %v6717_v42 }
0x1284   : > { %v6738_v13 = vmax.f32 %v6736_v39, %v6737_v26  ;;  %v6743_v23 = vmax.f32 %v6739_v16, %v6740_v36  ;;  %v8261_v26 = vld [vmem:[%s12022_s13 + $0x4] ss:$0 sm:$0xff] }
0x1285   : > { %v6731_v35 = vmax.f32 %v6729_v8, %v6730_v9  ;;  %v6941_v18 = vsel %vm1305_vm5, %v6856_v11, %v6855_v12 }
0x1286   : > { %v6742_v52 = vsel %vm947_vm3, %v6738_v13, -inf  ;;  %v6858_v54 = vmax.f32 %v6738_v13, 0.0 }
0x1287   : > { %v6741_v17 = vsel %vm947_vm3, %v6731_v35, -inf  ;;  %v6857_v22 = vmax.f32 %v6731_v35, 0.0  ;;  %v7358_v47 = vsel %vm1307_vm6, %v6731_v35, %v7357_v43 }
0x1288   : > { %v6744_v31 = vmax.f32 %v6741_v17, %v6742_v52  ;;  %v7359_v55 = vsel %vm1309_vm7, %v6738_v13, %v7358_v47  ;;  %v7609_v47 = vld [vmem:[%s12028_s19 + $0x10] sm:$0xff] }
0x1289   : > { %v6942_v32 = vsel %vm1307_vm6, %v6857_v22, %v6941_v18 }
0x128a   : > { %v6943_v21 = vsel %vm1309_vm7, %v6858_v54, %v6942_v32  ;;  %v6745_v33 = vmax.f32 %v6743_v23, %v6744_v31  ;;  %v8250_v23 = vld [vmem:[%s12025_s16 + $0x190] sm:$0xff]  ;;  %v8251_v31 = vld [vmem:[%s12025_s16 + $0x198] sm:$0xff] }
0x128b   : > { %9413 = vmatmul.mubr.msk.f32.vlgmr.msra.gmra.mrb[66].mxu1 %vm947_vm3, %v6943_v21 }
0x128c   : > { %9918 = vmatpush3.bf16.msra.mxu1 %v9917_v7  ;;  %v6859_v34 = vmax.f32 %v6745_v33, 0.0  ;;  %9451 = vmatprep.mubr.msk.f32.mxu1 %vm10201_vm4, %v10202_v41 }
0x128d   : > { %9919 = vmatprep.subr.bf16.mxu1 %v10200_v3 }
0x128e   : > { %9402 = vmatmul.mubr.msk.f32.vlgmr.msra.gmra.mrb[60].mxu0 %vm947_vm3, %v6859_v34 }
0x128f   : > { %9903 = vmatpush3.bf16.msra.mxu0 %v9900_v58 }
0x1290   : > { %9921 = vmatpush3.bf16.msra.mxu1 %v9920_v37  ;;  %9905 = vmatprep.subr.bf16.mxu0 %v9904_v10 }
0x1291   : > { %9922 = vmatprep.subr.bf16.mxu1 %v10200_v3 }
0x1293   : > { %9452 = vmatmul.mubr.msk.f32.vlgmr.msra.gmra.mrb[68].mxu1 %vm947_vm3, %v6745_v33  ;;  %9907 = vmatpush3.bf16.msra.mxu0 %v9904_v10  ;;  %v8273_v10 = vld [vmem:[%s12024_s15 + $0x4] ss:$0 sm:$0xff] }
0x1294   : > { %9924 = vmatpush3.bf16.msra.mxu1 %v9923_v44  ;;  %9462 = vmatprep.mubr.msk.f32.mxu1 %vm10201_vm4, %v10202_v41  ;;  %v9912_v44 = vpack.c.bf16 %v8251_v31, %v8250_v23 }
0x1295   : > { %9925 = vmatprep.subr.bf16.mxu1 %v10200_v3  ;;  %9909 = vmatprep.subr.bf16.mxu0 %v9908_v24 }
0x1298   : > { %9927 = vmatpush3.bf16.msra.mxu1 %v9926_v29  ;;  %v7517_v29 = vld [vmem:[%s12026_s17] sm:$0xff] }
0x1299   : > { %9934 = vmatprep.subr.bf16.mxu1 %v10200_v3 }
0x129b   : > { %9463 = vmatmul.mubr.msk.f32.vlgmr.msra.gmra.mrb[70].mxu1 %vm947_vm3, %v7359_v55  ;;  %v7610_v55 = vld [vmem:[%s12028_s19 + $0x18] sm:$0xff] }
0x129c   : > { %9480 = vmatprep.mubr.msk.f32.mxu1 %vm10201_vm4, %v10202_v41  ;;  %v9935_v56 = vpack.c.bf16 %v7610_v55, %v7609_v47  ;;  %v7608_v47 = vld [vmem:[%s12028_s19 + $0x8] sm:$0xff]  ;;  %v8284_v55 = vld [vmem:[%s12027_s18] ss:$0 sm:$0xff] }
0x129e   : > { %9936 = vmatpush3.bf16.msra.mxu1 %v9935_v56 }
0x129f   : > { %9937 = vmatprep.subr.bf16.mxu1 %v10200_v3 }
0x134c   : > { %v9389_v63 = vpop.f32.mrb[62].mxu1 }
0x134d   : > { %v6836_v0 = vpop.f32.mrb[63].mxu1  ;;  %v6842_v16 = vadd.f32 %v9389_v63, %v8261_v26 }
0x134e   : > { %v6837_v13 = vadd.f32 %v8261_v26, %v6836_v0 }
0x1350   : > { %v9392_v1 = vpop.f32.mrb[64].mxu1 }
0x1351   : > { %v6846_v2 = vpop.f32.mrb[65].mxu1  ;;  %v6852_v54 = vadd.f32 %v9392_v1, %v8261_v26 }
0x1352   : > { %v6847_v35 = vadd.f32 %v8261_v26, %v6846_v2 }
0x135e   : > { %v7012_v5 = vpop.f32.mrb[66].mxu1 }
0x135f   : > { %v9414_v50 = vpop.f32.mrb[67].mxu1 }
0x1361   : > { %v6929_v51 = vpop.f32.mrb[60].mxu0 }
0x1362   : > { %v6936_v4 = vrot.slane %v6929_v51, %v10575_v30  ;;  %v9403_v20 = vpop.f32.mrb[61].mxu0 }
0x1364   : > { %v7013_v39 = vadd.f32 %v7012_v5, %v6936_v4 }
0x1366   : > { %v7023_v42 = vrot.slane %v7013_v39, %v10571_v27  ;;  %v7345_v8 = vpop.f32.mrb[68].mxu1 }
0x1367   : > { %v9453_v9 = vpop.f32.mrb[69].mxu1  ;;  %v7352_v18 = vrot.slane %v7345_v8, %v10575_v30 }
0x1368   : > { %v7024_v11 = vcombine.high %v7023_v42, %v7023_v42  ;;  %v7031_v12 = vrot.slane %v7023_v42, %v10571_v27 }
0x136a   : > { %v7038_v14 = vrot.slane %v7024_v11, %v10571_v27  ;;  %v7039_v15 = vcombine.high %v7031_v12, %v7031_v12  ;;  %v7044_v36 = vrot.slane %v7031_v12, %v10575_v30 }
0x136c   : > { %v7040_v52 = vcombine.high %v7038_v14, %v7038_v14  ;;  %v7048_v17 = vrot.slane %v7038_v14, %v10575_v30  ;;  %v7061_v22 = vadd.f32 %v7044_v36, %v6837_v13  ;;  %v7052_v7 = vrot.slane %v7039_v15, %v10575_v30 }
0x136e   : > { %v7428_v32 = vpop.f32.mrb[70].mxu1  ;;  %v7065_v48 = vmax.f32 %v7061_v22, 0.0  ;;  %v7062_v49 = vadd.f32 %v7048_v17, %v6842_v16  ;;  %v7063_v21 = vadd.f32 %v7052_v7, %v6847_v35  ;;  %v7056_v33 = vrot.slane %v7040_v52, %v10575_v30 }
0x136f   : > { %v7429_v34 = vadd.f32 %v7428_v32, %v7352_v18  ;;  %v9464_v37 = vpop.f32.mrb[71].mxu1 }
0x1370   : > { %9423 = vmatprep.mubr.msk.f32.mxu0 %vm947_vm3, %v7065_v48  ;;  %v7066_v38 = vmax.f32 %v7062_v49, 0.0  ;;  %v7067_v40 = vmax.f32 %v7063_v21, 0.0  ;;  %v7064_v45 = vadd.f32 %v7056_v33, %v6852_v54 }
0x1371   : > { %v7439_v57 = vrot.slane %v7429_v34, %v10571_v27 }
0x1372   : > { %9424 = vmatmul.mubr.msk.f32.vlgmr.msra.gmra.mrb[62].mxu0 %vm947_vm3, %v7066_v38  ;;  %v7068_v19 = vmax.f32 %v7064_v45, 0.0 }
0x1373   : > { %9911 = vmatpush3.bf16.msra.mxu0 %v9908_v24  ;;  %9426 = vmatprep.mubr.msk.f32.mxu0 %vm947_vm3, %v7067_v40  ;;  %v7440_v58 = vcombine.high %v7439_v57, %v7439_v57  ;;  %v7447_v60 = vrot.slane %v7439_v57, %v10571_v27 }
0x1374   : > { %9913 = vmatprep.subr.bf16.mxu0 %v9912_v44 }
0x1375   : > { %v7454_v59 = vrot.slane %v7440_v58, %v10571_v27  ;;  %v7460_v1 = vrot.slane %v7447_v60, %v10575_v30  ;;  %v7455_v2 = vcombine.high %v7447_v60, %v7447_v60 }
0x1376   : > { %9427 = vmatmul.mubr.msk.f32.gmra.mrb[64].mxu0 %vm947_vm3, %v7068_v19 }
0x1377   : > { %9915 = vmatpush3.bf16.msra.mxu0 %v9912_v44  ;;  %9437 = vmatprep.mubr.msk.f32.mxu0 %vm947_vm3, %v11745_v28  ;;  %v7518_v28 = vld [vmem:[%s12026_s17 + $0x8] sm:$0xff]  ;;  %v7464_v6 = vrot.slane %v7454_v59, %v10575_v30  ;;  %v7456_v0 = vcombine.high %v7454_v59, %v7454_v59  ;;  %v7468_v26 = vrot.slane %v7455_v2, %v10575_v30 }
0x1378   : > { %9928 = vmatprep.subr.bf16.mxu0 %v10200_v3  ;;  %v9929_v43 = vpack.c.bf16 %v7518_v28, %v7517_v29 }
0x1379   : > { %v7472_v27 = vrot.slane %v7456_v0, %v10575_v30 }
0x137a   : > { %9438 = vmatmul.mubr.msk.f32.vlgmr.msra.gmra.mrb[62].mxu0 %vm947_vm3, %v11743_v25  ;;  %v7519_v25 = vld [vmem:[%s12026_s17 + $0x10] sm:$0xff] }
0x137b   : > { %9440 = vmatprep.mubr.msk.f32.mxu0 %vm947_vm3, %v11763_v53  ;;  %9930 = vmatpush3.bf16.msra.mxu0 %v9929_v43 }
0x137c   : > { %9931 = vmatprep.subr.bf16.mxu0 %v10200_v3 }
0x137e   : > { %9441 = vmatmul.mubr.msk.f32.gmra.mrb[64].mxu0 %vm947_vm3, %v11761_v46  ;;  %v7520_v46 = vld [vmem:[%s12026_s17 + $0x18] sm:$0xff] }
0x137f   : > { %9473 = vmatprep.mubr.msk.f32.mxu0 %vm10201_vm4, %v10202_v41  ;;  %v9932_v53 = vpack.c.bf16 %v7520_v46, %v7519_v25 }
0x1381   : > { %9933 = vmatpush3.bf16.msra.mxu0 %v9932_v53  ;;  %v7607_v53 = vld [vmem:[%s12028_s19] sm:$0xff] }
0x1382   : > { %v9938_v57 = vpack.c.bf16 %v7608_v47, %v7607_v53 }
0x144d   : > { %v9439_v61 = vpop.f32.mrb[62].mxu0 }
0x144e   : > { %v10004_v24 = vadd.f32 %v9439_v61, %v8273_v10  ;;  %v7257_v63 = vpop.f32.mrb[63].mxu0 }
0x144f   : > { %v10006_v3 = vadd.f32 %v8273_v10, %v7257_v63 }
0x1450   : > { %v10005_v5 = vadd.f32 %v10004_v24, %v7464_v6 }
0x1451   : > { %v10007_v50 = vadd.f32 %v10006_v3, %v7460_v1  ;;  %v9442_v51 = vpop.f32.mrb[64].mxu0 }
0x1452   : > { %v7492_v4 = vsel %vm947_vm3, %v10005_v5, -inf  ;;  %v10008_v20 = vadd.f32 %v9442_v51, %v8273_v10  ;;  %v7267_v39 = vpop.f32.mrb[65].mxu0 }
0x1453   : > { %v7493_v42 = vrot.slane %v7492_v4, 4  ;;  %v7485_v8 = vsel %vm947_vm3, %v10007_v50, -inf  ;;  %v10010_v9 = vadd.f32 %v8273_v10, %v7267_v39 }
0x1454   : > { %v7486_v11 = vrot.slane %v7485_v8, 4  ;;  %v10009_v12 = vadd.f32 %v10008_v20, %v7472_v27 }
0x1455   : > { %v7494_v13 = vmax.f32 %v7492_v4, %v7493_v42  ;;  %v10011_v14 = vadd.f32 %v10010_v9, %v7468_v26 }
0x1456   : > { %v7487_v15 = vmax.f32 %v7485_v8, %v7486_v11  ;;  %v7506_v36 = vsel %vm947_vm3, %v10009_v12, -inf }
0x1457   : > { %v7495_v16 = vrot.slane %v7494_v13, 2  ;;  %v7507_v35 = vrot.slane %v7506_v36, 4  ;;  %v7499_v52 = vsel %vm947_vm3, %v10011_v14, -inf }
0x1458   : > { %v7488_v17 = vrot.slane %v7487_v15, 2  ;;  %v7500_v22 = vrot.slane %v7499_v52, 4 }
0x1459   : > { %v7496_v7 = vmax.f32 %v7494_v13, %v7495_v16  ;;  %v7508_v54 = vmax.f32 %v7506_v36, %v7507_v35 }
0x145a   : > { %v7489_v18 = vmax.f32 %v7487_v15, %v7488_v17  ;;  %v7501_v23 = vmax.f32 %v7499_v52, %v7500_v22 }
0x145b   : > { %v7497_v31 = vrot.slane %v7496_v7, 1  ;;  %v7509_v30 = vrot.slane %v7508_v54, 2 }
0x145c   : > { %v7490_v32 = vrot.slane %v7489_v18, 1  ;;  %v7502_v48 = vrot.slane %v7501_v23, 2 }
0x145d   : > { %v7498_v49 = vmax.f32 %v7496_v7, %v7497_v31  ;;  %v7510_v21 = vmax.f32 %v7508_v54, %v7509_v30 }
0x145e   : > { %v7491_v33 = vmax.f32 %v7489_v18, %v7490_v32  ;;  %v7503_v34 = vmax.f32 %v7501_v23, %v7502_v48 }
0x145f   : > { %v7514_v37 = vmax.f32 %v7498_v49, 0.0  ;;  %v7511_v38 = vrot.slane %v7510_v21, 1 }
0x1460   : > { %v7513_v40 = vmax.f32 %v7491_v33, 0.0  ;;  %v7504_v44 = vrot.slane %v7503_v34, 1 }
0x1461   : > { %v7512_v45 = vmax.f32 %v7510_v21, %v7511_v38 }
0x1462   : > { %v7505_v19 = vmax.f32 %v7503_v34, %v7504_v44  ;;  %v7532_v29 = vsel %vm1305_vm5, %v7514_v37, %v7513_v40 }
0x1463   : > { %v7516_v43 = vmax.f32 %v7512_v45, 0.0 }
0x1464   : > { %v7515_v28 = vmax.f32 %v7505_v19, 0.0 }
0x1466   : > { %v7533_v25 = vsel %vm1307_vm6, %v7515_v28, %v7532_v29 }
0x1467   : > { %v7534_v46 = vsel %vm1309_vm7, %v7516_v43, %v7533_v25 }
0x1468   : > { %9474 = vmatmul.mubr.msk.f32.vlgmr.msra.gmra.mrb[66].mxu0 %vm947_vm3, %v7534_v46 }
0x153b   : > { %v7603_v56 = vpop.f32.mrb[66].mxu0 }
0x153c   : > { %v7604_v58 = vadd.f32 %v8284_v55, %v7603_v56  ;;  %v9475_v59 = vpop.f32.mrb[67].mxu0 }
0x153e   : > { %9481 = vmatmul.mubr.msk.f32.vlgmr.msra.gmra.mrb[72].mxu1 %vm7611_vm10, %v7604_v58 }
0x153f   : > { %9939 = vmatpush3.bf16.msra.mxu1 %v9938_v57  ;;  %9487 = vmatprep.mubr.msk.f32.mxu1 %vm10201_vm4, %v10202_v41 }
0x1542   : > { %9488 = vmatmul.mubr.msk.f32.vlgmr.msra.gmra.mrb[74].mxu1 %vm7611_vm10, %v11106_v62 }
0x1543   : > { %10117 = shalt.err (!%p10114_p3)
}
0x1544   : > { %s10118_s24 = scalar_lea.hbm %s11934_s2, 64  ;;  %s10122_s26 = scalar_lea.hbm %s12030_s21, 128 }
0x1545   : > { %p10119_p4 = scmp.ne.s32.totalorder %s11934_s2, %s10118_s24  ;;  %p10123_p9 = scmp.lt.u32.totalorder %s11934_s2, %s12030_s21 }
0x1546   : > { %p10124_p10 = scmp.lt.u32.totalorder %s10122_s26, %s10118_s24  ;;  %p10126_p12 = scmp.lt.u32.totalorder %s10118_s24, %s11934_s2 }
0x1547   : > { %p10120_p7 = pnand %p10119_p4, %p10359_p5 }
0x1548   : > { %p10125_p11 = por %p10124_p10, %p10123_p9 }
0x1549   : > { %p10121_p8 = pneg %p10120_p7 }
0x154a   : > { %p10127_p13 = por %p10126_p12, %p10125_p11 }
0x154c   : > { %p10128_p0 = pnand %p10127_p13, %p10121_p8 }
0x154e   : > { %10131 = shalt.err (!%p10128_p0)
}
0x154f   : > { %10052 = dma.vmem_to_hbm [thread:$0]  (%p10359_p5), %s7787_s7, 64, %s11934_s2, %s7768_s0   ;;  %v8288_v10 = vld [vmem:[%s12029_s20] ss:$0 sm:$0xff] }
0x1550   : > { %s12077_s29 = sshll.u32 %s11098_s30, 2  ;;  %s12078_s1 = sshll.u32 %s10342_s4, 6 }
0x1551   : > { %s687_s24 = scalar_lea.vmem [#allocation4], %s12077_s29  ;;  %s12079_s9 = sld [smem:[#allocation25_spill]] }
0x1552   : > { %s7799_s3 = sshll.u32 %s687_s24, 4  ;;  %s7773_s2 = scalar_lea.sflag [#allocation5], %s11098_s30  ;;  %s11967_s3 = int_to_ptr.vmem [resolvable:$true] %s7799_s3 }
0x1553   : > { %s10132_s7 = scalar_lea.vmem %s11967_s3, 64  ;;  %s10205_s0 = smov [#allocation4]  }
0x1554   : > { %p10133_p1 = scmp.ne.s32.totalorder %s11967_s3, %s10132_s7  ;;  %s10136_s4 = sshll.u32 %s10205_s0, 4  ;;  %s10137_s4 = int_to_ptr.vmem [resolvable:$false] %s10136_s4 }
0x1555   : > { %s10138_s8 = scalar_lea.vmem %s10137_s4, 128  ;;  %p10139_p4 = scmp.lt.s32.totalorder %s11967_s3, %s10137_s4 }
0x1556   : > { %p10134_p2 = pnand %p10133_p1, %p10359_p5  ;;  %p10140_p7 = scmp.lt.s32.totalorder %s10138_s8, %s10132_s7 }
0x1557   : > { %s11965_s10 = scalar_lea.hbm %s12079_s9, %s12078_s1 }
0x1558   : > { %p10135_p3 = pneg %p10134_p2  ;;  %p10141_p8 = por %p10140_p7, %p10139_p4 }
0x155a   : > { %p10142_p9 = pnand %p10141_p8, %p10135_p3 }
0x1611   : > { %v7681_v41 = vpop.f32.mrb[72].mxu1 }
0x1612   : > { %v9482_v62 = vpop.f32.mrb[73].mxu1 }
0x1615   : > { %v7754_v60 = vpop.f32.mrb[74].mxu1 }
0x1616   : > { %v7755_v61 = vadd.f32 %v7754_v60, %v7681_v41  ;;  %v9489_v6 = vpop.f32.mrb[75].mxu1 }
0x1618   : > { %v7765_v24 = vadd.f32 %v8288_v10, %v7755_v61 }
0x161a   : > { %7766 = vst.msk [vmem:[%s687_s24] sm:$0xf] %vm3787_vm8, %v7765_v24 }
0x161b   : > { %10145 = shalt.err (!%p10142_p9)
}
0x161c   : > { %s10146_s30 = scalar_lea.hbm %s11965_s10, 64  ;;  %s10150_s24 = scalar_lea.hbm %s12079_s9, 128 }
0x161d   : > { %p10147_p10 = scmp.ne.s32.totalorder %s11965_s10, %s10146_s30  ;;  %p10151_p13 = scmp.lt.u32.totalorder %s11965_s10, %s12079_s9 }
0x161e   : > { %p10152_p0 = scmp.lt.u32.totalorder %s10150_s24, %s10146_s30  ;;  %p10154_p2 = scmp.lt.u32.totalorder %s10146_s30, %s11965_s10 }
0x161f   : > { %p10148_p11 = pnand %p10147_p10, %p10359_p5 }
0x1620   : > { %p10153_p1 = por %p10152_p0, %p10151_p13 }
0x1621   : > { %p10149_p12 = pneg %p10148_p11 }
0x1622   : > { %p10155_p3 = por %p10154_p2, %p10153_p1 }
0x1624   : > { %p10156_p4 = pnand %p10155_p3, %p10149_p12 }
0x1626   : > { %10159 = shalt.err (!%p10156_p4)
}
0x1627   : > { %10053 = dma.vmem_to_hbm [thread:$0]  (%p10359_p5), %s11967_s3, 64, %s11965_s10, %s7773_s2  }
0x1628 PF: > { %s12080_s22 = sld [smem:[#allocation10_spill]]  ;;  %s12081_s7 = sld [smem:[#allocation8_spill]] }
0x162e   : > { %p10063_p7 = scmp.ge.s32.totalorder %s12080_s22, 2  ;;  %s7811_s4 = sand.u32 1, %s12081_s7  }
0x162f   : > { %s7812_s8 = scalar_lea.sflag [#allocation3], %s7811_s4 }
0x1630   : > { %p10057_p8 = pnand %p10063_p7, %p10363_p6 }
0x1632   : > { %10177 = dma.done.wait (!%p10057_p8), %s7812_s8, 64  }
0x1633   : > { %10179 = vsyncadd (!%p10057_p8), %s7812_s8, 4294967232  ;;  %s7821_s30 = scalar_lea.sflag [#allocation5], %s7811_s4 }
0x1634   : > { %10181 = dma.done.wait (!%p10057_p8), %s7821_s30, 64  }
0x1635   : > { %10183 = vsyncadd (!%p10057_p8), %s7821_s30, 4294967232  ;;  %s12083_s30 = sld [smem:[#allocation11_spill]]  ;;  %s12084_s6 = sld [smem:[#allocation9_spill]] }
0x1636   : > { %s12085_s29 = sld [smem:[#allocation12_spill]]  ;;  %s12086_s3 = smov %s10190_s28 }
0x163b   : > { %p36_p5 = scmp.ge.s32.totalorder %s12083_s30, 4   ;;  %s12087_s28 = smov %s12084_s6 }
0x163d   :  { %38 = sbr.rel (!%p36_p5) target bundleno = 18 (0x12), region = 196 }
0x1644   :  { %7826 = vsyncpa [#allocation3], 1 }
0x1645   :  { %7828 = vsyncpa [#allocation3 + $0x1], 1 }
0x1646   :  { %7829 = vsyncpa [#allocation5], 1 }
0x1647   :  { %7831 = vsyncpa [#allocation5 + $0x1], 1 }

</bundles_post_ra>
